<compile_context>
chip_gen: v7x
topology: tpu7x:2x2x1
jax: 0.10.0
libtpu: 0.0.40
codegen_flags: <defaults>
</compile_context>

<pallas_src>
import functools

import numpy as np
import jax
import jax.numpy as jnp
from jax import lax
from jax.experimental import pallas as pl
from jax.experimental.pallas import tpu as pltpu


_BLOCK_B = 8  # samples per grid step (tunable; keep a multiple of 8)


# ---------------------------------------------------------------------------
# Fused forward kernel: one grid step == B samples
# ---------------------------------------------------------------------------
def _dcdf_kernel(x_ref, w1_ref, b1_ref, w2_ref, b2_ref,
                 wf1_ref, bf1_ref, wf2_ref, bf2_ref,
                 out_ref,
                 c1_ref, c2_ref):
    B = x_ref.shape[0]

    # ---------------- conv1: 5x5, 1 -> 10 as 5 band matmuls -------------------
    # rows = (b, h) ; columns = (w, co) ordered [w even | w odd]  -> (B*24, 240)
    acc1 = jnp.zeros((B * 24, 240), jnp.float32)
    for di in range(5):
        rows = x_ref[:, di:di + 24, :].reshape(B * 24, 28)           # (B*24, 28)
        acc1 = acc1 + jnp.dot(rows, w1_ref[di],
                              preferred_element_type=jnp.float32)
    acc1 = acc1 + b1_ref[...]                                        # (1, 240) bcast

    # 2x2 max-pool: width via even/odd column blocks (pure VPU max), height via
    # strided sublane reads from a VMEM scratch; then ReLU.
    m1 = jnp.maximum(acc1[:, :120], acc1[:, 120:])                   # (B*24, 120)
    c1_ref[...] = m1.reshape(B, 24, 120)
    h1 = jnp.maximum(
        jnp.maximum(c1_ref[:, pl.ds(0, 12, 2), :],
                    c1_ref[:, pl.ds(1, 12, 2), :]), 0.0)             # (B, 12, 120)

    # ---------------- conv2: 5x5, 10 -> 20 as 5 band matmuls ------------------
    # TODO(synk): nn.Dropout2d implemented with eval (identity) semantics.
    # rows = (b, p) ; columns = (q, c2) ordered [q even | q odd]  -> (B*8, 160)
    acc2 = jnp.zeros((B * 8, 160), jnp.float32)
    for di in range(5):
        rows = h1[:, di:di + 8, :].reshape(B * 8, 120)               # (B*8, 120)
        acc2 = acc2 + jnp.dot(rows, w2_ref[di],
                              preferred_element_type=jnp.float32)
    acc2 = acc2 + b2_ref[...]                                        # (1, 160) bcast

    # width pool (even/odd lanes blocks), store, height pool fused into fc1 below
    m2 = jnp.maximum(acc2[:, :80], acc2[:, 80:])                     # (B*8, 80)
    c2_ref[...] = m2                                                 # rows = b*8 + p

    # ---------------- maxpool(h) + relu + fc1 (+ relu) -------------------------
    # z1[b, :] = sum_r relu(max(row p=2r, row p=2r+1)) @ Wf1[r]
    z1 = jnp.zeros((B, 50), jnp.float32)
    for r in range(4):
        even = c2_ref[pl.ds(2 * r, B, 8), :]                         # (B, 80), p=2r
        odd = c2_ref[pl.ds(2 * r + 1, B, 8), :]                      # (B, 80), p=2r+1
        h2r = jnp.maximum(jnp.maximum(even, odd), 0.0)
        z1 = z1 + jnp.dot(h2r, wf1_ref[r], preferred_element_type=jnp.float32)
    z1 = jnp.maximum(z1 + bf1_ref[...], 0.0)                         # (B, 50)

    # TODO(synk): F.dropout implemented with eval (identity) semantics.

    # ---------------- fc2 + log_softmax ---------------------------------------
    logits = (jnp.dot(z1, wf2_ref[...], preferred_element_type=jnp.float32)
              + bf2_ref[...])                                        # (B, 10)
    m = jnp.max(logits, axis=-1, keepdims=True)
    lse = m + jnp.log(jnp.sum(jnp.exp(logits - m), axis=-1, keepdims=True))
    out_ref[...] = logits - lse


# ---------------------------------------------------------------------------
# Wrapper
# ---------------------------------------------------------------------------
@functools.partial(jax.jit, static_argnames=("block_b",))
def dcdf_forward(x_nchw, packed, block_b=_BLOCK_B):
    N = x_nchw.shape[0]
    x = x_nchw.astype(jnp.float32).reshape(N, 28, 28)                # drop C=1
    pad = (-N) % block_b
    if pad:
        x = jnp.pad(x, ((0, pad), (0, 0), (0, 0)))
    n_pad = N + pad
    B = block_b

    out = pl.pallas_call(
        _dcdf_kernel,
        out_shape=jax.ShapeDtypeStruct((n_pad, 10), jnp.float32),
        grid=(n_pad // B,),
        in_specs=[
            pl.BlockSpec((B, 28, 28), lambda g: (g, 0, 0)),          # x block
            pl.BlockSpec((5, 28, 240), lambda g: (0, 0, 0)),         # conv1 bands
            pl.BlockSpec((1, 240), lambda g: (0, 0)),                # conv1 bias (tiled)
            pl.BlockSpec((5, 120, 160), lambda g: (0, 0, 0)),        # conv2 bands
            pl.BlockSpec((1, 160), lambda g: (0, 0)),                # conv2 bias (tiled)
            pl.BlockSpec((4, 80, 50), lambda g: (0, 0, 0)),          # fc1 w (per pooled row)
            pl.BlockSpec((1, 50), lambda g: (0, 0)),                 # fc1 b
            pl.BlockSpec((50, 10), lambda g: (0, 0)),                # fc2 w^T
            pl.BlockSpec((1, 10), lambda g: (0, 0)),                 # fc2 b
        ],
        out_specs=pl.BlockSpec((B, 10), lambda g: (g, 0)),
        scratch_shapes=[
            pltpu.VMEM((B, 24, 120), jnp.float32),                   # conv1 (w-pooled)
            pltpu.VMEM((B * 8, 80), jnp.float32),                    # conv2 (w-pooled)
        ],
        compiler_params=pltpu.CompilerParams(
            dimension_semantics=("parallel",)),                      # v7x: 2 TCs
    )(x, packed["w1b"], packed["b1"], packed["w2b"], packed["b2"],
      packed["wf1"], packed["bf1"], packed["wf2"], packed["bf2"])
    return out[:N]


# ---------------------------------------------------------------------------
# One-time parameter packing (outside the jitted forward)
# ---------------------------------------------------------------------------
def pack_params(params):
    k1 = np.asarray(params["conv1_w"], np.float32)                   # (10, 1, 5, 5)
    k2 = np.asarray(params["conv2_w"], np.float32)                   # (20, 10, 5, 5)

    # conv1 band matrices: out1[(b,h), col(w,co)] = sum_di x_row(h+di) @ w1b[di]
    # column order: [w even | w odd] so width-pooling is max of two lane slices.
    w1b = np.zeros((5, 28, 240), np.float32)
    for di in range(5):
        for w in range(24):
            col0 = (w // 2) * 10 + (0 if w % 2 == 0 else 120)
            for dj in range(5):
                w1b[di, w + dj, col0:col0 + 10] = k1[:, 0, di, dj]
    b1 = np.tile(np.asarray(params["conv1_b"], np.float32), 24).reshape(1, 240)

    # conv2 band matrices over lanes (u', ci) -> columns (q, c2), [q even | q odd]
    w2b = np.zeros((5, 120, 160), np.float32)
    for di in range(5):
        for q in range(8):
            col0 = (q // 2) * 20 + (0 if q % 2 == 0 else 80)
            for dj in range(5):
                for ci in range(10):
                    w2b[di, (q + dj) * 10 + ci, col0:col0 + 20] = k2[:, ci, di, dj]
    b2 = np.tile(np.asarray(params["conv2_b"], np.float32), 8).reshape(1, 160)

    # fc1: kernel feature layout per pooled row r is lane = v*20 + c2 ;
    # PyTorch flatten index is c2*16 + r*4 + v  ->  permute once here.
    wf1 = np.asarray(params["fc1_w"], np.float32).reshape(50, 20, 4, 4)  # (o,c2,r,v)
    wf1 = wf1.transpose(2, 3, 1, 0).reshape(4, 80, 50)                   # [r, v*20+c2, o]

    return {
        "w1b": jnp.asarray(w1b), "b1": jnp.asarray(b1),
        "w2b": jnp.asarray(w2b), "b2": jnp.asarray(b2),
        "wf1": jnp.asarray(wf1),
        "bf1": jnp.asarray(params["fc1_b"]).reshape(1, 50),
        "wf2": jnp.asarray(params["fc2_w"]).T,                       # (50, 10)
        "bf2": jnp.asarray(params["fc2_b"]).reshape(1, 10),
    }


def init_params(key):
    def uniform(k, shape, fan_in):
        bound = 1.0 / jnp.sqrt(float(fan_in))
        return jax.random.uniform(k, shape, jnp.float32, -bound, bound)

    ks = jax.random.split(key, 8)
    return {
        "conv1_w": uniform(ks[0], (10, 1, 5, 5), 1 * 5 * 5),
        "conv1_b": uniform(ks[1], (10,), 1 * 5 * 5),
        "conv2_w": uniform(ks[2], (20, 10, 5, 5), 10 * 5 * 5),
        "conv2_b": uniform(ks[3], (20,), 10 * 5 * 5),
        "fc1_w": uniform(ks[4], (50, 320), 320),
        "fc1_b": uniform(ks[5], (50,), 320),
        "fc2_w": uniform(ks[6], (10, 50), 50),
        "fc2_b": uniform(ks[7], (10,), 50),
    }


# ---------------------------------------------------------------------------
# Pure-JAX reference (mirrors the PyTorch module, eval mode) for a sanity check
# ---------------------------------------------------------------------------
def reference_forward(x_nchw, params):
    hp = lax.Precision.HIGHEST
    c1 = lax.conv_general_dilated(
        x_nchw, params["conv1_w"], (1, 1), "VALID",
        dimension_numbers=("NCHW", "OIHW", "NCHW"), precision=hp)
    c1 = c1 + params["conv1_b"][None, :, None, None]
    h1 = jnp.maximum(lax.reduce_window(c1, -jnp.inf, lax.max,
                                       (1, 1, 2, 2), (1, 1, 2, 2), "VALID"), 0.0)
    c2 = lax.conv_general_dilated(
        h1, params["conv2_w"], (1, 1), "VALID",
        dimension_numbers=("NCHW", "OIHW", "NCHW"), precision=hp)
    c2 = c2 + params["conv2_b"][None, :, None, None]
    h2 = jnp.maximum(lax.reduce_window(c2, -jnp.inf, lax.max,
                                       (1, 1, 2, 2), (1, 1, 2, 2), "VALID"), 0.0)
    flat = h2.reshape(x_nchw.shape[0], 320)
    f1 = jnp.maximum(jnp.dot(flat, params["fc1_w"].T, precision=hp) + params["fc1_b"], 0.0)
    logits = jnp.dot(f1, params["fc2_w"].T, precision=hp) + params["fc2_b"]
    return jax.nn.log_softmax(logits, axis=1)


if __name__ == "__main__":
    key = jax.random.PRNGKey(0)
    pkey, xkey = jax.random.split(key)
    params = init_params(pkey)
    packed = pack_params(params)

    # MNIST-shaped input (28x28 so the flatten yields 320); N=16 -> grid=(2,).
    x = jax.random.normal(xkey, (16, 1, 28, 28), jnp.float32)

    out = jax.block_until_ready(dcdf_forward(x, packed))
    assert out.shape == (16, 10)
    assert bool(jnp.all(jnp.isfinite(out)))

    ref = jax.block_until_ready(reference_forward(x, params))
    max_err = float(jnp.max(jnp.abs(out - ref)))
    assert max_err < 1e-3, max_err

    print("KERNEL_OK")
</pallas_src>

<mosaic_0001>
module attributes {stable_mosaic.version = 11 : i64} {
  func.func @_dcdf_kernel(%arg0: i32, %arg1: memref<8x28x28xf32, #tpu.memory_space<vmem>>, %arg2: memref<5x28x240xf32, #tpu.memory_space<vmem>>, %arg3: memref<1x240xf32, #tpu.memory_space<vmem>>, %arg4: memref<5x120x160xf32, #tpu.memory_space<vmem>>, %arg5: memref<1x160xf32, #tpu.memory_space<vmem>>, %arg6: memref<4x80x50xf32, #tpu.memory_space<vmem>>, %arg7: memref<1x50xf32, #tpu.memory_space<vmem>>, %arg8: memref<50x10xf32, #tpu.memory_space<vmem>>, %arg9: memref<1x10xf32, #tpu.memory_space<vmem>>, %arg10: memref<8x10xf32, #tpu.memory_space<vmem>>, %arg11: memref<8x24x120xf32, #tpu.memory_space<vmem>>, %arg12: memref<64x80xf32, #tpu.memory_space<vmem>>) attributes {dimension_semantics = [#tpu.dimension_semantics<parallel>], iteration_bounds = array<i64: 2>, scalar_prefetch = 0 : i64, scratch_operands = 2 : i64, tpu.core_type = #tpu.core_type<tc>, window_params = [{transform_indices = @transform_0, window_bounds = array<i64: 8, 28, 28>}, {pipeline_mode = #tpu.pipeline_mode<synchronous>, transform_indices = @transform_1, window_bounds = array<i64: 5, 28, 240>}, {pipeline_mode = #tpu.pipeline_mode<synchronous>, transform_indices = @transform_2, window_bounds = array<i64: 1, 240>}, {pipeline_mode = #tpu.pipeline_mode<synchronous>, transform_indices = @transform_3, window_bounds = array<i64: 5, 120, 160>}, {pipeline_mode = #tpu.pipeline_mode<synchronous>, transform_indices = @transform_4, window_bounds = array<i64: 1, 160>}, {pipeline_mode = #tpu.pipeline_mode<synchronous>, transform_indices = @transform_5, window_bounds = array<i64: 4, 80, 50>}, {pipeline_mode = #tpu.pipeline_mode<synchronous>, transform_indices = @transform_6, window_bounds = array<i64: 1, 50>}, {pipeline_mode = #tpu.pipeline_mode<synchronous>, transform_indices = @transform_7, window_bounds = array<i64: 50, 10>}, {pipeline_mode = #tpu.pipeline_mode<synchronous>, transform_indices = @transform_8, window_bounds = array<i64: 1, 10>}, {transform_indices = @transform_9, window_bounds = array<i64: 8, 10>}]} {
    %cst = arith.constant 0.000000e+00 : f32
    %0 = vector.broadcast %cst : f32 to vector<192x240xf32>
    %c0 = arith.constant 0 : index
    %c0_0 = arith.constant 0 : index
    %c0_1 = arith.constant 0 : index
    %1 = vector.load %arg1[%c0, %c0_0, %c0_1] : memref<8x28x28xf32, #tpu.memory_space<vmem>>, vector<8x24x28xf32>
    %2 = vector.shape_cast %1 : vector<8x24x28xf32> to vector<192x28xf32>
    %c0_2 = arith.constant 0 : index
    %c0_3 = arith.constant 0 : index
    %c0_4 = arith.constant 0 : index
    %3 = vector.load %arg2[%c0_2, %c0_3, %c0_4] : memref<5x28x240xf32, #tpu.memory_space<vmem>>, vector<1x28x240xf32>
    %4 = vector.shape_cast %3 : vector<1x28x240xf32> to vector<28x240xf32>
    %cst_5 = arith.constant dense<0.000000e+00> : vector<192x240xf32>
    %5 = tpu.matmul %2, %4, %cst_5 {dimension_numbers = #tpu.dot_dimension_numbers<[1], [0], [0], [1], [0, 0, 1, 1], [], []>} : vector<192x28xf32>, vector<28x240xf32>, vector<192x240xf32> -> vector<192x240xf32>
    %6 = arith.addf %0, %5 : vector<192x240xf32>
    %c0_6 = arith.constant 0 : index
    %c1 = arith.constant 1 : index
    %c0_7 = arith.constant 0 : index
    %7 = vector.load %arg1[%c0_6, %c1, %c0_7] : memref<8x28x28xf32, #tpu.memory_space<vmem>>, vector<8x24x28xf32>
    %8 = vector.shape_cast %7 : vector<8x24x28xf32> to vector<192x28xf32>
    %c1_8 = arith.constant 1 : index
    %c0_9 = arith.constant 0 : index
    %c0_10 = arith.constant 0 : index
    %9 = vector.load %arg2[%c1_8, %c0_9, %c0_10] : memref<5x28x240xf32, #tpu.memory_space<vmem>>, vector<1x28x240xf32>
    %10 = vector.shape_cast %9 : vector<1x28x240xf32> to vector<28x240xf32>
    %cst_11 = arith.constant dense<0.000000e+00> : vector<192x240xf32>
    %11 = tpu.matmul %8, %10, %cst_11 {dimension_numbers = #tpu.dot_dimension_numbers<[1], [0], [0], [1], [0, 0, 1, 1], [], []>} : vector<192x28xf32>, vector<28x240xf32>, vector<192x240xf32> -> vector<192x240xf32>
    %12 = arith.addf %6, %11 : vector<192x240xf32>
    %c0_12 = arith.constant 0 : index
    %c2 = arith.constant 2 : index
    %c0_13 = arith.constant 0 : index
    %13 = vector.load %arg1[%c0_12, %c2, %c0_13] : memref<8x28x28xf32, #tpu.memory_space<vmem>>, vector<8x24x28xf32>
    %14 = vector.shape_cast %13 : vector<8x24x28xf32> to vector<192x28xf32>
    %c2_14 = arith.constant 2 : index
    %c0_15 = arith.constant 0 : index
    %c0_16 = arith.constant 0 : index
    %15 = vector.load %arg2[%c2_14, %c0_15, %c0_16] : memref<5x28x240xf32, #tpu.memory_space<vmem>>, vector<1x28x240xf32>
    %16 = vector.shape_cast %15 : vector<1x28x240xf32> to vector<28x240xf32>
    %cst_17 = arith.constant dense<0.000000e+00> : vector<192x240xf32>
    %17 = tpu.matmul %14, %16, %cst_17 {dimension_numbers = #tpu.dot_dimension_numbers<[1], [0], [0], [1], [0, 0, 1, 1], [], []>} : vector<192x28xf32>, vector<28x240xf32>, vector<192x240xf32> -> vector<192x240xf32>
    %18 = arith.addf %12, %17 : vector<192x240xf32>
    %c0_18 = arith.constant 0 : index
    %c3 = arith.constant 3 : index
    %c0_19 = arith.constant 0 : index
    %19 = vector.load %arg1[%c0_18, %c3, %c0_19] : memref<8x28x28xf32, #tpu.memory_space<vmem>>, vector<8x24x28xf32>
    %20 = vector.shape_cast %19 : vector<8x24x28xf32> to vector<192x28xf32>
    %c3_20 = arith.constant 3 : index
    %c0_21 = arith.constant 0 : index
    %c0_22 = arith.constant 0 : index
    %21 = vector.load %arg2[%c3_20, %c0_21, %c0_22] : memref<5x28x240xf32, #tpu.memory_space<vmem>>, vector<1x28x240xf32>
    %22 = vector.shape_cast %21 : vector<1x28x240xf32> to vector<28x240xf32>
    %cst_23 = arith.constant dense<0.000000e+00> : vector<192x240xf32>
    %23 = tpu.matmul %20, %22, %cst_23 {dimension_numbers = #tpu.dot_dimension_numbers<[1], [0], [0], [1], [0, 0, 1, 1], [], []>} : vector<192x28xf32>, vector<28x240xf32>, vector<192x240xf32> -> vector<192x240xf32>
    %24 = arith.addf %18, %23 : vector<192x240xf32>
    %c0_24 = arith.constant 0 : index
    %c4 = arith.constant 4 : index
    %c0_25 = arith.constant 0 : index
    %25 = vector.load %arg1[%c0_24, %c4, %c0_25] : memref<8x28x28xf32, #tpu.memory_space<vmem>>, vector<8x24x28xf32>
    %26 = vector.shape_cast %25 : vector<8x24x28xf32> to vector<192x28xf32>
    %c4_26 = arith.constant 4 : index
    %c0_27 = arith.constant 0 : index
    %c0_28 = arith.constant 0 : index
    %27 = vector.load %arg2[%c4_26, %c0_27, %c0_28] : memref<5x28x240xf32, #tpu.memory_space<vmem>>, vector<1x28x240xf32>
    %28 = vector.shape_cast %27 : vector<1x28x240xf32> to vector<28x240xf32>
    %cst_29 = arith.constant dense<0.000000e+00> : vector<192x240xf32>
    %29 = tpu.matmul %26, %28, %cst_29 {dimension_numbers = #tpu.dot_dimension_numbers<[1], [0], [0], [1], [0, 0, 1, 1], [], []>} : vector<192x28xf32>, vector<28x240xf32>, vector<192x240xf32> -> vector<192x240xf32>
    %30 = arith.addf %24, %29 : vector<192x240xf32>
    %c0_30 = arith.constant 0 : index
    %c0_31 = arith.constant 0 : index
    %31 = vector.load %arg3[%c0_30, %c0_31] : memref<1x240xf32, #tpu.memory_space<vmem>>, vector<1x240xf32>
    %32 = vector.broadcast %31 : vector<1x240xf32> to vector<192x240xf32>
    %33 = arith.addf %30, %32 : vector<192x240xf32>
    %34 = vector.extract_strided_slice %33 {offsets = [0, 0], sizes = [192, 120], strides = [1, 1]} : vector<192x240xf32> to vector<192x120xf32>
    %35 = vector.extract_strided_slice %33 {offsets = [0, 120], sizes = [192, 120], strides = [1, 1]} : vector<192x240xf32> to vector<192x120xf32>
    %36 = arith.maximumf %34, %35 : vector<192x120xf32>
    %37 = vector.shape_cast %36 : vector<192x120xf32> to vector<8x24x120xf32>
    %c0_32 = arith.constant 0 : index
    %c0_33 = arith.constant 0 : index
    %c0_34 = arith.constant 0 : index
    %38 = vector.load %arg11[%c0_32, %c0_33, %c0_34] : memref<8x24x120xf32, #tpu.memory_space<vmem>>, vector<8x24x120xf32>
    tpu.vector_store %arg11[%c0_32, %c0_33, %c0_34], %37 {strides = array<i32>} : memref<8x24x120xf32, #tpu.memory_space<vmem>>, vector<8x24x120xf32>,
    %c0_35 = arith.constant 0 : index
    %c0_36 = arith.constant 0 : index
    %c0_37 = arith.constant 0 : index
    %39 = tpu.strided_load %arg11[%c0_35, %c0_36, %c0_37] {strides = array<i32: 1, 2, 1>} : memref<8x24x120xf32, #tpu.memory_space<vmem>>, vector<8x12x120xf32>
    %c0_38 = arith.constant 0 : index
    %c1_39 = arith.constant 1 : index
    %c0_40 = arith.constant 0 : index
    %40 = tpu.strided_load %arg11[%c0_38, %c1_39, %c0_40] {strides = array<i32: 1, 2, 1>} : memref<8x24x120xf32, #tpu.memory_space<vmem>>, vector<8x12x120xf32>
    %41 = arith.maximumf %39, %40 : vector<8x12x120xf32>
    %cst_41 = arith.constant 0.000000e+00 : f32
    %42 = vector.broadcast %cst_41 : f32 to vector<8x12x120xf32>
    %43 = arith.maximumf %41, %42 : vector<8x12x120xf32>
    %cst_42 = arith.constant 0.000000e+00 : f32
    %44 = vector.broadcast %cst_42 : f32 to vector<64x160xf32>
    %45 = vector.extract_strided_slice %43 {offsets = [0, 0, 0], sizes = [8, 8, 120], strides = [1, 1, 1]} : vector<8x12x120xf32> to vector<8x8x120xf32>
    %46 = vector.shape_cast %45 : vector<8x8x120xf32> to vector<64x120xf32>
    %c0_43 = arith.constant 0 : index
    %c0_44 = arith.constant 0 : index
    %c0_45 = arith.constant 0 : index
    %47 = vector.load %arg4[%c0_43, %c0_44, %c0_45] : memref<5x120x160xf32, #tpu.memory_space<vmem>>, vector<1x120x160xf32>
    %48 = vector.shape_cast %47 : vector<1x120x160xf32> to vector<120x160xf32>
    %cst_46 = arith.constant dense<0.000000e+00> : vector<64x160xf32>
    %49 = tpu.matmul %46, %48, %cst_46 {dimension_numbers = #tpu.dot_dimension_numbers<[1], [0], [0], [1], [0, 0, 1, 1], [], []>} : vector<64x120xf32>, vector<120x160xf32>, vector<64x160xf32> -> vector<64x160xf32>
    %50 = arith.addf %44, %49 : vector<64x160xf32>
    %51 = vector.extract_strided_slice %43 {offsets = [0, 1, 0], sizes = [8, 8, 120], strides = [1, 1, 1]} : vector<8x12x120xf32> to vector<8x8x120xf32>
    %52 = vector.shape_cast %51 : vector<8x8x120xf32> to vector<64x120xf32>
    %c1_47 = arith.constant 1 : index
    %c0_48 = arith.constant 0 : index
    %c0_49 = arith.constant 0 : index
    %53 = vector.load %arg4[%c1_47, %c0_48, %c0_49] : memref<5x120x160xf32, #tpu.memory_space<vmem>>, vector<1x120x160xf32>
    %54 = vector.shape_cast %53 : vector<1x120x160xf32> to vector<120x160xf32>
    %cst_50 = arith.constant dense<0.000000e+00> : vector<64x160xf32>
    %55 = tpu.matmul %52, %54, %cst_50 {dimension_numbers = #tpu.dot_dimension_numbers<[1], [0], [0], [1], [0, 0, 1, 1], [], []>} : vector<64x120xf32>, vector<120x160xf32>, vector<64x160xf32> -> vector<64x160xf32>
    %56 = arith.addf %50, %55 : vector<64x160xf32>
    %57 = vector.extract_strided_slice %43 {offsets = [0, 2, 0], sizes = [8, 8, 120], strides = [1, 1, 1]} : vector<8x12x120xf32> to vector<8x8x120xf32>
    %58 = vector.shape_cast %57 : vector<8x8x120xf32> to vector<64x120xf32>
    %c2_51 = arith.constant 2 : index
    %c0_52 = arith.constant 0 : index
    %c0_53 = arith.constant 0 : index
    %59 = vector.load %arg4[%c2_51, %c0_52, %c0_53] : memref<5x120x160xf32, #tpu.memory_space<vmem>>, vector<1x120x160xf32>
    %60 = vector.shape_cast %59 : vector<1x120x160xf32> to vector<120x160xf32>
    %cst_54 = arith.constant dense<0.000000e+00> : vector<64x160xf32>
    %61 = tpu.matmul %58, %60, %cst_54 {dimension_numbers = #tpu.dot_dimension_numbers<[1], [0], [0], [1], [0, 0, 1, 1], [], []>} : vector<64x120xf32>, vector<120x160xf32>, vector<64x160xf32> -> vector<64x160xf32>
    %62 = arith.addf %56, %61 : vector<64x160xf32>
    %63 = vector.extract_strided_slice %43 {offsets = [0, 3, 0], sizes = [8, 8, 120], strides = [1, 1, 1]} : vector<8x12x120xf32> to vector<8x8x120xf32>
    %64 = vector.shape_cast %63 : vector<8x8x120xf32> to vector<64x120xf32>
    %c3_55 = arith.constant 3 : index
    %c0_56 = arith.constant 0 : index
    %c0_57 = arith.constant 0 : index
    %65 = vector.load %arg4[%c3_55, %c0_56, %c0_57] : memref<5x120x160xf32, #tpu.memory_space<vmem>>, vector<1x120x160xf32>
    %66 = vector.shape_cast %65 : vector<1x120x160xf32> to vector<120x160xf32>
    %cst_58 = arith.constant dense<0.000000e+00> : vector<64x160xf32>
    %67 = tpu.matmul %64, %66, %cst_58 {dimension_numbers = #tpu.dot_dimension_numbers<[1], [0], [0], [1], [0, 0, 1, 1], [], []>} : vector<64x120xf32>, vector<120x160xf32>, vector<64x160xf32> -> vector<64x160xf32>
    %68 = arith.addf %62, %67 : vector<64x160xf32>
    %69 = vector.extract_strided_slice %43 {offsets = [0, 4, 0], sizes = [8, 8, 120], strides = [1, 1, 1]} : vector<8x12x120xf32> to vector<8x8x120xf32>
    %70 = vector.shape_cast %69 : vector<8x8x120xf32> to vector<64x120xf32>
    %c4_59 = arith.constant 4 : index
    %c0_60 = arith.constant 0 : index
    %c0_61 = arith.constant 0 : index
    %71 = vector.load %arg4[%c4_59, %c0_60, %c0_61] : memref<5x120x160xf32, #tpu.memory_space<vmem>>, vector<1x120x160xf32>
    %72 = vector.shape_cast %71 : vector<1x120x160xf32> to vector<120x160xf32>
    %cst_62 = arith.constant dense<0.000000e+00> : vector<64x160xf32>
    %73 = tpu.matmul %70, %72, %cst_62 {dimension_numbers = #tpu.dot_dimension_numbers<[1], [0], [0], [1], [0, 0, 1, 1], [], []>} : vector<64x120xf32>, vector<120x160xf32>, vector<64x160xf32> -> vector<64x160xf32>
    %74 = arith.addf %68, %73 : vector<64x160xf32>
    %c0_63 = arith.constant 0 : index
    %c0_64 = arith.constant 0 : index
    %75 = vector.load %arg5[%c0_63, %c0_64] : memref<1x160xf32, #tpu.memory_space<vmem>>, vector<1x160xf32>
    %76 = vector.broadcast %75 : vector<1x160xf32> to vector<64x160xf32>
    %77 = arith.addf %74, %76 : vector<64x160xf32>
    %78 = vector.extract_strided_slice %77 {offsets = [0, 0], sizes = [64, 80], strides = [1, 1]} : vector<64x160xf32> to vector<64x80xf32>
    %79 = vector.extract_strided_slice %77 {offsets = [0, 80], sizes = [64, 80], strides = [1, 1]} : vector<64x160xf32> to vector<64x80xf32>
    %80 = arith.maximumf %78, %79 : vector<64x80xf32>
    %c0_65 = arith.constant 0 : index
    %c0_66 = arith.constant 0 : index
    %81 = vector.load %arg12[%c0_65, %c0_66] : memref<64x80xf32, #tpu.memory_space<vmem>>, vector<64x80xf32>
    tpu.vector_store %arg12[%c0_65, %c0_66], %80 {strides = array<i32>} : memref<64x80xf32, #tpu.memory_space<vmem>>, vector<64x80xf32>,
    %cst_67 = arith.constant 0.000000e+00 : f32
    %82 = vector.broadcast %cst_67 : f32 to vector<8x50xf32>
    %c0_68 = arith.constant 0 : index
    %c0_69 = arith.constant 0 : index
    %83 = tpu.strided_load %arg12[%c0_68, %c0_69] {strides = array<i32: 8, 1>} : memref<64x80xf32, #tpu.memory_space<vmem>>, vector<8x80xf32>
    %c1_70 = arith.constant 1 : index
    %c0_71 = arith.constant 0 : index
    %84 = tpu.strided_load %arg12[%c1_70, %c0_71] {strides = array<i32: 8, 1>} : memref<64x80xf32, #tpu.memory_space<vmem>>, vector<8x80xf32>
    %85 = arith.maximumf %83, %84 : vector<8x80xf32>
    %cst_72 = arith.constant 0.000000e+00 : f32
    %86 = vector.broadcast %cst_72 : f32 to vector<8x80xf32>
    %87 = arith.maximumf %85, %86 : vector<8x80xf32>
    %c0_73 = arith.constant 0 : index
    %c0_74 = arith.constant 0 : index
    %c0_75 = arith.constant 0 : index
    %88 = vector.load %arg6[%c0_73, %c0_74, %c0_75] : memref<4x80x50xf32, #tpu.memory_space<vmem>>, vector<1x80x50xf32>
    %89 = vector.shape_cast %88 : vector<1x80x50xf32> to vector<80x50xf32>
    %cst_76 = arith.constant dense<0.000000e+00> : vector<8x50xf32>
    %90 = tpu.matmul %87, %89, %cst_76 {dimension_numbers = #tpu.dot_dimension_numbers<[1], [0], [0], [1], [0, 0, 1, 1], [], []>} : vector<8x80xf32>, vector<80x50xf32>, vector<8x50xf32> -> vector<8x50xf32>
    %91 = arith.addf %82, %90 : vector<8x50xf32>
    %c2_77 = arith.constant 2 : index
    %c0_78 = arith.constant 0 : index
    %92 = tpu.strided_load %arg12[%c2_77, %c0_78] {strides = array<i32: 8, 1>} : memref<64x80xf32, #tpu.memory_space<vmem>>, vector<8x80xf32>
    %c3_79 = arith.constant 3 : index
    %c0_80 = arith.constant 0 : index
    %93 = tpu.strided_load %arg12[%c3_79, %c0_80] {strides = array<i32: 8, 1>} : memref<64x80xf32, #tpu.memory_space<vmem>>, vector<8x80xf32>
    %94 = arith.maximumf %92, %93 : vector<8x80xf32>
    %cst_81 = arith.constant 0.000000e+00 : f32
    %95 = vector.broadcast %cst_81 : f32 to vector<8x80xf32>
    %96 = arith.maximumf %94, %95 : vector<8x80xf32>
    %c1_82 = arith.constant 1 : index
    %c0_83 = arith.constant 0 : index
    %c0_84 = arith.constant 0 : index
    %97 = vector.load %arg6[%c1_82, %c0_83, %c0_84] : memref<4x80x50xf32, #tpu.memory_space<vmem>>, vector<1x80x50xf32>
    %98 = vector.shape_cast %97 : vector<1x80x50xf32> to vector<80x50xf32>
    %cst_85 = arith.constant dense<0.000000e+00> : vector<8x50xf32>
    %99 = tpu.matmul %96, %98, %cst_85 {dimension_numbers = #tpu.dot_dimension_numbers<[1], [0], [0], [1], [0, 0, 1, 1], [], []>} : vector<8x80xf32>, vector<80x50xf32>, vector<8x50xf32> -> vector<8x50xf32>
    %100 = arith.addf %91, %99 : vector<8x50xf32>
    %c4_86 = arith.constant 4 : index
    %c0_87 = arith.constant 0 : index
    %101 = tpu.strided_load %arg12[%c4_86, %c0_87] {strides = array<i32: 8, 1>} : memref<64x80xf32, #tpu.memory_space<vmem>>, vector<8x80xf32>
    %c5 = arith.constant 5 : index
    %c0_88 = arith.constant 0 : index
    %102 = tpu.strided_load %arg12[%c5, %c0_88] {strides = array<i32: 8, 1>} : memref<64x80xf32, #tpu.memory_space<vmem>>, vector<8x80xf32>
    %103 = arith.maximumf %101, %102 : vector<8x80xf32>
    %cst_89 = arith.constant 0.000000e+00 : f32
    %104 = vector.broadcast %cst_89 : f32 to vector<8x80xf32>
    %105 = arith.maximumf %103, %104 : vector<8x80xf32>
    %c2_90 = arith.constant 2 : index
    %c0_91 = arith.constant 0 : index
    %c0_92 = arith.constant 0 : index
    %106 = vector.load %arg6[%c2_90, %c0_91, %c0_92] : memref<4x80x50xf32, #tpu.memory_space<vmem>>, vector<1x80x50xf32>
    %107 = vector.shape_cast %106 : vector<1x80x50xf32> to vector<80x50xf32>
    %cst_93 = arith.constant dense<0.000000e+00> : vector<8x50xf32>
    %108 = tpu.matmul %105, %107, %cst_93 {dimension_numbers = #tpu.dot_dimension_numbers<[1], [0], [0], [1], [0, 0, 1, 1], [], []>} : vector<8x80xf32>, vector<80x50xf32>, vector<8x50xf32> -> vector<8x50xf32>
    %109 = arith.addf %100, %108 : vector<8x50xf32>
    %c6 = arith.constant 6 : index
    %c0_94 = arith.constant 0 : index
    %110 = tpu.strided_load %arg12[%c6, %c0_94] {strides = array<i32: 8, 1>} : memref<64x80xf32, #tpu.memory_space<vmem>>, vector<8x80xf32>
    %c7 = arith.constant 7 : index
    %c0_95 = arith.constant 0 : index
    %111 = tpu.strided_load %arg12[%c7, %c0_95] {strides = array<i32: 8, 1>} : memref<64x80xf32, #tpu.memory_space<vmem>>, vector<8x80xf32>
    %112 = arith.maximumf %110, %111 : vector<8x80xf32>
    %cst_96 = arith.constant 0.000000e+00 : f32
    %113 = vector.broadcast %cst_96 : f32 to vector<8x80xf32>
    %114 = arith.maximumf %112, %113 : vector<8x80xf32>
    %c3_97 = arith.constant 3 : index
    %c0_98 = arith.constant 0 : index
    %c0_99 = arith.constant 0 : index
    %115 = vector.load %arg6[%c3_97, %c0_98, %c0_99] : memref<4x80x50xf32, #tpu.memory_space<vmem>>, vector<1x80x50xf32>
    %116 = vector.shape_cast %115 : vector<1x80x50xf32> to vector<80x50xf32>
    %cst_100 = arith.constant dense<0.000000e+00> : vector<8x50xf32>
    %117 = tpu.matmul %114, %116, %cst_100 {dimension_numbers = #tpu.dot_dimension_numbers<[1], [0], [0], [1], [0, 0, 1, 1], [], []>} : vector<8x80xf32>, vector<80x50xf32>, vector<8x50xf32> -> vector<8x50xf32>
    %118 = arith.addf %109, %117 : vector<8x50xf32>
    %c0_101 = arith.constant 0 : index
    %c0_102 = arith.constant 0 : index
    %119 = vector.load %arg7[%c0_101, %c0_102] : memref<1x50xf32, #tpu.memory_space<vmem>>, vector<1x50xf32>
    %120 = vector.broadcast %119 : vector<1x50xf32> to vector<8x50xf32>
    %121 = arith.addf %118, %120 : vector<8x50xf32>
    %cst_103 = arith.constant 0.000000e+00 : f32
    %122 = vector.broadcast %cst_103 : f32 to vector<8x50xf32>
    %123 = arith.maximumf %121, %122 : vector<8x50xf32>
    %c0_104 = arith.constant 0 : index
    %c0_105 = arith.constant 0 : index
    %124 = vector.load %arg8[%c0_104, %c0_105] : memref<50x10xf32, #tpu.memory_space<vmem>>, vector<50x10xf32>
    %cst_106 = arith.constant dense<0.000000e+00> : vector<8x10xf32>
    %125 = tpu.matmul %123, %124, %cst_106 {dimension_numbers = #tpu.dot_dimension_numbers<[1], [0], [0], [1], [0, 0, 1, 1], [], []>} : vector<8x50xf32>, vector<50x10xf32>, vector<8x10xf32> -> vector<8x10xf32>
    %c0_107 = arith.constant 0 : index
    %c0_108 = arith.constant 0 : index
    %126 = vector.load %arg9[%c0_107, %c0_108] : memref<1x10xf32, #tpu.memory_space<vmem>>, vector<1x10xf32>
    %127 = vector.broadcast %126 : vector<1x10xf32> to vector<8x10xf32>
    %128 = arith.addf %125, %127 : vector<8x10xf32>
    %cst_109 = arith.constant dense<0xFF800000> : vector<8xf32>
    %129 = vector.multi_reduction <maximumf>, %128, %cst_109 [1] : vector<8x10xf32> to vector<8xf32>
    %130 = vector.shape_cast %129 : vector<8xf32> to vector<8x1xf32>
    %131 = vector.broadcast %130 : vector<8x1xf32> to vector<8x10xf32>
    %132 = arith.subf %128, %131 : vector<8x10xf32>
    %133 = math.exp %132 : vector<8x10xf32>
    %cst_110 = arith.constant dense<0.000000e+00> : vector<8xf32>
    %134 = vector.multi_reduction <add>, %133, %cst_110 [1] : vector<8x10xf32> to vector<8xf32>
    %135 = vector.shape_cast %134 : vector<8xf32> to vector<8x1xf32>
    %136 = math.log %135 : vector<8x1xf32>
    %137 = arith.addf %130, %136 : vector<8x1xf32>
    %138 = vector.broadcast %137 : vector<8x1xf32> to vector<8x10xf32>
    %139 = arith.subf %128, %138 : vector<8x10xf32>
    %c0_111 = arith.constant 0 : index
    %c0_112 = arith.constant 0 : index
    %140 = vector.load %arg10[%c0_111, %c0_112] : memref<8x10xf32, #tpu.memory_space<vmem>>, vector<8x10xf32>
    tpu.vector_store %arg10[%c0_111, %c0_112], %139 {strides = array<i32>} : memref<8x10xf32, #tpu.memory_space<vmem>>, vector<8x10xf32>,
    return
  }
  func.func @transform_0(%arg0: i32) -> (i32, i32, i32) {
    %c0_i32 = arith.constant 0 : i32
    %c0_i32_0 = arith.constant 0 : i32
    %c0_i32_1 = arith.constant 0 : i32
    return %arg0, %c0_i32, %c0_i32_0 : i32, i32, i32
  }
  func.func @transform_1(%arg0: i32) -> (i32, i32, i32) {
    %c0_i32 = arith.constant 0 : i32
    %c0_i32_0 = arith.constant 0 : i32
    %c0_i32_1 = arith.constant 0 : i32
    %c0_i32_2 = arith.constant 0 : i32
    return %c0_i32, %c0_i32_0, %c0_i32_1 : i32, i32, i32
  }
  func.func @transform_2(%arg0: i32) -> (i32, i32) {
    %c0_i32 = arith.constant 0 : i32
    %c0_i32_0 = arith.constant 0 : i32
    %c0_i32_1 = arith.constant 0 : i32
    return %c0_i32, %c0_i32_0 : i32, i32
  }
  func.func @transform_3(%arg0: i32) -> (i32, i32, i32) {
    %c0_i32 = arith.constant 0 : i32
    %c0_i32_0 = arith.constant 0 : i32
    %c0_i32_1 = arith.constant 0 : i32
    %c0_i32_2 = arith.constant 0 : i32
    return %c0_i32, %c0_i32_0, %c0_i32_1 : i32, i32, i32
  }
  func.func @transform_4(%arg0: i32) -> (i32, i32) {
    %c0_i32 = arith.constant 0 : i32
    %c0_i32_0 = arith.constant 0 : i32
    %c0_i32_1 = arith.constant 0 : i32
    return %c0_i32, %c0_i32_0 : i32, i32
  }
  func.func @transform_5(%arg0: i32) -> (i32, i32, i32) {
    %c0_i32 = arith.constant 0 : i32
    %c0_i32_0 = arith.constant 0 : i32
    %c0_i32_1 = arith.constant 0 : i32
    %c0_i32_2 = arith.constant 0 : i32
    return %c0_i32, %c0_i32_0, %c0_i32_1 : i32, i32, i32
  }
  func.func @transform_6(%arg0: i32) -> (i32, i32) {
    %c0_i32 = arith.constant 0 : i32
    %c0_i32_0 = arith.constant 0 : i32
    %c0_i32_1 = arith.constant 0 : i32
    return %c0_i32, %c0_i32_0 : i32, i32
  }
  func.func @transform_7(%arg0: i32) -> (i32, i32) {
    %c0_i32 = arith.constant 0 : i32
    %c0_i32_0 = arith.constant 0 : i32
    %c0_i32_1 = arith.constant 0 : i32
    return %c0_i32, %c0_i32_0 : i32, i32
  }
  func.func @transform_8(%arg0: i32) -> (i32, i32) {
    %c0_i32 = arith.constant 0 : i32
    %c0_i32_0 = arith.constant 0 : i32
    %c0_i32_1 = arith.constant 0 : i32
    return %c0_i32, %c0_i32_0 : i32, i32
  }
  func.func @transform_9(%arg0: i32) -> (i32, i32) {
    %c0_i32 = arith.constant 0 : i32
    %c0_i32_0 = arith.constant 0 : i32
    return %arg0, %c0_i32 : i32, i32
  }
}

</mosaic_0001>

<bundles_post_ra>
// kernel: dcdf_forward.1
= control target key start
LH: loop header
LB: loop body
LE: loop exit
PB: predicated region body
PF: predicated region fallthrough
CT: control target
= control target key end

     0   :  { %14 = vsyncpa [#allocation5], 0  ;;  %s7288_s0 = inlined_call_operand.vmem [shape: f32[16,28,28], index: 0, kind: input, shape index: {}]   ;;  %s7289_s1 = inlined_call_operand.vmem [shape: f32[5,28,240], index: 1, kind: input, shape index: {}]   ;;  %s7290_s2 = inlined_call_operand.vmem [shape: f32[1,240], index: 2, kind: input, shape index: {}]   ;;  %s7291_s3 = inlined_call_operand.vmem [shape: f32[5,120,160], index: 3, kind: input, shape index: {}]   ;;  %s7292_s4 = inlined_call_operand.vmem [shape: f32[1,160], index: 4, kind: input, shape index: {}]   ;;  %s7293_s5 = inlined_call_operand.vmem [shape: f32[4,80,50], index: 5, kind: input, shape index: {}]   ;;  %s7294_s6 = inlined_call_operand.vmem [shape: f32[1,50], index: 6, kind: input, shape index: {}]   ;;  %s7295_s7 = inlined_call_operand.vmem [shape: f32[50,10], index: 7, kind: input, shape index: {}]   ;;  %s7296_s8 = inlined_call_operand.vmem [shape: f32[1,10], index: 8, kind: input, shape index: {}]   ;;  %s7297_s9 = inlined_call_operand.hbm [shape: f32[16,10], index: 9, kind: output, shape index: {}]  }
   0x1   :  { %16 = vsyncpa [#allocation5 + $0x1], 0  ;;  %s5334_s30 = smov 0   ;;  %s5336_s10 = smov 0  }
   0x2   :  { %s5338_s11 = smov 0   ;;  %s5340_s12 = smov 0  }
   0x3 LB: > { %s5355_s13 = sadd.s32 4294967295, %s5275_s12   ;;  %s4115_s14 = sadd.s32 4294967294, %s5275_s12   ;;  %s5275_s12 = sphi %s5340_s12, %s7312_s12   ;;  %s5271_s11 = sphi %s5338_s11, %s7311_s11   ;;  %s5267_s10 = sphi %s5336_s10, %s7310_s10   ;;  %s5263_s30 = sphi %s5334_s30, %s7309_s30  }
   0x4   : > { %s5359_s15 = sadd.s32 1, %s5275_s12   ;;  %s223_s16 = sadd.s32 1, %s5271_s11 }
   0x5   : > { %s220_s17 = ssub.s32 %s5275_s12, %s5359_s15  ;;  %p233_p0 = scmp.ne.s32.totalorder %s5271_s11, %s5267_s10 }
   0x6   : > { %p221_p1 = scmp.eq.s32.totalorder %s220_s17, 0  ;;  %p234_p2 = scmp.eq.s32.totalorder %s5355_s13, 1 }
   0x7   : > { %p239_p3 = scmp.ne.s32.totalorder %s5267_s10, %s5263_s30  ;;  %p240_p4 = scmp.eq.s32.totalorder %s4115_s14, 1 }
   0x8   : > { %s5370_s18 = scalar_select %p221_p1, %s5271_s11, %s223_s16  }
   0x9   : > { %p5372_p5 = por %p234_p2, %p233_p0  ;;  %p5376_p6 = por %p240_p4, %p239_p3 }
   0xa   : > { %7301 = sst [smem:[#allocation7_spill]] %s5370_s18  ;;  %p4118_p7 = scmp.ge.s32.totalorder %s5275_s12, 1 }
   0xb   : > { %p292_p8 = scmp.lt.s32.totalorder %s5275_s12, 3 }
   0xd   : > { %p293_p9 = pnand %p4118_p7, %p292_p8 }
   0xe   : > { %v361_v0 = vld [vmem:[%s7289_s1 + $0x8] sm:$0xff] (!%p293_p9)  ;;  %v363_v1 = vld [vmem:[%s7289_s1 + $0x18] sm:$0xff] (!%p293_p9)  ;;  %v360_v2 = vld [vmem:[%s7289_s1] sm:$0xff] (!%p293_p9)  ;;  %vm474_vm0 = vcmask (!%p293_p9), 1043456   ;;  %v7298_v7 = vmov (!%p293_p9), 0.0   ;;  %s4120_s21 = sshll.u32 (!%p293_p9), %s5355_s13, 3 }
   0xf   : > { %296 = sbr.rel (%p293_p9) target bundleno = 2058 (0x80a), region = 56  ;;  %v4659_v3 = vpack.c.bf16 (!%p293_p9), %v363_v1, %v361_v0  ;;  %v362_v4 = vld [vmem:[%s7289_s1 + $0x10] sm:$0xff] (!%p293_p9)  ;;  %v365_v5 = vld [vmem:[%s7289_s1 + $0x28] sm:$0xff] (!%p293_p9)  ;;  %v367_v6 = vld [vmem:[%s7289_s1 + $0x38] sm:$0xf] (!%p293_p9)  ;;  %832 = vmatprep.mubr.f32.mxu0 (!%p293_p9), %v7298_v7  ;;  %545 = vmatprep.mubr.f32.mxu1 (!%p293_p9), %v7298_v7  ;;  %vm5278_vm1 = vmmov (!%p293_p9), 1  }
  0x10   : > { %v4661_v8 = vpack.c.bf16 (!%p293_p9), %v362_v4, %v360_v2  ;;  %vm5404_vm2 = vmpackc.low (!%p293_p9), %vm474_vm0, %vm5278_vm1  ;;  %v4663_v10 = vpack.c.bf16 (!%p293_p9), %v367_v6, %v365_v5  ;;  %v364_v11 = vld [vmem:[%s7289_s1 + $0x20] sm:$0xff] (!%p293_p9)  ;;  %v366_v12 = vld [vmem:[%s7289_s1 + $0x30] sm:$0xf] (!%p293_p9)  ;;  %p330_p10 = scmp.lt.s32.totalorder (!%p293_p9), %s4120_s21, 15  ;;  %vm401_vm3 = vcmask (!%p293_p9), 228352   ;;  %s5279_s29 = smov (!%p293_p9), 8  }
  0x11   : > { %4660 = vmatprep.subr.bf16.mxu0 (!%p293_p9), %v4659_v3  ;;  %v4184_v13 = vld [vmem:[%s7289_s1 + $0x88] sm:$0xff] (!%p293_p9)  ;;  %v4186_v14 = vld [vmem:[%s7289_s1 + $0x98] sm:$0xff] (!%p293_p9)  ;;  %v4666_v15 = vpack.c.bf16 (!%p293_p9), %v366_v12, %v364_v11  ;;  %v4183_v17 = vld [vmem:[%s7289_s1 + $0x80] sm:$0xff] (!%p293_p9)  ;;  %vm2285_vm4 = vcmask (!%p293_p9), 64512   ;;  %vm2358_vm5 = vcmask (!%p293_p9), 982016   ;;  %vm2524_vm6 = vcmask (!%p293_p9), 1046528  }
  0x12   : > { %4662 = vmatpush1.bf16.msra.mxu0 (!%p293_p9), %v4661_v8  ;;  %v4669_v16 = vpack.c.bf16 (!%p293_p9), %v4186_v14, %v4184_v13  ;;  %v4185_v18 = vld [vmem:[%s7289_s1 + $0x90] sm:$0xff] (!%p293_p9)  ;;  %v4188_v19 = vld [vmem:[%s7289_s1 + $0xa8] sm:$0xff] (!%p293_p9)  ;;  %v4190_v20 = vld [vmem:[%s7289_s1 + $0xb8] sm:$0xf] (!%p293_p9)  ;;  %vm2838_vm7 = vcmask (!%p293_p9), 1045504   ;;  %vm3039_vm8 = vcmask (!%p293_p9), 1044480  }
  0x13   : > { %4665 = vmatprep.subr.msk.bf16.mxu0 (!%p293_p9), %vm5404_vm2, %v4663_v10  ;;  %v4671_v22 = vpack.c.bf16 (!%p293_p9), %v4185_v18, %v4183_v17  ;;  %v4673_v23 = vpack.c.bf16 (!%p293_p9), %v4190_v20, %v4188_v19  ;;  %v4187_v24 = vld [vmem:[%s7289_s1 + $0xa0] sm:$0xff] (!%p293_p9)  ;;  %v4189_v25 = vld [vmem:[%s7289_s1 + $0xb0] sm:$0xf] (!%p293_p9)  ;;  %v4218_v26 = vld [vmem:[%s7289_s1 + $0xc8] sm:$0xff] (!%p293_p9)  ;;  %s5280_s28 = smov (!%p293_p9), 48   ;;  %vm5282_vm9 = vmmov (!%p293_p9), 0  }
  0x14   : > { %v4220_v27 = vld [vmem:[%s7289_s1 + $0xd8] sm:$0xff] (!%p293_p9)  ;;  %v4676_v29 = vpack.c.bf16 (!%p293_p9), %v4189_v25, %v4187_v24  ;;  %v4217_v53 = vld [vmem:[%s7289_s1 + $0xc0] sm:$0xff] (!%p293_p9)  ;;  %v4219_v54 = vld [vmem:[%s7289_s1 + $0xd0] sm:$0xff] (!%p293_p9)  ;;  %vm3516_vm10 = vcmask (!%p293_p9), 392192   ;;  %vm3541_vm11 = vcmask (!%p293_p9), 654336   ;;  %vm3953_vm12 = vcmask (!%p293_p9), 1041408  }
  0x15   : > { %v4679_v30 = vpack.c.bf16 (!%p293_p9), %v4220_v27, %v4218_v26  ;;  %v4222_v55 = vld [vmem:[%s7289_s1 + $0xe8] sm:$0xff] (!%p293_p9)  ;;  %v4224_v56 = vld [vmem:[%s7289_s1 + $0xf8] sm:$0xf] (!%p293_p9)  ;;  %v4681_v58 = vpack.c.bf16 (!%p293_p9), %v4219_v54, %v4217_v53  ;;  %v4221_v60 = vld [vmem:[%s7289_s1 + $0xe0] sm:$0xff] (!%p293_p9)  ;;  %vm3949_vm13 = vcmask (!%p293_p9), 408576   ;;  %vm4027_vm14 = vcmask (!%p293_p9), 80896  }
  0x16   : > { %s7314_s21 = smov (!%p330_p10, %s4120_s21), 15  ;;  %4668 = vmatpush1.bf16.msk.msra.mxu0 %vm5404_vm2, %v4666_v15  ;;  %v4683_v59 = vpack.c.bf16 %v4224_v56, %v4222_v55  ;;  %v4223_v61 = vld [vmem:[%s7289_s1 + $0xf0] sm:$0xf]  ;;  %v4252_v62 = vld [vmem:[%s7289_s1 + $0x108] sm:$0xff]  ;;  %v4254_v63 = vld [vmem:[%s7289_s1 + $0x118] sm:$0xff]  ;;  %s4484_s25 = sshll.u32 %s5355_s13, 7 }
  0x17   : > { %s4487_s23 = sshll.u32 %s7314_s21, 5  ;;  %4670 = vmatprep.subr.bf16.mxu0 %v4669_v16  ;;  %v4686_v1 = vpack.c.bf16 %v4223_v61, %v4221_v60  ;;  %v4689_v2 = vpack.c.bf16 %v4254_v63, %v4252_v62  ;;  %v4124_v17 = vld [vmem:[%s7289_s1 + $0x48] sm:$0xff]  ;;  %v4126_v18 = vld [vmem:[%s7289_s1 + $0x58] sm:$0xff]  ;;  %v4255_v55 = vld [vmem:[%s7289_s1 + $0x120] sm:$0xff]  ;;  %s7245_s16 = scalar_lea.hbm %s7297_s9, %s4484_s25 }
  0x18   : > { %s5437_s18 = scalar_lea.vmem %s7288_s0, %s4487_s23  ;;  %v4649_v20 = vpack.c.bf16 %v4126_v18, %v4124_v17  ;;  %v4128_v24 = vld [vmem:[%s7289_s1 + $0x68] sm:$0xff]  ;;  %v4130_v25 = vld [vmem:[%s7289_s1 + $0x78] sm:$0xf]  ;;  %v4257_v56 = vld [vmem:[%s7289_s1 + $0x130] sm:$0xf]  ;;  %s5283_s13 = smov [#allocation4]  }
  0x19   : > { %v336_v21 = vld [vmem:[%s5437_s18] sm:$0xff]  ;;  %v337_v28 = vld [vmem:[%s5437_s18 + $0x8] sm:$0xff]  ;;  %v338_v31 = vld [vmem:[%s5437_s18 + $0x10] sm:$0xff]  ;;  %v4653_v27 = vpack.c.bf16 %v4130_v25, %v4128_v24  ;;  %s5217_s22 = sshll.u32 %s5283_s13, 4  ;;  %s5218_s22 = int_to_ptr.vmem [resolvable:$false] %s5217_s22 }
  0x1a   : > { %4159 = vmatmul.mubr.msk.f32.vlgmr.msra.gmra.mrb[0].mxu0 %vm401_vm3, %v336_v21  ;;  %v339_v32 = vld [vmem:[%s5437_s18 + $0x20] sm:$0xff]  ;;  %v340_v33 = vld [vmem:[%s5437_s18 + $0x28] sm:$0xff]  ;;  %v341_v34 = vld [vmem:[%s5437_s18 + $0x30] sm:$0xff]  ;;  %4650 = vmatprep.subr.bf16.mxu1 %v4649_v20  ;;  %s5219_s23 = scalar_lea.vmem %s5218_s22, 256 }
  0x1b   : > { %4672 = vmatpush1.bf16.msra.mxu0 %v4671_v22  ;;  %838 = vmatprep.mubr.f32.mxu0 %v7298_v7  ;;  %v342_v35 = vld [vmem:[%s5437_s18 + $0x40] sm:$0xff]  ;;  %v343_v36 = vld [vmem:[%s5437_s18 + $0x48] sm:$0xff]  ;;  %v344_v37 = vld [vmem:[%s5437_s18 + $0x50] sm:$0xff] }
  0x1c   : > { %4675 = vmatprep.subr.msk.bf16.mxu0 %vm5404_vm2, %v4673_v23  ;;  %v345_v38 = vld [vmem:[%s5437_s18 + $0x60] sm:$0xff]  ;;  %v346_v39 = vld [vmem:[%s5437_s18 + $0x68] sm:$0xff]  ;;  %v347_v40 = vld [vmem:[%s5437_s18 + $0x70] sm:$0xff] }
  0x1d   : > { %v348_v41 = vld [vmem:[%s5437_s18 + $0x80] sm:$0xff]  ;;  %v349_v42 = vld [vmem:[%s5437_s18 + $0x88] sm:$0xff]  ;;  %v350_v43 = vld [vmem:[%s5437_s18 + $0x90] sm:$0xff] }
  0x1e   : > { %4160 = vmatmul.mubr.msk.f32.gmra.mrb[2].mxu0 %vm401_vm3, %v337_v28  ;;  %v351_v44 = vld [vmem:[%s5437_s18 + $0xa0] sm:$0xff]  ;;  %v352_v45 = vld [vmem:[%s5437_s18 + $0xa8] sm:$0xff]  ;;  %v353_v46 = vld [vmem:[%s5437_s18 + $0xb0] sm:$0xff] }
  0x1f   : > { %844 = vmatprep.mubr.f32.mxu0 %v7298_v7  ;;  %4678 = vmatpush1.bf16.msk.msra.mxu0 %vm5404_vm2, %v4676_v29  ;;  %v354_v47 = vld [vmem:[%s5437_s18 + $0xc0] sm:$0xff]  ;;  %v355_v48 = vld [vmem:[%s5437_s18 + $0xc8] sm:$0xff]  ;;  %v356_v49 = vld [vmem:[%s5437_s18 + $0xd0] sm:$0xff] }
  0x20   : > { %4680 = vmatprep.subr.bf16.mxu0 %v4679_v30  ;;  %v357_v50 = vld [vmem:[%s5437_s18 + $0xe0] sm:$0xff]  ;;  %v358_v51 = vld [vmem:[%s5437_s18 + $0xe8] sm:$0xff]  ;;  %v359_v52 = vld [vmem:[%s5437_s18 + $0xf0] sm:$0xff] }
  0x21   : > { %v977_v57 = vld [vmem:[%s5437_s18 + $0x2] sm:$0xff]  ;;  %v978_v0 = vld [vmem:[%s5437_s18 + $0xa] sm:$0xff]  ;;  %v979_v3 = vld [vmem:[%s5437_s18 + $0x12] sm:$0xff] }
  0x22   : > { %4161 = vmatmul.mubr.msk.f32.gmra.mrb[4].mxu0 %vm401_vm3, %v338_v31  ;;  %v980_v4 = vld [vmem:[%s5437_s18 + $0x22] sm:$0xff]  ;;  %v981_v5 = vld [vmem:[%s5437_s18 + $0x2a] sm:$0xff]  ;;  %v982_v6 = vld [vmem:[%s5437_s18 + $0x32] sm:$0xff] }
  0x23   : > { %850 = vmatprep.mubr.f32.mxu0 %v7298_v7  ;;  %v983_v8 = vld [vmem:[%s5437_s18 + $0x42] sm:$0xff]  ;;  %v984_v10 = vld [vmem:[%s5437_s18 + $0x4a] sm:$0xff]  ;;  %v985_v11 = vld [vmem:[%s5437_s18 + $0x52] sm:$0xff] }
  0x24   : > { %v986_v12 = vld [vmem:[%s5437_s18 + $0x62] sm:$0xff]  ;;  %v987_v13 = vld [vmem:[%s5437_s18 + $0x6a] sm:$0xff]  ;;  %v988_v14 = vld [vmem:[%s5437_s18 + $0x72] sm:$0xff] }
  0x25   : > { %v989_v15 = vld [vmem:[%s5437_s18 + $0x82] sm:$0xff]  ;;  %v990_v16 = vld [vmem:[%s5437_s18 + $0x8a] sm:$0xff]  ;;  %v991_v19 = vld [vmem:[%s5437_s18 + $0x92] sm:$0xff] }
  0x26   : > { %4162 = vmatmul.mubr.msk.f32.gmra.mrb[6].mxu0 %vm401_vm3, %v339_v32  ;;  %v4123_v21 = vld [vmem:[%s7289_s1 + $0x40] sm:$0xff]  ;;  %v4125_v22 = vld [vmem:[%s7289_s1 + $0x50] sm:$0xff] }
  0x27   : > { %856 = vmatprep.mubr.f32.mxu0 %v7298_v7  ;;  %v4651_v23 = vpack.c.bf16 %v4125_v22, %v4123_v21  ;;  %v992_v26 = vld [vmem:[%s5437_s18 + $0xa2] sm:$0xff]  ;;  %v4129_v29 = vld [vmem:[%s7289_s1 + $0x70] sm:$0xf] }
  0x28   : > { %v4127_v28 = vld [vmem:[%s7289_s1 + $0x60] sm:$0xff]  ;;  %v993_v31 = vld [vmem:[%s5437_s18 + $0xaa] sm:$0xff]  ;;  %v1347_v60 = vld [vmem:[%s5437_s18 + $0x13] sm:$0xff] }
  0x29   : > { %4652 = vmatpush1.bf16.msra.mxu1 %v4651_v23  ;;  %v4656_v30 = vpack.c.bf16 %v4129_v29, %v4127_v28  ;;  %v368_v32 = vld [vmem:[%s5437_s18 + $0x1] sm:$0xff]  ;;  %v376_v53 = vld [vmem:[%s5437_s18 + $0x51] sm:$0xff]  ;;  %v378_v61 = vld [vmem:[%s5437_s18 + $0x69] sm:$0xff] }
  0x2a   : > { %4163 = vmatmul.mubr.msk.f32.gmra.mrb[8].mxu0 %vm401_vm3, %v340_v33  ;;  %4655 = vmatprep.subr.msk.bf16.mxu1 %vm5404_vm2, %v4653_v27  ;;  %v994_v33 = vld [vmem:[%s5437_s18 + $0xb2] sm:$0xff]  ;;  %v1348_v62 = vld [vmem:[%s5437_s18 + $0x23] sm:$0xff] }
  0x2b   : > { %862 = vmatprep.mubr.f32.mxu0 %v7298_v7  ;;  %v379_v63 = vld [vmem:[%s5437_s18 + $0x71] sm:$0xff]  ;;  %v1357_v17 = vld [vmem:[%s5437_s18 + $0x83] sm:$0xff] }
  0x2c   : > { %v1349_v9 = vld [vmem:[%s5437_s18 + $0x2b] sm:$0xff]  ;;  %v389_v20 = vld [vmem:[%s5437_s18 + $0xe1] sm:$0xff]  ;;  %v1359_v21 = vld [vmem:[%s5437_s18 + $0x93] sm:$0xff] }
  0x2d   : > { %4658 = vmatpush1.bf16.msk.msra.mxu1 %vm5404_vm2, %v4656_v30  ;;  %v388_v18 = vld [vmem:[%s5437_s18 + $0xd1] sm:$0xff]  ;;  %v390_v22 = vld [vmem:[%s5437_s18 + $0xe9] sm:$0xff] }
  0x2e   : > { %4164 = vmatmul.mubr.msk.f32.gmra.mrb[10].mxu0 %vm401_vm3, %v341_v34  ;;  %v369_v34 = vld [vmem:[%s5437_s18 + $0x9] sm:$0xff]  ;;  %v391_v24 = vld [vmem:[%s5437_s18 + $0xf1] sm:$0xff] }
  0x2f   : > { %868 = vmatprep.mubr.f32.mxu0 %v7298_v7  ;;  %v1360_v23 = vld [vmem:[%s5437_s18 + $0xa3] sm:$0xff]  ;;  %v1361_v25 = vld [vmem:[%s5437_s18 + $0xab] sm:$0xff]  ;;  %v1365_v29 = vld [vmem:[%s5437_s18 + $0xd3] sm:$0xff] }
  0x30   : > { %4133 = vmatmul.mubr.msk.f32.vlgmr.msra.gmra.mrb[0].mxu1 %vm401_vm3, %v368_v32  ;;  %v1363_v27 = vld [vmem:[%s5437_s18 + $0xc3] sm:$0xff]  ;;  %v1364_v28 = vld [vmem:[%s5437_s18 + $0xcb] sm:$0xff]  ;;  %v1368_v32 = vld [vmem:[%s5437_s18 + $0xf3] sm:$0xff] }
  0x31   : > { %551 = vmatprep.mubr.f32.mxu1 %v7298_v7  ;;  %v1366_v30 = vld [vmem:[%s5437_s18 + $0xe3] sm:$0xff] }
  0x32   : > { %4165 = vmatmul.mubr.msk.f32.gmra.mrb[12].mxu0 %vm401_vm3, %v342_v35  ;;  %v995_v35 = vld [vmem:[%s5437_s18 + $0xc2] sm:$0xff] }
  0x33   : > { %874 = vmatprep.mubr.f32.mxu0 %v7298_v7 }
  0x34   : > { %4134 = vmatmul.mubr.msk.f32.gmra.mrb[2].mxu1 %vm401_vm3, %v369_v34  ;;  %v1714_v34 = vld [vmem:[%s5437_s18 + $0xc] sm:$0xff] }
  0x35   : > { %557 = vmatprep.mubr.f32.mxu1 %v7298_v7 }
  0x36   : > { %4166 = vmatmul.mubr.msk.f32.gmra.mrb[14].mxu0 %vm401_vm3, %v343_v36  ;;  %v370_v36 = vld [vmem:[%s5437_s18 + $0x11] sm:$0xff] }
  0x37   : > { %880 = vmatprep.mubr.f32.mxu0 %v7298_v7 }
  0x38   : > { %4135 = vmatmul.mubr.msk.f32.gmra.mrb[4].mxu1 %vm401_vm3, %v370_v36  ;;  %v1716_v36 = vld [vmem:[%s5437_s18 + $0x24] sm:$0xff] }
  0x39   : > { %563 = vmatprep.mubr.f32.mxu1 %v7298_v7 }
  0x3a   : > { %4167 = vmatmul.mubr.msk.f32.gmra.mrb[16].mxu0 %vm401_vm3, %v344_v37  ;;  %v996_v37 = vld [vmem:[%s5437_s18 + $0xca] sm:$0xff] }
  0x3b   : > { %886 = vmatprep.mubr.f32.mxu0 %v7298_v7 }
  0x3e   : > { %4168 = vmatmul.mubr.msk.f32.gmra.mrb[18].mxu0 %vm401_vm3, %v345_v38  ;;  %v371_v38 = vld [vmem:[%s5437_s18 + $0x21] sm:$0xff] }
  0x3f   : > { %892 = vmatprep.mubr.f32.mxu0 %v7298_v7  ;;  %4136 = vmatmul.mubr.msk.f32.gmra.mrb[6].mxu1 %vm401_vm3, %v371_v38  ;;  %v1718_v38 = vld [vmem:[%s5437_s18 + $0x34] sm:$0xff] }
  0x40   : > { %569 = vmatprep.mubr.f32.mxu1 %v7298_v7 }
  0x42   : > { %4169 = vmatmul.mubr.msk.f32.gmra.mrb[20].mxu0 %vm401_vm3, %v346_v39  ;;  %v997_v39 = vld [vmem:[%s5437_s18 + $0xd2] sm:$0xff] }
  0x43   : > { %898 = vmatprep.mubr.f32.mxu0 %v7298_v7 }
  0x46   : > { %4170 = vmatmul.mubr.msk.f32.gmra.mrb[22].mxu0 %vm401_vm3, %v347_v40  ;;  %v372_v40 = vld [vmem:[%s5437_s18 + $0x29] sm:$0xff] }
  0x47   : > { %904 = vmatprep.mubr.f32.mxu0 %v7298_v7  ;;  %4137 = vmatmul.mubr.msk.f32.gmra.mrb[8].mxu1 %vm401_vm3, %v372_v40  ;;  %v1720_v40 = vld [vmem:[%s5437_s18 + $0x4c] sm:$0xff] }
  0x48   : > { %575 = vmatprep.mubr.f32.mxu1 %v7298_v7 }
  0x4a   : > { %4171 = vmatmul.mubr.msk.f32.gmra.mrb[24].mxu0 %vm401_vm3, %v348_v41  ;;  %v998_v41 = vld [vmem:[%s5437_s18 + $0xe2] sm:$0xff] }
  0x4b   : > { %910 = vmatprep.mubr.f32.mxu0 %v7298_v7 }
  0x4e   : > { %4172 = vmatmul.mubr.msk.f32.gmra.mrb[26].mxu0 %vm401_vm3, %v349_v42  ;;  %v373_v42 = vld [vmem:[%s5437_s18 + $0x31] sm:$0xff] }
  0x4f   : > { %916 = vmatprep.mubr.f32.mxu0 %v7298_v7  ;;  %4138 = vmatmul.mubr.msk.f32.gmra.mrb[10].mxu1 %vm401_vm3, %v373_v42  ;;  %v1722_v42 = vld [vmem:[%s5437_s18 + $0x64] sm:$0xff] }
  0x50   : > { %581 = vmatprep.mubr.f32.mxu1 %v7298_v7 }
  0x52   : > { %4173 = vmatmul.mubr.msk.f32.gmra.mrb[28].mxu0 %vm401_vm3, %v350_v43  ;;  %v999_v43 = vld [vmem:[%s5437_s18 + $0xea] sm:$0xff] }
  0x53   : > { %922 = vmatprep.mubr.f32.mxu0 %v7298_v7 }
  0x56   : > { %4174 = vmatmul.mubr.msk.f32.gmra.mrb[30].mxu0 %vm401_vm3, %v351_v44  ;;  %v374_v44 = vld [vmem:[%s5437_s18 + $0x41] sm:$0xff] }
  0x57   : > { %928 = vmatprep.mubr.f32.mxu0 %v7298_v7  ;;  %4139 = vmatmul.mubr.msk.f32.gmra.mrb[12].mxu1 %vm401_vm3, %v374_v44  ;;  %v1724_v44 = vld [vmem:[%s5437_s18 + $0x74] sm:$0xff] }
  0x58   : > { %587 = vmatprep.mubr.f32.mxu1 %v7298_v7 }
  0x5a   : > { %4175 = vmatmul.mubr.msk.f32.gmra.mrb[32].mxu0 %vm401_vm3, %v352_v45  ;;  %v1000_v45 = vld [vmem:[%s5437_s18 + $0xf2] sm:$0xff] }
  0x5b   : > { %934 = vmatprep.mubr.f32.mxu0 %v7298_v7 }
  0x5e   : > { %4176 = vmatmul.mubr.msk.f32.gmra.mrb[34].mxu0 %vm401_vm3, %v353_v46  ;;  %v375_v46 = vld [vmem:[%s5437_s18 + $0x49] sm:$0xff] }
  0x5f   : > { %940 = vmatprep.mubr.f32.mxu0 %v7298_v7  ;;  %4140 = vmatmul.mubr.msk.f32.gmra.mrb[14].mxu1 %vm401_vm3, %v375_v46  ;;  %v1726_v46 = vld [vmem:[%s5437_s18 + $0x8c] sm:$0xff] }
  0x60   : > { %593 = vmatprep.mubr.f32.mxu1 %v7298_v7 }
  0x62   : > { %4177 = vmatmul.mubr.msk.f32.gmra.mrb[36].mxu0 %vm401_vm3, %v354_v47  ;;  %v4251_v47 = vld [vmem:[%s7289_s1 + $0x100] sm:$0xff] }
  0x63   : > { %946 = vmatprep.mubr.f32.mxu0 %v7298_v7  ;;  %4141 = vmatmul.mubr.msk.f32.gmra.mrb[16].mxu1 %vm401_vm3, %v376_v53  ;;  %v1733_v53 = vld [vmem:[%s5437_s18 + $0xd4] sm:$0xff] }
  0x64   : > { %599 = vmatprep.mubr.f32.mxu1 %v7298_v7 }
  0x66   : > { %4178 = vmatmul.mubr.msk.f32.gmra.mrb[38].mxu0 %vm401_vm3, %v355_v48  ;;  %v4253_v48 = vld [vmem:[%s7289_s1 + $0x110] sm:$0xff] }
  0x67   : > { %952 = vmatprep.mubr.f32.mxu0 %v7298_v7 }
  0x6a   : > { %4179 = vmatmul.mubr.msk.f32.gmra.mrb[40].mxu0 %vm401_vm3, %v356_v49  ;;  %v4256_v49 = vld [vmem:[%s7289_s1 + $0x128] sm:$0xff] }
  0x6b   : > { %958 = vmatprep.mubr.f32.mxu0 %v7298_v7 }
  0x6e   : > { %4180 = vmatmul.mubr.msk.f32.gmra.mrb[42].mxu0 %vm401_vm3, %v357_v50  ;;  %v4258_v50 = vld [vmem:[%s7289_s1 + $0x138] sm:$0xf] }
  0x6f   : > { %964 = vmatprep.mubr.f32.mxu0 %v7298_v7  ;;  %v4693_v54 = vpack.c.bf16 %v4258_v50, %v4256_v49  ;;  %v1729_v49 = vld [vmem:[%s5437_s18 + $0xac] sm:$0xff]  ;;  %v1730_v50 = vld [vmem:[%s5437_s18 + $0xb4] sm:$0xff] }
  0x72   : > { %4181 = vmatmul.mubr.msk.f32.gmra.mrb[44].mxu0 %vm401_vm3, %v358_v51  ;;  %v1345_v51 = vld [vmem:[%s5437_s18 + $0x3] sm:$0xff] }
  0x73   : > { %970 = vmatprep.mubr.f32.mxu0 %v7298_v7 }
  0x76   : > { %4182 = vmatmul.mubr.msk.f32.gmra.mrb[46].mxu0 %vm401_vm3, %v359_v52  ;;  %v4691_v52 = vpack.c.bf16 %v4253_v48, %v4251_v47  ;;  %v1727_v47 = vld [vmem:[%s5437_s18 + $0x94] sm:$0xff]  ;;  %v1728_v48 = vld [vmem:[%s5437_s18 + $0xa4] sm:$0xff] }
  0x77   : > { %1152 = vmatprep.mubr.f32.mxu0 %v7298_v7 }
  0x7a   : > { %4193 = vmatmul.mubr.msk.f32.vlgmr.msra.gmra.mrb[0].mxu0 %vm401_vm3, %v977_v57  ;;  %v1346_v57 = vld [vmem:[%s5437_s18 + $0xb] sm:$0xff] }
  0x7b   : > { %4682 = vmatpush1.bf16.msra.mxu0 %v4681_v58  ;;  %1158 = vmatprep.mubr.f32.mxu0 %v7298_v7  ;;  %v4696_v58 = vpack.c.bf16 %v4257_v56, %v4255_v55 }
  0x7c   : > { %4685 = vmatprep.subr.msk.bf16.mxu0 %vm5404_vm2, %v4683_v59  ;;  %v377_v59 = vld [vmem:[%s5437_s18 + $0x61] sm:$0xff] }
  0x7d   : > { %4142 = vmatmul.mubr.msk.f32.gmra.mrb[18].mxu1 %vm401_vm3, %v377_v59 }
  0x7e   : > { %4194 = vmatmul.mubr.msk.f32.gmra.mrb[2].mxu0 %vm401_vm3, %v978_v0  ;;  %605 = vmatprep.mubr.f32.mxu1 %v7298_v7  ;;  %v380_v0 = vld [vmem:[%s5437_s18 + $0x81] sm:$0xff] }
  0x7f   : > { %1164 = vmatprep.mubr.f32.mxu0 %v7298_v7  ;;  %4688 = vmatpush1.bf16.msk.msra.mxu0 %vm5404_vm2, %v4686_v1  ;;  %v1350_v1 = vld [vmem:[%s5437_s18 + $0x33] sm:$0xff] }
  0x80   : > { %4690 = vmatprep.subr.bf16.mxu0 %v4689_v2  ;;  %v381_v2 = vld [vmem:[%s5437_s18 + $0x89] sm:$0xff] }
  0x81   : > { %4143 = vmatmul.mubr.msk.f32.gmra.mrb[20].mxu1 %vm401_vm3, %v378_v61 }
  0x82   : > { %4195 = vmatmul.mubr.msk.f32.gmra.mrb[4].mxu0 %vm401_vm3, %v979_v3  ;;  %611 = vmatprep.mubr.f32.mxu1 %v7298_v7  ;;  %v1351_v3 = vld [vmem:[%s5437_s18 + $0x43] sm:$0xff] }
  0x83   : > { %1170 = vmatprep.mubr.f32.mxu0 %v7298_v7 }
  0x85   : > { %4144 = vmatmul.mubr.msk.f32.gmra.mrb[22].mxu1 %vm401_vm3, %v379_v63 }
  0x86   : > { %4196 = vmatmul.mubr.msk.f32.gmra.mrb[6].mxu0 %vm401_vm3, %v980_v4  ;;  %617 = vmatprep.mubr.f32.mxu1 %v7298_v7  ;;  %v382_v4 = vld [vmem:[%s5437_s18 + $0x91] sm:$0xff] }
  0x87   : > { %1176 = vmatprep.mubr.f32.mxu0 %v7298_v7 }
  0x89   : > { %4145 = vmatmul.mubr.msk.f32.gmra.mrb[24].mxu1 %vm401_vm3, %v380_v0 }
  0x8a   : > { %4197 = vmatmul.mubr.msk.f32.gmra.mrb[8].mxu0 %vm401_vm3, %v981_v5  ;;  %623 = vmatprep.mubr.f32.mxu1 %v7298_v7  ;;  %v1352_v5 = vld [vmem:[%s5437_s18 + $0x4b] sm:$0xff] }
  0x8b   : > { %1182 = vmatprep.mubr.f32.mxu0 %v7298_v7 }
  0x8d   : > { %4146 = vmatmul.mubr.msk.f32.gmra.mrb[26].mxu1 %vm401_vm3, %v381_v2 }
  0x8e   : > { %4198 = vmatmul.mubr.msk.f32.gmra.mrb[10].mxu0 %vm401_vm3, %v982_v6  ;;  %629 = vmatprep.mubr.f32.mxu1 %v7298_v7  ;;  %v383_v6 = vld [vmem:[%s5437_s18 + $0xa1] sm:$0xff] }
  0x8f   : > { %1188 = vmatprep.mubr.f32.mxu0 %v7298_v7 }
  0x91   : > { %4147 = vmatmul.mubr.msk.f32.gmra.mrb[28].mxu1 %vm401_vm3, %v382_v4 }
  0x92   : > { %4199 = vmatmul.mubr.msk.f32.gmra.mrb[12].mxu0 %vm401_vm3, %v983_v8  ;;  %635 = vmatprep.mubr.f32.mxu1 %v7298_v7  ;;  %v1353_v8 = vld [vmem:[%s5437_s18 + $0x53] sm:$0xff] }
  0x93   : > { %1194 = vmatprep.mubr.f32.mxu0 %v7298_v7 }
  0x95   : > { %4148 = vmatmul.mubr.msk.f32.gmra.mrb[30].mxu1 %vm401_vm3, %v383_v6 }
  0x96   : > { %4200 = vmatmul.mubr.msk.f32.gmra.mrb[14].mxu0 %vm401_vm3, %v984_v10  ;;  %641 = vmatprep.mubr.f32.mxu1 %v7298_v7  ;;  %v384_v10 = vld [vmem:[%s5437_s18 + $0xa9] sm:$0xff] }
  0x97   : > { %1200 = vmatprep.mubr.f32.mxu0 %v7298_v7 }
  0x99   : > { %4149 = vmatmul.mubr.msk.f32.gmra.mrb[32].mxu1 %vm401_vm3, %v384_v10 }
  0x9a   : > { %4201 = vmatmul.mubr.msk.f32.gmra.mrb[16].mxu0 %vm401_vm3, %v985_v11  ;;  %647 = vmatprep.mubr.f32.mxu1 %v7298_v7  ;;  %v1354_v11 = vld [vmem:[%s5437_s18 + $0x63] sm:$0xff] }
  0x9b   : > { %1206 = vmatprep.mubr.f32.mxu0 %v7298_v7 }
  0x9e   : > { %4202 = vmatmul.mubr.msk.f32.gmra.mrb[18].mxu0 %vm401_vm3, %v986_v12  ;;  %v385_v12 = vld [vmem:[%s5437_s18 + $0xb1] sm:$0xff] }
  0x9f   : > { %1212 = vmatprep.mubr.f32.mxu0 %v7298_v7  ;;  %4150 = vmatmul.mubr.msk.f32.gmra.mrb[34].mxu1 %vm401_vm3, %v385_v12 }
  0xa0   : > { %653 = vmatprep.mubr.f32.mxu1 %v7298_v7 }
  0xa2   : > { %4203 = vmatmul.mubr.msk.f32.gmra.mrb[20].mxu0 %vm401_vm3, %v987_v13  ;;  %v1355_v13 = vld [vmem:[%s5437_s18 + $0x6b] sm:$0xff] }
  0xa3   : > { %1218 = vmatprep.mubr.f32.mxu0 %v7298_v7 }
  0xa6   : > { %4204 = vmatmul.mubr.msk.f32.gmra.mrb[22].mxu0 %vm401_vm3, %v988_v14  ;;  %v386_v14 = vld [vmem:[%s5437_s18 + $0xc1] sm:$0xff] }
  0xa7   : > { %1224 = vmatprep.mubr.f32.mxu0 %v7298_v7  ;;  %4151 = vmatmul.mubr.msk.f32.gmra.mrb[36].mxu1 %vm401_vm3, %v386_v14 }
  0xa8   : > { %659 = vmatprep.mubr.f32.mxu1 %v7298_v7 }
  0xaa   : > { %4205 = vmatmul.mubr.msk.f32.gmra.mrb[24].mxu0 %vm401_vm3, %v989_v15  ;;  %v1356_v15 = vld [vmem:[%s5437_s18 + $0x73] sm:$0xff] }
  0xab   : > { %1230 = vmatprep.mubr.f32.mxu0 %v7298_v7 }
  0xae   : > { %4206 = vmatmul.mubr.msk.f32.gmra.mrb[26].mxu0 %vm401_vm3, %v990_v16  ;;  %v387_v16 = vld [vmem:[%s5437_s18 + $0xc9] sm:$0xff] }
  0xaf   : > { %1236 = vmatprep.mubr.f32.mxu0 %v7298_v7  ;;  %4152 = vmatmul.mubr.msk.f32.gmra.mrb[38].mxu1 %vm401_vm3, %v387_v16 }
  0xb0   : > { %665 = vmatprep.mubr.f32.mxu1 %v7298_v7 }
  0xb2   : > { %4207 = vmatmul.mubr.msk.f32.gmra.mrb[28].mxu0 %vm401_vm3, %v991_v19  ;;  %v1358_v19 = vld [vmem:[%s5437_s18 + $0x8b] sm:$0xff] }
  0xb3   : > { %1242 = vmatprep.mubr.f32.mxu0 %v7298_v7  ;;  %4153 = vmatmul.mubr.msk.f32.gmra.mrb[40].mxu1 %vm401_vm3, %v388_v18 }
  0xb4   : > { %671 = vmatprep.mubr.f32.mxu1 %v7298_v7 }
  0xb6   : > { %4208 = vmatmul.mubr.msk.f32.gmra.mrb[30].mxu0 %vm401_vm3, %v992_v26  ;;  %v1362_v26 = vld [vmem:[%s5437_s18 + $0xb3] sm:$0xff] }
  0xb7   : > { %1248 = vmatprep.mubr.f32.mxu0 %v7298_v7  ;;  %4154 = vmatmul.mubr.msk.f32.gmra.mrb[42].mxu1 %vm401_vm3, %v389_v20 }
  0xb8   : > { %677 = vmatprep.mubr.f32.mxu1 %v7298_v7 }
  0xba   : > { %4209 = vmatmul.mubr.msk.f32.gmra.mrb[32].mxu0 %vm401_vm3, %v993_v31  ;;  %v1367_v31 = vld [vmem:[%s5437_s18 + $0xeb] sm:$0xff] }
  0xbb   : > { %1254 = vmatprep.mubr.f32.mxu0 %v7298_v7  ;;  %4155 = vmatmul.mubr.msk.f32.gmra.mrb[44].mxu1 %vm401_vm3, %v390_v22 }
  0xbc   : > { %683 = vmatprep.mubr.f32.mxu1 %v7298_v7 }
  0xbe   : > { %4210 = vmatmul.mubr.msk.f32.gmra.mrb[34].mxu0 %vm401_vm3, %v994_v33  ;;  %v1713_v33 = vld [vmem:[%s5437_s18 + $0x4] sm:$0xff] }
  0xbf   : > { %1260 = vmatprep.mubr.f32.mxu0 %v7298_v7  ;;  %4156 = vmatmul.mubr.msk.f32.gmra.mrb[46].mxu1 %vm401_vm3, %v391_v24 }
  0xc0   : > { %2660 = vmatprep.mubr.f32.mxu1 %v7298_v7 }
  0xc2   : > { %4211 = vmatmul.mubr.msk.f32.gmra.mrb[36].mxu0 %vm401_vm3, %v995_v35  ;;  %v1715_v35 = vld [vmem:[%s5437_s18 + $0x14] sm:$0xff] }
  0xc3   : > { %1266 = vmatprep.mubr.f32.mxu0 %v7298_v7 }
  0xc6   : > { %4212 = vmatmul.mubr.msk.f32.gmra.mrb[38].mxu0 %vm401_vm3, %v996_v37  ;;  %v1717_v37 = vld [vmem:[%s5437_s18 + $0x2c] sm:$0xff] }
  0xc7   : > { %1272 = vmatprep.mubr.f32.mxu0 %v7298_v7 }
  0xca   : > { %4213 = vmatmul.mubr.msk.f32.gmra.mrb[40].mxu0 %vm401_vm3, %v997_v39  ;;  %v1719_v39 = vld [vmem:[%s5437_s18 + $0x44] sm:$0xff] }
  0xcb   : > { %1278 = vmatprep.mubr.f32.mxu0 %v7298_v7 }
  0xce   : > { %4214 = vmatmul.mubr.msk.f32.gmra.mrb[42].mxu0 %vm401_vm3, %v998_v41  ;;  %v1721_v41 = vld [vmem:[%s5437_s18 + $0x54] sm:$0xff] }
  0xcf   : > { %1284 = vmatprep.mubr.f32.mxu0 %v7298_v7 }
  0xd2   : > { %4215 = vmatmul.mubr.msk.f32.gmra.mrb[44].mxu0 %vm401_vm3, %v999_v43  ;;  %v1723_v43 = vld [vmem:[%s5437_s18 + $0x6c] sm:$0xff] }
  0xd3   : > { %1290 = vmatprep.mubr.f32.mxu0 %v7298_v7 }
  0xd6   : > { %4216 = vmatmul.mubr.msk.f32.gmra.mrb[46].mxu0 %vm401_vm3, %v1000_v45  ;;  %v1725_v45 = vld [vmem:[%s5437_s18 + $0x84] sm:$0xff] }
  0xd7   : > { %1520 = vmatprep.mubr.f32.mxu0 %v7298_v7 }
  0xda   : > { %4227 = vmatmul.mubr.msk.f32.vlgmr.msra.gmra.mrb[0].mxu0 %vm401_vm3, %v1345_v51  ;;  %v1731_v51 = vld [vmem:[%s5437_s18 + $0xc4] sm:$0xff] }
  0xdb   : > { %4692 = vmatpush1.bf16.msra.mxu0 %v4691_v52  ;;  %1526 = vmatprep.mubr.f32.mxu0 %v7298_v7  ;;  %v1732_v52 = vld [vmem:[%s5437_s18 + $0xcc] sm:$0xff] }
  0xdc   : > { %4695 = vmatprep.subr.msk.bf16.mxu0 %vm5404_vm2, %v4693_v54  ;;  %v1734_v54 = vld [vmem:[%s5437_s18 + $0xe4] sm:$0xff] }
  0xde   : > { %4228 = vmatmul.mubr.msk.f32.gmra.mrb[2].mxu0 %vm401_vm3, %v1346_v57  ;;  %v1735_v57 = vld [vmem:[%s5437_s18 + $0xec] sm:$0xff] }
  0xdf   : > { %1532 = vmatprep.mubr.f32.mxu0 %v7298_v7  ;;  %4698 = vmatpush1.bf16.msk.msra.mxu0 %vm5404_vm2, %v4696_v58 }
  0xe2   : > { %4229 = vmatmul.mubr.msk.f32.gmra.mrb[4].mxu0 %vm401_vm3, %v1347_v60  ;;  %v1736_v60 = vld [vmem:[%s5437_s18 + $0xf4] sm:$0xff] }
  0xe3   : > { %1538 = vmatprep.mubr.f32.mxu0 %v7298_v7 }
  0xe6   : > { %4230 = vmatmul.mubr.msk.f32.gmra.mrb[6].mxu0 %vm401_vm3, %v1348_v62 }
  0xe7   : > { %1544 = vmatprep.mubr.f32.mxu0 %v7298_v7 }
  0xea   : > { %4231 = vmatmul.mubr.msk.f32.gmra.mrb[8].mxu0 %vm401_vm3, %v1349_v9 }
  0xeb   : > { %1550 = vmatprep.mubr.f32.mxu0 %v7298_v7 }
  0xee   : > { %4232 = vmatmul.mubr.msk.f32.gmra.mrb[10].mxu0 %vm401_vm3, %v1350_v1 }
  0xef   : > { %1556 = vmatprep.mubr.f32.mxu0 %v7298_v7 }
  0xf2   : > { %4233 = vmatmul.mubr.msk.f32.gmra.mrb[12].mxu0 %vm401_vm3, %v1351_v3 }
  0xf3   : > { %1562 = vmatprep.mubr.f32.mxu0 %v7298_v7 }
  0xf6   : > { %4234 = vmatmul.mubr.msk.f32.gmra.mrb[14].mxu0 %vm401_vm3, %v1352_v5 }
  0xf7   : > { %1568 = vmatprep.mubr.f32.mxu0 %v7298_v7 }
  0xfa   : > { %4235 = vmatmul.mubr.msk.f32.gmra.mrb[16].mxu0 %vm401_vm3, %v1353_v8 }
  0xfb   : > { %1574 = vmatprep.mubr.f32.mxu0 %v7298_v7 }
  0xfe   : > { %4236 = vmatmul.mubr.msk.f32.gmra.mrb[18].mxu0 %vm401_vm3, %v1354_v11 }
  0xff   : > { %1580 = vmatprep.mubr.f32.mxu0 %v7298_v7 }
 0x102   : > { %4237 = vmatmul.mubr.msk.f32.gmra.mrb[20].mxu0 %vm401_vm3, %v1355_v13 }
 0x103   : > { %1586 = vmatprep.mubr.f32.mxu0 %v7298_v7  ;;  %v5887_v55 = vpop.f32.mrb[0].mxu1 }
 0x104   : > { %v5889_v56 = vpop.f32.mrb[1].mxu1 }
 0x106   : > { %4238 = vmatmul.mubr.msk.f32.gmra.mrb[22].mxu0 %vm401_vm3, %v1356_v15 }
 0x107   : > { %1592 = vmatprep.mubr.f32.mxu0 %v7298_v7  ;;  %v5894_v58 = vpop.f32.mrb[2].mxu1 }
 0x108   : > { %v5896_v59 = vpop.f32.mrb[3].mxu1 }
 0x10a   : > { %4239 = vmatmul.mubr.msk.f32.gmra.mrb[24].mxu0 %vm401_vm3, %v1357_v17 }
 0x10b   : > { %1598 = vmatprep.mubr.f32.mxu0 %v7298_v7  ;;  %v5901_v61 = vpop.f32.mrb[4].mxu1 }
 0x10c   : > { %v5904_v62 = vpop.f32.mrb[5].mxu1 }
 0x10e   : > { %4240 = vmatmul.mubr.msk.f32.gmra.mrb[26].mxu0 %vm401_vm3, %v1358_v19 }
 0x10f   : > { %1604 = vmatprep.mubr.f32.mxu0 %v7298_v7 }
 0x112   : > { %4241 = vmatmul.mubr.msk.f32.gmra.mrb[28].mxu0 %vm401_vm3, %v1359_v21  ;;  %v5906_v63 = vpop.f32.mrb[6].mxu1 }
 0x113   : > { %1610 = vmatprep.mubr.f32.mxu0 %v7298_v7  ;;  %v5908_v9 = vpop.f32.mrb[7].mxu1 }
 0x116   : > { %4242 = vmatmul.mubr.msk.f32.gmra.mrb[30].mxu0 %vm401_vm3, %v1360_v23 }
 0x117   : > { %1616 = vmatprep.mubr.f32.mxu0 %v7298_v7 }
 0x11a   : > { %4243 = vmatmul.mubr.msk.f32.gmra.mrb[32].mxu0 %vm401_vm3, %v1361_v25  ;;  %v5910_v0 = vpop.f32.mrb[8].mxu1 }
 0x11b   : > { %1622 = vmatprep.mubr.f32.mxu0 %v7298_v7  ;;  %v5912_v1 = vpop.f32.mrb[9].mxu1 }
 0x11e   : > { %4244 = vmatmul.mubr.msk.f32.gmra.mrb[34].mxu0 %vm401_vm3, %v1362_v26 }
 0x11f   : > { %1628 = vmatprep.mubr.f32.mxu0 %v7298_v7 }
 0x122   : > { %4245 = vmatmul.mubr.msk.f32.gmra.mrb[36].mxu0 %vm401_vm3, %v1363_v27  ;;  %v5914_v2 = vpop.f32.mrb[10].mxu1 }
 0x123   : > { %1634 = vmatprep.mubr.f32.mxu0 %v7298_v7  ;;  %v5916_v3 = vpop.f32.mrb[11].mxu1 }
 0x126   : > { %4246 = vmatmul.mubr.msk.f32.gmra.mrb[38].mxu0 %vm401_vm3, %v1364_v28 }
 0x127   : > { %1640 = vmatprep.mubr.f32.mxu0 %v7298_v7 }
 0x12a   : > { %4247 = vmatmul.mubr.msk.f32.gmra.mrb[40].mxu0 %vm401_vm3, %v1365_v29  ;;  %v5918_v4 = vpop.f32.mrb[12].mxu1 }
 0x12b   : > { %1646 = vmatprep.mubr.f32.mxu0 %v7298_v7  ;;  %v5920_v5 = vpop.f32.mrb[13].mxu1 }
 0x12e   : > { %4248 = vmatmul.mubr.msk.f32.gmra.mrb[42].mxu0 %vm401_vm3, %v1366_v30 }
 0x12f   : > { %1652 = vmatprep.mubr.f32.mxu0 %v7298_v7 }
 0x132   : > { %4249 = vmatmul.mubr.msk.f32.gmra.mrb[44].mxu0 %vm401_vm3, %v1367_v31  ;;  %v5922_v6 = vpop.f32.mrb[14].mxu1 }
 0x133   : > { %1658 = vmatprep.mubr.f32.mxu0 %v7298_v7  ;;  %v5924_v8 = vpop.f32.mrb[15].mxu1 }
 0x136   : > { %4250 = vmatmul.mubr.msk.f32.gmra.mrb[46].mxu0 %vm401_vm3, %v1368_v32  ;;  %v5926_v10 = vpop.f32.mrb[16].mxu1 }
 0x137   : > { %1888 = vmatprep.mubr.f32.mxu0 %v7298_v7  ;;  %v5928_v11 = vpop.f32.mrb[17].mxu1 }
 0x13a   : > { %4261 = vmatmul.mubr.msk.f32.vlgmr.msra.gmra.mrb[0].mxu0 %vm401_vm3, %v1713_v33 }
 0x13b   : > { %1894 = vmatprep.mubr.f32.mxu0 %v7298_v7 }
 0x13e   : > { %4262 = vmatmul.mubr.msk.f32.gmra.mrb[2].mxu0 %vm401_vm3, %v1714_v34 }
 0x13f   : > { %1900 = vmatprep.mubr.f32.mxu0 %v7298_v7 }
 0x142   : > { %4263 = vmatmul.mubr.msk.f32.gmra.mrb[4].mxu0 %vm401_vm3, %v1715_v35 }
 0x143   : > { %1906 = vmatprep.mubr.f32.mxu0 %v7298_v7 }
 0x146   : > { %4264 = vmatmul.mubr.msk.f32.gmra.mrb[6].mxu0 %vm401_vm3, %v1716_v36 }
 0x147   : > { %1912 = vmatprep.mubr.f32.mxu0 %v7298_v7 }
 0x14a   : > { %4265 = vmatmul.mubr.msk.f32.gmra.mrb[8].mxu0 %vm401_vm3, %v1717_v37 }
 0x14b   : > { %1918 = vmatprep.mubr.f32.mxu0 %v7298_v7 }
 0x14e   : > { %4266 = vmatmul.mubr.msk.f32.gmra.mrb[10].mxu0 %vm401_vm3, %v1718_v38 }
 0x14f   : > { %1924 = vmatprep.mubr.f32.mxu0 %v7298_v7 }
 0x150   : > { %v5930_v12 = vpop.f32.mrb[18].mxu1 }
 0x151   : > { %v5932_v13 = vpop.f32.mrb[19].mxu1 }
 0x152   : > { %4267 = vmatmul.mubr.msk.f32.gmra.mrb[12].mxu0 %vm401_vm3, %v1719_v39 }
 0x153   : > { %1930 = vmatprep.mubr.f32.mxu0 %v7298_v7 }
 0x154   : > { %v5934_v14 = vpop.f32.mrb[20].mxu1 }
 0x155   : > { %v5936_v15 = vpop.f32.mrb[21].mxu1 }
 0x156   : > { %4268 = vmatmul.mubr.msk.f32.gmra.mrb[14].mxu0 %vm401_vm3, %v1720_v40 }
 0x157   : > { %1936 = vmatprep.mubr.f32.mxu0 %v7298_v7 }
 0x158   : > { %v5938_v16 = vpop.f32.mrb[22].mxu1 }
 0x159   : > { %v5940_v17 = vpop.f32.mrb[23].mxu1 }
 0x15a   : > { %4269 = vmatmul.mubr.msk.f32.gmra.mrb[16].mxu0 %vm401_vm3, %v1721_v41 }
 0x15b   : > { %1942 = vmatprep.mubr.f32.mxu0 %v7298_v7 }
 0x15c   : > { %v5942_v18 = vpop.f32.mrb[24].mxu1 }
 0x15d   : > { %v5944_v19 = vpop.f32.mrb[25].mxu1 }
 0x15e   : > { %4270 = vmatmul.mubr.msk.f32.gmra.mrb[18].mxu0 %vm401_vm3, %v1722_v42  ;;  %v4286_v42 = vld [vmem:[%s7291_s3 + $0xf8] sm:$0xff] }
 0x15f   : > { %1948 = vmatprep.mubr.f32.mxu0 %v7298_v7 }
 0x160   : > { %v5946_v20 = vpop.f32.mrb[26].mxu1 }
 0x161   : > { %v5948_v21 = vpop.f32.mrb[27].mxu1 }
 0x162   : > { %4271 = vmatmul.mubr.msk.f32.gmra.mrb[20].mxu0 %vm401_vm3, %v1723_v43  ;;  %v4288_v43 = vld [vmem:[%s7291_s3 + $0x108] sm:$0xff] }
 0x163   : > { %1954 = vmatprep.mubr.f32.mxu0 %v7298_v7 }
 0x164   : > { %v5950_v22 = vpop.f32.mrb[28].mxu1 }
 0x165   : > { %v5952_v23 = vpop.f32.mrb[29].mxu1 }
 0x166   : > { %4272 = vmatmul.mubr.msk.f32.gmra.mrb[22].mxu0 %vm401_vm3, %v1724_v44  ;;  %v4285_v44 = vld [vmem:[%s7291_s3 + $0xf0] sm:$0xff] }
 0x167   : > { %1960 = vmatprep.mubr.f32.mxu0 %v7298_v7 }
 0x168   : > { %v5954_v24 = vpop.f32.mrb[30].mxu1 }
 0x169   : > { %v5956_v25 = vpop.f32.mrb[31].mxu1 }
 0x16a   : > { %4273 = vmatmul.mubr.msk.f32.gmra.mrb[24].mxu0 %vm401_vm3, %v1725_v45  ;;  %v4699_v45 = vpack.c.bf16 %v4288_v43, %v4286_v42  ;;  %v2081_v42 = vld [vmem:[%s7290_s2] sm:$0x3]  ;;  %v4294_v43 = vld [vmem:[%s7291_s3 + $0x138] sm:$0xff] }
 0x16b   : > { %1966 = vmatprep.mubr.f32.mxu0 %v7298_v7 }
 0x16c   : > { %v5958_v26 = vpop.f32.mrb[32].mxu1  ;;  %4700 = vmatprep.subr.bf16.mxu1 %v4699_v45 }
 0x16d   : > { %v5960_v27 = vpop.f32.mrb[33].mxu1 }
 0x16e   : > { %4274 = vmatmul.mubr.msk.f32.gmra.mrb[26].mxu0 %vm401_vm3, %v1726_v46  ;;  %v4287_v46 = vld [vmem:[%s7291_s3 + $0x100] sm:$0xff] }
 0x16f   : > { %1972 = vmatprep.mubr.f32.mxu0 %v7298_v7 }
 0x172   : > { %4275 = vmatmul.mubr.msk.f32.gmra.mrb[28].mxu0 %vm401_vm3, %v1727_v47  ;;  %v5962_v28 = vpop.f32.mrb[34].mxu1  ;;  %v4701_v47 = vpack.c.bf16 %v4287_v46, %v4285_v44  ;;  %v4296_v44 = vld [vmem:[%s7291_s3 + $0x148] sm:$0xff]  ;;  %v4293_v46 = vld [vmem:[%s7291_s3 + $0x130] sm:$0xff] }
 0x173   : > { %1978 = vmatprep.mubr.f32.mxu0 %v7298_v7  ;;  %v5964_v29 = vpop.f32.mrb[35].mxu1  ;;  %v4707_v45 = vpack.c.bf16 %v4296_v44, %v4294_v43  ;;  %v4300_v43 = vld [vmem:[%s7291_s3 + $0x168] sm:$0xff] }
 0x174   : > { %4702 = vmatpush1.bf16.msra.mxu1 %v4701_v47  ;;  %v4295_v47 = vld [vmem:[%s7291_s3 + $0x140] sm:$0xff] }
 0x176   : > { %4276 = vmatmul.mubr.msk.f32.gmra.mrb[30].mxu0 %vm401_vm3, %v1728_v48  ;;  %v2083_v48 = vlaneseq }
 0x177   : > { %1984 = vmatprep.mubr.f32.mxu0 %v7298_v7 }
 0x17a   : > { %4277 = vmatmul.mubr.msk.f32.gmra.mrb[32].mxu0 %vm401_vm3, %v1729_v49  ;;  %v5966_v30 = vpop.f32.mrb[36].mxu1  ;;  %v6002_v49 = vshrl.u32 %v2083_v48, 7 }
 0x17b   : > { %1990 = vmatprep.mubr.f32.mxu0 %v7298_v7  ;;  %v5968_v31 = vpop.f32.mrb[37].mxu1 }
 0x17c   : > { %v7300_v48 = vsub.s32 1, %v6002_v49 }
 0x17e   : > { %4278 = vmatmul.mubr.msk.f32.gmra.mrb[34].mxu0 %vm401_vm3, %v1730_v50  ;;  %v4290_v50 = vld [vmem:[%s7291_s3 + $0x118] sm:$0xff] }
 0x17f   : > { %1996 = vmatprep.mubr.f32.mxu0 %v7298_v7 }
 0x182   : > { %4279 = vmatmul.mubr.msk.f32.gmra.mrb[36].mxu0 %vm401_vm3, %v1731_v51  ;;  %v5970_v32 = vpop.f32.mrb[38].mxu1  ;;  %v4292_v51 = vld [vmem:[%s7291_s3 + $0x128] sm:$0xff] }
 0x183   : > { %2002 = vmatprep.mubr.f32.mxu0 %v7298_v7  ;;  %v5972_v33 = vpop.f32.mrb[39].mxu1 }
 0x186   : > { %4280 = vmatmul.mubr.msk.f32.gmra.mrb[38].mxu0 %vm401_vm3, %v1732_v52  ;;  %v5974_v34 = vpop.f32.mrb[40].mxu1  ;;  %v4289_v52 = vld [vmem:[%s7291_s3 + $0x110] sm:$0xff] }
 0x187   : > { %2008 = vmatprep.mubr.f32.mxu0 %v7298_v7  ;;  %v5976_v35 = vpop.f32.mrb[41].mxu1 }
 0x18a   : > { %4281 = vmatmul.mubr.msk.f32.gmra.mrb[40].mxu0 %vm401_vm3, %v1733_v53  ;;  %v5978_v36 = vpop.f32.mrb[42].mxu1  ;;  %v4703_v53 = vpack.c.bf16 %v4292_v51, %v4290_v50  ;;  %v4709_v51 = vpack.c.bf16 %v4295_v47, %v4293_v46  ;;  %v4297_v46 = vld [vmem:[%s7291_s3 + $0x150] sm:$0xff] }
 0x18b   : > { %2014 = vmatprep.mubr.f32.mxu0 %v7298_v7  ;;  %v5980_v37 = vpop.f32.mrb[43].mxu1 }
 0x18c   : > { %4704 = vmatprep.subr.bf16.mxu1 %v4703_v53 }
 0x18e   : > { %4282 = vmatmul.mubr.msk.f32.gmra.mrb[42].mxu0 %vm401_vm3, %v1734_v54  ;;  %v5982_v38 = vpop.f32.mrb[44].mxu1  ;;  %v4291_v54 = vld [vmem:[%s7291_s3 + $0x120] sm:$0xff] }
 0x18f   : > { %2020 = vmatprep.mubr.f32.mxu0 %v7298_v7  ;;  %v5984_v39 = vpop.f32.mrb[45].mxu1 }
 0x192   : > { %4283 = vmatmul.mubr.msk.f32.gmra.mrb[44].mxu0 %vm401_vm3, %v1735_v57  ;;  %v5986_v40 = vpop.f32.mrb[46].mxu1  ;;  %v4705_v57 = vpack.c.bf16 %v4291_v54, %v4289_v52 }
 0x193   : > { %2026 = vmatprep.mubr.f32.mxu0 %v7298_v7  ;;  %v5988_v41 = vpop.f32.mrb[47].mxu1 }
 0x194   : > { %4706 = vmatpush1.bf16.msra.mxu1 %v4705_v57  ;;  %v4298_v57 = vld [vmem:[%s7291_s3 + $0x158] sm:$0xff] }
 0x195   : > { %4708 = vmatprep.subr.bf16.mxu1 %v4707_v45  ;;  %v4711_v7 = vpack.c.bf16 %v4300_v43, %v4298_v57  ;;  %v6053_v45 = vrot.slane %v2081_v42, %v7300_v48  ;;  %v4302_v57 = vld [vmem:[%s7291_s3 + $0x178] sm:$0xff] }
 0x196   : > { %4284 = vmatmul.mubr.msk.f32.gmra.mrb[46].mxu0 %vm401_vm3, %v1736_v60  ;;  %v2085_v60 = vsub.s32 0, %v6002_v49 }
 0x198   : > { %v6035_v50 = vrot.slane %v2081_v42, %v2085_v60  ;;  %4710 = vmatpush1.bf16.msra.mxu1 %v4709_v51  ;;  %v4304_v42 = vld [vmem:[%s7291_s3 + $0x188] sm:$0xff] }
 0x199   : > { %4712 = vmatprep.subr.bf16.mxu1 %v4711_v7  ;;  %v4715_v43 = vpack.c.bf16 %v4304_v42, %v4302_v57  ;;  %v4301_v7 = vld [vmem:[%s7291_s3 + $0x170] sm:$0xff]  ;;  %v4307_v42 = vld [vmem:[%s7291_s3 + $0x1a0] sm:$0xff] }
 0x20d   : > { %v1890_v52 = vpop.f32.mrb[0].mxu0 }
 0x20e   : > { %v4908_v53 = vadd.f32 %v1890_v52, %v5887_v55  ;;  %v1892_v54 = vpop.f32.mrb[1].mxu0  ;;  %v4299_v55 = vld [vmem:[%s7291_s3 + $0x160] sm:$0xff] }
 0x20f   : > { %v4909_v44 = vadd.f32 %v1892_v54, %v5889_v56  ;;  %v4713_v51 = vpack.c.bf16 %v4299_v55, %v4297_v46 }
 0x210   : > { %v6056_v47 = vadd.f32 %v4908_v53, %v6035_v50 }
 0x211   : > { %v1896_v52 = vpop.f32.mrb[2].mxu0  ;;  %4714 = vmatpush1.bf16.msra.mxu1 %v4713_v51  ;;  %v2094_v46 = vadd.f32 %v4909_v44, %v6053_v45  ;;  %v4308_v44 = vld [vmem:[%s7291_s3 + $0x1a8] sm:$0xff] }
 0x212   : > { %v4910_v56 = vadd.f32 %v1896_v52, %v5894_v58  ;;  %2189 = vrot.lane.b32.xlu0 %v6056_v47, %s5279_s29  ;;  %v1898_v54 = vpop.f32.mrb[3].mxu0  ;;  %v4303_v58 = vld [vmem:[%s7291_s3 + $0x180] sm:$0xff]  ;;  %4716 = vmatprep.subr.bf16.mxu1 %v4715_v43 }
 0x213   : > { %v4911_v53 = vadd.f32 %v1898_v54, %v5896_v59  ;;  %v4717_v51 = vpack.c.bf16 %v4303_v58, %v4301_v7  ;;  %v4306_v54 = vld [vmem:[%s7291_s3 + $0x198] sm:$0xff] }
 0x214   : > { %v6076_v55 = vadd.f32 %v4910_v56, %v6035_v50  ;;  %v4719_v57 = vpack.c.bf16 %v4308_v44, %v4306_v54  ;;  %v4311_v54 = vld [vmem:[%s7291_s3 + $0x1c0] sm:$0xff] }
 0x215   : > { %v1902_v52 = vpop.f32.mrb[4].mxu0  ;;  %4718 = vmatpush1.bf16.msra.mxu1 %v4717_v51  ;;  %v2096_v43 = vadd.f32 %v4911_v53, %v6053_v45 }
 0x216   : > { %v4912_v48 = vadd.f32 %v1902_v52, %v5901_v61  ;;  %2191 = vrot.lane.b32.xlu0 %v2094_v46, %s5279_s29  ;;  %2193 = vrot.lane.b32.xlu1 %v6076_v55, %s5279_s29  ;;  %v1904_v59 = vpop.f32.mrb[5].mxu0  ;;  %v4305_v61 = vld [vmem:[%s7291_s3 + $0x190] sm:$0xff]  ;;  %v4310_v52 = vld [vmem:[%s7291_s3 + $0x1b8] sm:$0xff] }
 0x217   : > { %v4913_v56 = vadd.f32 %v1904_v59, %v5904_v62  ;;  %v4721_v58 = vpack.c.bf16 %v4307_v42, %v4305_v61  ;;  %4720 = vmatprep.subr.bf16.mxu1 %v4719_v57 }
 0x218   : > { %v6097_v7 = vadd.f32 %v4912_v48, %v6035_v50  ;;  %v4312_v48 = vld [vmem:[%s7291_s3 + $0x1c8] sm:$0xff] }
 0x219   : > { %v1908_v46 = vpop.f32.mrb[6].mxu0  ;;  %4722 = vmatpush1.bf16.msra.mxu1 %v4721_v58  ;;  %v4723_v59 = vpack.c.bf16 %v4312_v48, %v4310_v52  ;;  %v2098_v44 = vadd.f32 %v4913_v56, %v6053_v45 }
 0x21a   : > { %v4914_v62 = vadd.f32 %v1908_v46, %v5906_v63  ;;  %2195 = vrot.lane.b32.xlu1 %v2096_v43, %s5279_s29  ;;  %2197 = vrot.lane.b32.xlu0 %v6097_v7, %s5279_s29  ;;  %v1910_v51 = vpop.f32.mrb[7].mxu0  ;;  %v4309_v63 = vld [vmem:[%s7291_s3 + $0x1b0] sm:$0xff] }
 0x21b   : > { %v4915_v53 = vadd.f32 %v1910_v51, %v5908_v9  ;;  %v4725_v61 = vpack.c.bf16 %v4311_v54, %v4309_v63  ;;  %4724 = vmatprep.subr.bf16.mxu1 %v4723_v59 }
 0x21c   : > { %v6118_v57 = vadd.f32 %v4914_v62, %v6035_v50  ;;  %v4314_v62 = vld [vmem:[%s7291_s3 + $0x1d8] sm:$0xff] }
 0x21d   : > { %v1914_v42 = vpop.f32.mrb[8].mxu0  ;;  %4726 = vmatpush1.bf16.msra.mxu1 %v4725_v61  ;;  %v2100_v46 = vadd.f32 %v4915_v53, %v6053_v45 }
 0x21e   : > { %v4916_v9 = vadd.f32 %v1914_v42, %v5910_v0  ;;  %2199 = vrot.lane.b32.xlu1 %v2098_v44, %s5279_s29  ;;  %2201 = vrot.lane.b32.xlu0 %v6118_v57, %s5279_s29  ;;  %v1916_v43 = vpop.f32.mrb[9].mxu0  ;;  %v4313_v0 = vld [vmem:[%s7291_s3 + $0x1d0] sm:$0xff] }
 0x21f   : > { %v4917_v58 = vadd.f32 %v1916_v43, %v5912_v1  ;;  %2624 = vmatprep.subr.mxu1 %v4314_v62 }
 0x220   : > { %v6127_v56 = vadd.f32 %v4916_v9, %v6035_v50 }
 0x221   : > { %v1920_v51 = vpop.f32.mrb[10].mxu0  ;;  %2625 = vmatpush1.msra.mxu1 %v4313_v0  ;;  %v2102_v53 = vadd.f32 %v4917_v58, %v6053_v45 }
 0x222   : > { %v4918_v52 = vadd.f32 %v1920_v51, %v5914_v2  ;;  %2203 = vrot.lane.b32.xlu1 %v2100_v46, %s5279_s29  ;;  %2205 = vrot.lane.b32.xlu0 %v6127_v56, %s5279_s29  ;;  %v1922_v1 = vpop.f32.mrb[11].mxu0 }
 0x223   : > { %v4919_v48 = vadd.f32 %v1922_v1, %v5916_v3 }
 0x224   : > { %v6142_v59 = vadd.f32 %v4918_v52, %v6035_v50 }
 0x225   : > { %v1926_v63 = vpop.f32.mrb[12].mxu0  ;;  %v2104_v61 = vadd.f32 %v4919_v48, %v6053_v45 }
 0x226   : > { %v4920_v54 = vadd.f32 %v1926_v63, %v5918_v4  ;;  %2207 = vrot.lane.b32.xlu1 %v2102_v53, %s5279_s29  ;;  %2209 = vrot.lane.b32.xlu0 %v6142_v59, %s5279_s29  ;;  %v1928_v2 = vpop.f32.mrb[13].mxu0 }
 0x227   : > { %v4921_v44 = vadd.f32 %v1928_v2, %v5920_v5 }
 0x228   : > { %v6151_v3 = vadd.f32 %v4920_v54, %v6035_v50 }
 0x229   : > { %v1932_v42 = vpop.f32.mrb[14].mxu0  ;;  %v2106_v58 = vadd.f32 %v4921_v44, %v6053_v45 }
 0x22a   : > { %v4922_v9 = vadd.f32 %v1932_v42, %v5922_v6  ;;  %2211 = vrot.lane.b32.xlu1 %v2104_v61, %s5279_s29  ;;  %2213 = vrot.lane.b32.xlu0 %v6151_v3, %s5279_s29  ;;  %v1934_v4 = vpop.f32.mrb[15].mxu0 }
 0x22b   : > { %v4923_v43 = vadd.f32 %v1934_v4, %v5924_v8 }
 0x22c   : > { %v6160_v5 = vadd.f32 %v4922_v9, %v6035_v50 }
 0x22d   : > { %v1938_v46 = vpop.f32.mrb[16].mxu0  ;;  %v2108_v0 = vadd.f32 %v4923_v43, %v6053_v45 }
 0x22e   : > { %v4924_v62 = vadd.f32 %v1938_v46, %v5926_v10  ;;  %2215 = vrot.lane.b32.xlu1 %v2106_v58, %s5279_s29  ;;  %2217 = vrot.lane.b32.xlu0 %v6160_v5, %s5279_s29  ;;  %v1940_v6 = vpop.f32.mrb[17].mxu0 }
 0x22f   : > { %v4925_v51 = vadd.f32 %v1940_v6, %v5928_v11 }
 0x230   : > { %v6169_v8 = vadd.f32 %v4924_v62, %v6035_v50 }
 0x231   : > { %v1944_v52 = vpop.f32.mrb[18].mxu0  ;;  %v2110_v53 = vadd.f32 %v4925_v51, %v6053_v45 }
 0x232   : > { %v4926_v1 = vadd.f32 %v1944_v52, %v5930_v12  ;;  %2219 = vrot.lane.b32.xlu1 %v2108_v0, %s5279_s29  ;;  %2221 = vrot.lane.b32.xlu0 %v6169_v8, %s5279_s29  ;;  %v1946_v10 = vpop.f32.mrb[19].mxu0 }
 0x233   : > { %v4927_v48 = vadd.f32 %v1946_v10, %v5932_v13 }
 0x234   : > { %v6178_v11 = vadd.f32 %v4926_v1, %v6035_v50 }
 0x235   : > { %v1950_v63 = vpop.f32.mrb[20].mxu0  ;;  %v2112_v44 = vadd.f32 %v4927_v48, %v6053_v45 }
 0x236   : > { %v4928_v54 = vadd.f32 %v1950_v63, %v5934_v14  ;;  %2223 = vrot.lane.b32.xlu1 %v2110_v53, %s5279_s29  ;;  %2225 = vrot.lane.b32.xlu0 %v6178_v11, %s5279_s29  ;;  %v1952_v12 = vpop.f32.mrb[21].mxu0 }
 0x237   : > { %v4929_v2 = vadd.f32 %v1952_v12, %v5936_v15 }
 0x238   : > { %v6187_v13 = vadd.f32 %v4928_v54, %v6035_v50 }
 0x239   : > { %v1956_v61 = vpop.f32.mrb[22].mxu0  ;;  %v2114_v4 = vadd.f32 %v4929_v2, %v6053_v45 }
 0x23a   : > { %v4930_v42 = vadd.f32 %v1956_v61, %v5938_v16  ;;  %2227 = vrot.lane.b32.xlu1 %v2112_v44, %s5279_s29  ;;  %2229 = vrot.lane.b32.xlu0 %v6187_v13, %s5279_s29  ;;  %v1958_v14 = vpop.f32.mrb[23].mxu0 }
 0x23b   : > { %v4931_v9 = vadd.f32 %v1958_v14, %v5940_v17 }
 0x23c   : > { %v6196_v15 = vadd.f32 %v4930_v42, %v6035_v50 }
 0x23d   : > { %v1962_v43 = vpop.f32.mrb[24].mxu0  ;;  %v2116_v62 = vadd.f32 %v4931_v9, %v6053_v45 }
 0x23e   : > { %v4932_v58 = vadd.f32 %v1962_v43, %v5942_v18  ;;  %2231 = vrot.lane.b32.xlu1 %v2114_v4, %s5279_s29  ;;  %2233 = vrot.lane.b32.xlu0 %v6196_v15, %s5279_s29  ;;  %v1964_v16 = vpop.f32.mrb[25].mxu0 }
 0x23f   : > { %v4933_v46 = vadd.f32 %v1964_v16, %v5944_v19 }
 0x240   : > { %v6205_v17 = vadd.f32 %v4932_v58, %v6035_v50 }
 0x241   : > { %v1968_v6 = vpop.f32.mrb[26].mxu0  ;;  %v2118_v52 = vadd.f32 %v4933_v46, %v6053_v45 }
 0x242   : > { %v4934_v51 = vadd.f32 %v1968_v6, %v5946_v20  ;;  %2235 = vrot.lane.b32.xlu1 %v2116_v62, %s5279_s29  ;;  %2237 = vrot.lane.b32.xlu0 %v6205_v17, %s5279_s29  ;;  %v1970_v18 = vpop.f32.mrb[27].mxu0 }
 0x243   : > { %v4935_v0 = vadd.f32 %v1970_v18, %v5948_v21 }
 0x244   : > { %v6214_v19 = vadd.f32 %v4934_v51, %v6035_v50 }
 0x245   : > { %v1974_v1 = vpop.f32.mrb[28].mxu0  ;;  %v2120_v53 = vadd.f32 %v4935_v0, %v6053_v45  ;;  %v2479_v0 = vld [vmem:[%s7291_s3 + $0x8] sm:$0xff] }
 0x246   : > { %v4936_v10 = vadd.f32 %v1974_v1, %v5950_v22  ;;  %2239 = vrot.lane.b32.xlu1 %v2118_v52, %s5279_s29  ;;  %2241 = vrot.lane.b32.xlu0 %v6214_v19, %s5279_s29  ;;  %v1976_v20 = vpop.f32.mrb[29].mxu0 }
 0x247   : > { %v4937_v48 = vadd.f32 %v1976_v20, %v5952_v23 }
 0x248   : > { %v6223_v21 = vadd.f32 %v4936_v10, %v6035_v50 }
 0x249   : > { %v1980_v63 = vpop.f32.mrb[30].mxu0  ;;  %v2122_v2 = vadd.f32 %v4937_v48, %v6053_v45 }
 0x24a   : > { %v4938_v54 = vadd.f32 %v1980_v63, %v5954_v24  ;;  %2243 = vrot.lane.b32.xlu1 %v2120_v53, %s5279_s29  ;;  %2245 = vrot.lane.b32.xlu0 %v6223_v21, %s5279_s29  ;;  %v1982_v22 = vpop.f32.mrb[31].mxu0 }
 0x24b   : > { %v4939_v12 = vadd.f32 %v1982_v22, %v5956_v25 }
 0x24c   : > { %v6232_v23 = vadd.f32 %v4938_v54, %v6035_v50 }
 0x24d   : > { %v1986_v44 = vpop.f32.mrb[32].mxu0  ;;  %v2124_v14 = vadd.f32 %v4939_v12, %v6053_v45 }
 0x24e   : > { %v4940_v61 = vadd.f32 %v1986_v44, %v5958_v26  ;;  %2247 = vrot.lane.b32.xlu1 %v2122_v2, %s5279_s29  ;;  %2249 = vrot.lane.b32.xlu0 %v6232_v23, %s5279_s29  ;;  %v1988_v24 = vpop.f32.mrb[33].mxu0 }
 0x24f   : > { %v4941_v42 = vadd.f32 %v1988_v24, %v5960_v27 }
 0x250   : > { %v6241_v25 = vadd.f32 %v4940_v61, %v6035_v50 }
 0x251   : > { %v1992_v9 = vpop.f32.mrb[34].mxu0  ;;  %v2126_v58 = vadd.f32 %v4941_v42, %v6053_v45 }
 0x252   : > { %v4942_v4 = vadd.f32 %v1992_v9, %v5962_v28  ;;  %2251 = vrot.lane.b32.xlu1 %v2124_v14, %s5279_s29  ;;  %2253 = vrot.lane.b32.xlu0 %v6241_v25, %s5279_s29  ;;  %v1994_v26 = vpop.f32.mrb[35].mxu0 }
 0x253   : > { %v4943_v43 = vadd.f32 %v1994_v26, %v5964_v29 }
 0x254   : > { %v6250_v27 = vadd.f32 %v4942_v4, %v6035_v50 }
 0x255   : > { %v1998_v16 = vpop.f32.mrb[36].mxu0  ;;  %v2128_v6 = vadd.f32 %v4943_v43, %v6053_v45 }
 0x256   : > { %v4944_v46 = vadd.f32 %v1998_v16, %v5966_v30  ;;  %2255 = vrot.lane.b32.xlu1 %v2126_v58, %s5279_s29  ;;  %2257 = vrot.lane.b32.xlu0 %v6250_v27, %s5279_s29  ;;  %v2000_v28 = vpop.f32.mrb[37].mxu0 }
 0x257   : > { %v4945_v62 = vadd.f32 %v2000_v28, %v5968_v31  ;;  %v2481_v31 = vld [vmem:[%s7291_s3 + $0x18] sm:$0xff] }
 0x258   : > { %v6259_v29 = vadd.f32 %v4944_v46, %v6035_v50  ;;  %v4727_v1 = vpack.c.bf16 %v2481_v31, %v2479_v0 }
 0x259   : > { %v2004_v51 = vpop.f32.mrb[38].mxu0  ;;  %v2130_v10 = vadd.f32 %v4945_v62, %v6053_v45 }
 0x25a   : > { %v4946_v18 = vadd.f32 %v2004_v51, %v5970_v32  ;;  %2259 = vrot.lane.b32.xlu1 %v2128_v6, %s5279_s29  ;;  %2261 = vrot.lane.b32.xlu0 %v6259_v29, %s5279_s29  ;;  %v2006_v30 = vpop.f32.mrb[39].mxu0 }
 0x25b   : > { %v4947_v52 = vadd.f32 %v2006_v30, %v5972_v33  ;;  %4728 = vmatprep.subr.bf16.mxu1 %v4727_v1 }
 0x25c   : > { %v6274_v32 = vadd.f32 %v4946_v18, %v6035_v50 }
 0x25d   : > { %v2010_v20 = vpop.f32.mrb[40].mxu0  ;;  %v2132_v33 = vadd.f32 %v4947_v52, %v6053_v45 }
 0x25e   : > { %v4948_v48 = vadd.f32 %v2010_v20, %v5974_v34  ;;  %2263 = vrot.lane.b32.xlu1 %v2130_v10, %s5279_s29  ;;  %2265 = vrot.lane.b32.xlu0 %v6274_v32, %s5279_s29  ;;  %v2012_v53 = vpop.f32.mrb[41].mxu0 }
 0x25f   : > { %v4949_v63 = vadd.f32 %v2012_v53, %v5976_v35 }
 0x260   : > { %v6283_v54 = vadd.f32 %v4948_v48, %v6035_v50 }
 0x261   : > { %v2016_v22 = vpop.f32.mrb[42].mxu0  ;;  %v2134_v44 = vadd.f32 %v4949_v63, %v6053_v45 }
 0x262   : > { %v4950_v12 = vadd.f32 %v2016_v22, %v5978_v36  ;;  %2267 = vrot.lane.b32.xlu1 %v2132_v33, %s5279_s29  ;;  %2269 = vrot.lane.b32.xlu0 %v6283_v54, %s5279_s29  ;;  %v2018_v34 = vpop.f32.mrb[43].mxu0 }
 0x263   : > { %v4951_v2 = vadd.f32 %v2018_v34, %v5980_v37 }
 0x264   : > { %v6292_v35 = vadd.f32 %v4950_v12, %v6035_v50 }
 0x265   : > { %v2022_v61 = vpop.f32.mrb[44].mxu0  ;;  %v2136_v14 = vadd.f32 %v4951_v2, %v6053_v45 }
 0x266   : > { %v4952_v24 = vadd.f32 %v2022_v61, %v5982_v38  ;;  %2271 = vrot.lane.b32.xlu1 %v2134_v44, %s5279_s29  ;;  %2273 = vrot.lane.b32.xlu0 %v6292_v35, %s5279_s29  ;;  %v2024_v36 = vpop.f32.mrb[45].mxu0  ;;  %v2478_v61 = vld [vmem:[%s7291_s3] sm:$0xff] }
 0x267   : > { %v4953_v42 = vadd.f32 %v2024_v36, %v5984_v39 }
 0x268   : > { %v6301_v37 = vadd.f32 %v4952_v24, %v6035_v50  ;;  %v2480_v24 = vld [vmem:[%s7291_s3 + $0x10] sm:$0xff] }
 0x269   : > { %v2028_v9 = vpop.f32.mrb[46].mxu0  ;;  %v2138_v43 = vadd.f32 %v4953_v42, %v6053_v45  ;;  %v2483_v42 = vld [vmem:[%s7291_s3 + $0x28] sm:$0xff] }
 0x26a   : > { %v4954_v4 = vadd.f32 %v2028_v9, %v5986_v40  ;;  %2275 = vrot.lane.b32.xlu1 %v2136_v14, %s5279_s29  ;;  %2277 = vrot.lane.b32.xlu0 %v6301_v37, %s5279_s29  ;;  %v2030_v38 = vpop.f32.mrb[47].mxu0  ;;  %v2485_v14 = vld [vmem:[%s7291_s3 + $0x38] sm:$0xff] }
 0x26b   : > { %v4955_v26 = vadd.f32 %v2030_v38, %v5988_v41 }
 0x26c   : > { %v6310_v39 = vadd.f32 %v4954_v4, %v6035_v50 }
 0x26d   : > { %v2140_v40 = vadd.f32 %v4955_v26, %v6053_v45 }
 0x26e   : > { %2279 = vrot.lane.b32.xlu1 %v2138_v43, %s5279_s29  ;;  %2281 = vrot.lane.b32.xlu0 %v6310_v39, %s5279_s29 }
 0x272   : > { %2283 = vrot.lane.b32.xlu1 %v2140_v40, %s5279_s29  ;;  %v4731_v40 = vpack.c.bf16 %v2485_v14, %v2483_v42 }
 0x284   : > { %v2190_v58 = vpop.permute.xlu0 %2189 }
 0x288   : > { %v2192_v16 = vpop.permute.xlu0 %2191  ;;  %v2194_v46 = vpop.permute.xlu1 %2193 }
 0x289   : > { %v2286_v41 = vsel %vm2285_vm4, %v2190_v58, %v2192_v16  ;;  %v2482_v58 = vld [vmem:[%s7291_s3 + $0x20] sm:$0xff]  ;;  %v2484_v16 = vld [vmem:[%s7291_s3 + $0x30] sm:$0xff] }
 0x28a   : > { %v2334_v28 = vmax.f32 %v6056_v47, %v2286_v41 }
 0x28c   : > { %2359 = vst.msk [vmem:[#allocation2] sm:$0xff] %vm2358_vm5, %v2334_v28  ;;  %v2196_v50 = vpop.permute.xlu1 %2195  ;;  %v2198_v62 = vpop.permute.xlu0 %2197  ;;  %v2487_v28 = vld [vmem:[%s7291_s3 + $0x48] sm:$0xff] }
 0x28d   : > { %v2287_v6 = vsel %vm2285_vm4, %v2194_v46, %v2196_v50  ;;  %v2489_v50 = vld [vmem:[%s7291_s3 + $0x58] sm:$0xff] }
 0x28e   : > { %v2335_v51 = vmax.f32 %v6076_v55, %v2287_v6 }
 0x290   : > { %2360 = vst.msk [vmem:[#allocation2 + $0x8] sm:$0xff] %vm2358_vm5, %v2335_v51  ;;  %v2200_v45 = vpop.permute.xlu1 %2199  ;;  %v2202_v18 = vpop.permute.xlu0 %2201 }
 0x291   : > { %v2288_v30 = vsel %vm2285_vm4, %v2198_v62, %v2200_v45 }
 0x292   : > { %v2336_v0 = vmax.f32 %v6097_v7, %v2288_v30  ;;  %v4733_v30 = vpack.c.bf16 %v2484_v16, %v2482_v58  ;;  %v2499_v16 = vld [vmem:[%s7291_s3 + $0xa8] sm:$0xff] }
 0x294   : > { %2361 = vst.msk [vmem:[#allocation2 + $0x10] sm:$0xff] %vm2358_vm5, %v2336_v0  ;;  %v2204_v31 = vpop.permute.xlu1 %2203  ;;  %v2206_v47 = vpop.permute.xlu0 %2205 }
 0x295   : > { %v2289_v52 = vsel %vm2285_vm4, %v2202_v18, %v2204_v31  ;;  %v7306_v18 = vmov 0.0   ;;  %v4735_v31 = vpack.c.bf16 %v2489_v50, %v2487_v28 }
 0x296   : > { %v2337_v1 = vmax.f32 %v6118_v57, %v2289_v52  ;;  %v2488_v52 = vld [vmem:[%s7291_s3 + $0x50] sm:$0xff] }
 0x297   : > { %v2383_v10 = vld [vmem:[#allocation2] ss:$2 sm:$0xff]  ;;  %v2415_v20 = vld [vmem:[#allocation2 + $0x1] ss:$2 sm:$0xff] }
 0x298   : > { %2362 = vst.msk [vmem:[#allocation2 + $0x18] sm:$0xff] %vm2358_vm5, %v2337_v1  ;;  %v2208_v55 = vpop.permute.xlu1 %2207  ;;  %v2210_v48 = vpop.permute.xlu0 %2209  ;;  %v2446_v53 = vmax.f32 %v2383_v10, %v2415_v20  ;;  %v2491_v10 = vld [vmem:[%s7291_s3 + $0x68] sm:$0xff]  ;;  %v2493_v20 = vld [vmem:[%s7291_s3 + $0x78] sm:$0xff] }
 0x299   : > { %v2290_v63 = vsel %vm2285_vm4, %v2206_v47, %v2208_v55  ;;  %v2486_v47 = vld [vmem:[%s7291_s3 + $0x40] sm:$0xff] }
 0x29a   : > { %v2338_v33 = vmax.f32 %v6127_v56, %v2290_v63  ;;  %v6332_v44 = vmax.f32 %v2446_v53, 0.0 }
 0x29b   : > { %v2385_v7 = vld [vmem:[#allocation2 + $0x10] ss:$2 sm:$0xf]  ;;  %v2417_v22 = vld [vmem:[#allocation2 + $0x11] ss:$2 sm:$0xf] }
 0x29c   : > { %2363 = vst.msk [vmem:[#allocation2 + $0x20] sm:$0xff] %vm2358_vm5, %v2338_v33  ;;  %v2212_v12 = vpop.permute.xlu1 %2211  ;;  %v2214_v34 = vpop.permute.xlu0 %2213  ;;  %v2447_v2 = vmax.f32 %v2385_v7, %v2417_v22  ;;  %v2525_v38 = vrot.slane %v6332_v44, 1  ;;  %v4737_v22 = vpack.c.bf16 %v2488_v52, %v2486_v47  ;;  %v2505_v47 = vld [vmem:[%s7291_s3 + $0xd8] sm:$0xff] }
 0x29d   : > { %v2291_v57 = vsel %vm2285_vm4, %v2210_v48, %v2212_v12  ;;  %v4739_v12 = vpack.c.bf16 %v2493_v20, %v2491_v10 }
 0x29e   : > { %v2339_v56 = vmax.f32 %v6142_v59, %v2291_v57  ;;  %v6342_v36 = vmax.f32 %v2447_v2, 0.0  ;;  %v4729_v59 = vpack.c.bf16 %v2480_v24, %v2478_v61  ;;  %v2492_v2 = vld [vmem:[%s7291_s3 + $0x70] sm:$0xff]  ;;  %v2495_v24 = vld [vmem:[%s7291_s3 + $0x88] sm:$0xff] }
 0x2a0   : > { %2364 = vst.msk [vmem:[#allocation2 + $0x28] sm:$0xff] %vm2358_vm5, %v2339_v56  ;;  %v2216_v9 = vpop.permute.xlu1 %2215  ;;  %v2218_v4 = vpop.permute.xlu0 %2217  ;;  %v2526_v26 = vrot.slane %v6342_v36, 1  ;;  %v2497_v56 = vld [vmem:[%s7291_s3 + $0x98] sm:$0xff] }
 0x2a1   : > { %v2292_v43 = vsel %vm2285_vm4, %v2214_v34, %v2216_v9  ;;  %v2490_v34 = vld [vmem:[%s7291_s3 + $0x60] sm:$0xff] }
 0x2a2   : > { %v2340_v46 = vmax.f32 %v6151_v3, %v2292_v43  ;;  %v2527_v41 = vsel %vm2524_vm6, %v2525_v38, %v2526_v26  ;;  %v4743_v26 = vpack.c.bf16 %v2497_v56, %v2495_v24  ;;  %v2496_v43 = vld [vmem:[%s7291_s3 + $0x90] sm:$0xff] }
 0x2a3   : > { %4315 = vmatmul.mubr.msk.f32.vlgmr.msra.gmra.mrb[48].mxu1 %vm2358_vm5, %v2527_v41  ;;  %v2387_v62 = vld [vmem:[#allocation2 + $0x18] ss:$2 sm:$0xff]  ;;  %v2419_v6 = vld [vmem:[#allocation2 + $0x19] ss:$2 sm:$0xff] }
 0x2a4   : > { %2365 = vst.msk [vmem:[#allocation2 + $0x30] sm:$0xff] %vm2358_vm5, %v2340_v46  ;;  %v2220_v51 = vpop.permute.xlu1 %2219  ;;  %v2222_v45 = vpop.permute.xlu0 %2221  ;;  %2666 = vmatprep.mubr.f32.mxu1 %v7306_v18  ;;  %v2448_v3 = vmax.f32 %v2387_v62, %v2419_v6  ;;  %4730 = vmatpush1.bf16.msra.mxu1 %v4729_v59  ;;  %v2494_v59 = vld [vmem:[%s7291_s3 + $0x80] sm:$0xff]  ;;  %v2501_v46 = vld [vmem:[%s7291_s3 + $0xb8] sm:$0xff] }
 0x2a5   : > { %v2293_v0 = vsel %vm2285_vm4, %v2218_v4, %v2220_v51  ;;  %4732 = vmatprep.subr.bf16.mxu1 %v4731_v40  ;;  %v4745_v6 = vpack.c.bf16 %v2496_v43, %v2494_v59 }
 0x2a6   : > { %v2341_v1 = vmax.f32 %v6160_v5, %v2293_v0  ;;  %v6386_v7 = vmax.f32 %v2448_v3, 0.0  ;;  %v2498_v3 = vld [vmem:[%s7291_s3 + $0xa0] sm:$0xff] }
 0x2a7   : > { %v2389_v55 = vld [vmem:[#allocation2 + $0x28] ss:$2 sm:$0xf]  ;;  %v2421_v48 = vld [vmem:[#allocation2 + $0x29] ss:$2 sm:$0xf] }
 0x2a8   : > { %2366 = vst.msk [vmem:[#allocation2 + $0x38] sm:$0xff] %vm2358_vm5, %v2341_v1  ;;  %v2224_v53 = vpop.permute.xlu1 %2223  ;;  %v2226_v63 = vpop.permute.xlu0 %2225  ;;  %v2449_v33 = vmax.f32 %v2389_v55, %v2421_v48  ;;  %4734 = vmatpush1.bf16.msra.mxu1 %v4733_v30  ;;  %v2528_v9 = vrot.slane %v6386_v7, 1  ;;  %v2500_v30 = vld [vmem:[%s7291_s3 + $0xb0] sm:$0xff] }
 0x2a9   : > { %v2294_v5 = vsel %vm2285_vm4, %v2222_v45, %v2224_v53  ;;  %4736 = vmatprep.subr.bf16.mxu1 %v4735_v31  ;;  %v4747_v45 = vpack.c.bf16 %v2501_v46, %v2499_v16  ;;  %v2503_v31 = vld [vmem:[%s7291_s3 + $0xc8] sm:$0xff]  ;;  %v4749_v53 = vpack.c.bf16 %v2500_v30, %v2498_v3 }
 0x2aa   : > { %v2342_v57 = vmax.f32 %v6169_v8, %v2294_v5  ;;  %v6396_v61 = vmax.f32 %v2449_v33, 0.0  ;;  %v4741_v8 = vpack.c.bf16 %v2492_v2, %v2490_v34  ;;  %v2502_v33 = vld [vmem:[%s7291_s3 + $0xc0] sm:$0xff] }
 0x2ac   : > { %2367 = vst.msk [vmem:[#allocation2 + $0x40] sm:$0xff] %vm2358_vm5, %v2342_v57  ;;  %v2228_v42 = vpop.permute.xlu1 %2227  ;;  %v2230_v14 = vpop.permute.xlu0 %2229  ;;  %v2529_v4 = vrot.slane %v6396_v61, 1  ;;  %4738 = vmatpush1.bf16.msra.mxu1 %v4737_v22  ;;  %v2504_v22 = vld [vmem:[%s7291_s3 + $0xd0] sm:$0xff] }
 0x2ad   : > { %v2295_v38 = vsel %vm2285_vm4, %v2226_v63, %v2228_v42  ;;  %4740 = vmatprep.subr.bf16.mxu1 %v4739_v12  ;;  %v4751_v63 = vpack.c.bf16 %v2505_v47, %v2503_v31  ;;  %v4753_v56 = vpack.c.bf16 %v2504_v22, %v2502_v33 }
 0x2ae   : > { %v2343_v40 = vmax.f32 %v6178_v11, %v2295_v38  ;;  %v2530_v58 = vsel %vm2524_vm6, %v2528_v9, %v2529_v4  ;;  %v4332_v4 = vld [vmem:[%s7291_s3 + $0x1e8] sm:$0xff] }
 0x2af   : > { %4316 = vmatmul.mubr.msk.f32.gmra.mrb[50].mxu1 %vm2358_vm5, %v2530_v58  ;;  %v2391_v41 = vld [vmem:[#allocation2 + $0x30] ss:$2 sm:$0xff]  ;;  %v2423_v28 = vld [vmem:[#allocation2 + $0x31] ss:$2 sm:$0xff]  ;;  %v2506_v58 = vld [vmem:[%s7291_s3 + $0xe0] sm:$0xff] }
 0x2b0   : > { %2368 = vst.msk [vmem:[#allocation2 + $0x48] sm:$0xff] %vm2358_vm5, %v2343_v40  ;;  %v2232_v50 = vpop.permute.xlu1 %2231  ;;  %v2234_v62 = vpop.permute.xlu0 %2233  ;;  %2672 = vmatprep.mubr.f32.mxu1 %v7306_v18  ;;  %v2450_v11 = vmax.f32 %v2391_v41, %v2423_v28  ;;  %4742 = vmatpush1.bf16.msra.mxu1 %v4741_v8  ;;  %v4334_v8 = vld [vmem:[%s7291_s3 + $0x1f8] sm:$0xff] }
 0x2b1   : > { %v2296_v51 = vsel %vm2285_vm4, %v2230_v14, %v2232_v50  ;;  %4744 = vmatprep.subr.bf16.mxu1 %v4743_v26  ;;  %v4755_v16 = vpack.c.bf16 %v4334_v8, %v4332_v4 }
 0x2b2   : > { %v2344_v0 = vmax.f32 %v6187_v13, %v2296_v51  ;;  %v6440_v48 = vmax.f32 %v2450_v11, 0.0 }
 0x2b3   : > { %v2393_v52 = vld [vmem:[#allocation2 + $0x40] ss:$2 sm:$0xf]  ;;  %v2425_v1 = vld [vmem:[#allocation2 + $0x41] ss:$2 sm:$0xf] }
 0x2b4   : > { %2369 = vst.msk [vmem:[#allocation2 + $0x50] sm:$0xff] %vm2358_vm5, %v2344_v0  ;;  %v2236_v10 = vpop.permute.xlu1 %2235  ;;  %v2238_v20 = vpop.permute.xlu0 %2237  ;;  %v2451_v55 = vmax.f32 %v2393_v52, %v2425_v1  ;;  %4746 = vmatpush1.bf16.msra.mxu1 %v4745_v6  ;;  %v2531_v57 = vrot.slane %v6440_v48, 1 }
 0x2b5   : > { %v2297_v13 = vsel %vm2285_vm4, %v2234_v62, %v2236_v10  ;;  %4748 = vmatprep.subr.bf16.mxu1 %v4747_v45 }
 0x2b6   : > { %v2345_v5 = vmax.f32 %v6196_v15, %v2297_v13  ;;  %v6450_v12 = vmax.f32 %v2451_v55, 0.0  ;;  %v2507_v15 = vld [vmem:[%s7291_s3 + $0xe8] sm:$0xff] }
 0x2b8   : > { %2370 = vst.msk [vmem:[#allocation2 + $0x58] sm:$0xff] %vm2358_vm5, %v2345_v5  ;;  %v2240_v34 = vpop.permute.xlu1 %2239  ;;  %v2242_v2 = vpop.permute.xlu0 %2241  ;;  %v2532_v24 = vrot.slane %v6450_v12, 1  ;;  %4750 = vmatpush1.bf16.msra.mxu1 %v4749_v53 }
 0x2b9   : > { %v2298_v42 = vsel %vm2285_vm4, %v2238_v20, %v2240_v34  ;;  %4752 = vmatprep.subr.bf16.mxu1 %v4751_v63 }
 0x2ba   : > { %v2346_v14 = vmax.f32 %v6205_v17, %v2298_v42  ;;  %v2533_v9 = vsel %vm2524_vm6, %v2531_v57, %v2532_v24 }
 0x2bb   : > { %4317 = vmatmul.mubr.msk.f32.gmra.mrb[52].mxu1 %vm2358_vm5, %v2533_v9  ;;  %v2395_v38 = vld [vmem:[#allocation2 + $0x48] ss:$2 sm:$0xff]  ;;  %v2427_v26 = vld [vmem:[#allocation2 + $0x49] ss:$2 sm:$0xff] }
 0x2bc   : > { %2371 = vst.msk [vmem:[#allocation2 + $0x60] sm:$0xff] %vm2358_vm5, %v2346_v14  ;;  %v2244_v17 = vpop.permute.xlu1 %2243  ;;  %v2246_v59 = vpop.permute.xlu0 %2245  ;;  %2678 = vmatprep.mubr.f32.mxu1 %v7306_v18  ;;  %v2452_v43 = vmax.f32 %v2395_v38, %v2427_v26  ;;  %4754 = vmatpush1.bf16.msra.mxu1 %v4753_v56 }
 0x2bd   : > { %v2299_v40 = vsel %vm2285_vm4, %v2242_v2, %v2244_v17  ;;  %2753 = vmatprep.subr.mxu1 %v2507_v15 }
 0x2be   : > { %v2347_v46 = vmax.f32 %v6214_v19, %v2299_v40  ;;  %v6476_v6 = vmax.f32 %v2452_v43, 0.0 }
 0x2bf   : > { %v2397_v41 = vld [vmem:[#allocation2 + $0x58] ss:$2 sm:$0xf]  ;;  %v2429_v28 = vld [vmem:[#allocation2 + $0x59] ss:$2 sm:$0xf] }
 0x2c0   : > { %2372 = vst.msk [vmem:[#allocation2 + $0x68] sm:$0xff] %vm2358_vm5, %v2347_v46  ;;  %v2248_v50 = vpop.permute.xlu1 %2247  ;;  %v2250_v62 = vpop.permute.xlu0 %2249  ;;  %v2453_v11 = vmax.f32 %v2397_v41, %v2429_v28  ;;  %2754 = vmatpush1.msra.mxu1 %v2506_v58  ;;  %v2534_v0 = vrot.slane %v6476_v6, 1 }
 0x2c1   : > { %v2300_v51 = vsel %vm2285_vm4, %v2246_v59, %v2248_v50  ;;  %4756 = vmatprep.subr.bf16.mxu1 %v4755_v16 }
 0x2c2   : > { %v2348_v45 = vmax.f32 %v6223_v21, %v2300_v51  ;;  %v6480_v3 = vmax.f32 %v2453_v11, 0.0 }
 0x2c4   : > { %2373 = vst.msk [vmem:[#allocation2 + $0x70] sm:$0xff] %vm2358_vm5, %v2348_v45  ;;  %v2252_v19 = vpop.permute.xlu1 %2251  ;;  %v2254_v30 = vpop.permute.xlu0 %2253  ;;  %v2535_v31 = vrot.slane %v6480_v3, 1 }
 0x2c5   : > { %v2301_v47 = vsel %vm2285_vm4, %v2250_v62, %v2252_v19 }
 0x2c6   : > { %v2349_v52 = vmax.f32 %v6232_v23, %v2301_v47  ;;  %v2536_v1 = vsel %vm2524_vm6, %v2534_v0, %v2535_v31 }
 0x2c7   : > { %4318 = vmatmul.mubr.msk.f32.gmra.mrb[54].mxu1 %vm2358_vm5, %v2536_v1  ;;  %v2399_v10 = vld [vmem:[#allocation2 + $0x60] ss:$2 sm:$0xff]  ;;  %v2431_v21 = vld [vmem:[#allocation2 + $0x61] ss:$2 sm:$0xff] }
 0x2c8   : > { %2374 = vst.msk [vmem:[#allocation2 + $0x78] sm:$0xff] %vm2358_vm5, %v2349_v52  ;;  %v2256_v20 = vpop.permute.xlu1 %2255  ;;  %v2258_v55 = vpop.permute.xlu0 %2257  ;;  %2684 = vmatprep.mubr.f32.mxu1 %v7306_v18  ;;  %v2454_v53 = vmax.f32 %v2399_v10, %v2431_v21 }
 0x2c9   : > { %v2302_v13 = vsel %vm2285_vm4, %v2254_v30, %v2256_v20 }
 0x2ca   : > { %v2350_v63 = vmax.f32 %v6241_v25, %v2302_v13  ;;  %v6493_v33 = vmax.f32 %v2454_v53, 0.0 }
 0x2cb   : > { %v2401_v23 = vld [vmem:[#allocation2 + $0x70] ss:$2 sm:$0xf]  ;;  %v2433_v22 = vld [vmem:[#allocation2 + $0x71] ss:$2 sm:$0xf] }
 0x2cc   : > { %2375 = vst.msk [vmem:[#allocation2 + $0x80] sm:$0xff] %vm2358_vm5, %v2350_v63  ;;  %v2260_v5 = vpop.permute.xlu1 %2259  ;;  %v2262_v34 = vpop.permute.xlu0 %2261  ;;  %v2455_v2 = vmax.f32 %v2401_v23, %v2433_v22  ;;  %v2537_v42 = vrot.slane %v6493_v33, 1  ;;  %v2851_v14 = vrot.slane %v6493_v33, 2  ;;  %v3052_v8 = vrot.slane %v6493_v33, 3 }
 0x2cd   : > { %v2303_v57 = vsel %vm2285_vm4, %v2258_v55, %v2260_v5 }
 0x2ce   : > { %v2351_v24 = vmax.f32 %v6250_v27, %v2303_v57  ;;  %v2471_v56 = vmax.f32 %v2455_v2, 0.0  ;;  %v3252_v27 = vrot.slane %v6493_v33, 4 }
 0x2d0   : > { %2376 = vst.msk [vmem:[#allocation2 + $0x88] sm:$0xff] %vm2358_vm5, %v2351_v24  ;;  %v2264_v25 = vpop.permute.xlu1 %2263  ;;  %v2266_v9 = vpop.permute.xlu0 %2265  ;;  %v2538_v15 = vrot.slane %v2471_v56, 1  ;;  %v2852_v4 = vrot.slane %v2471_v56, 2  ;;  %v3053_v38 = vrot.slane %v2471_v56, 3  ;;  %v3253_v17 = vrot.slane %v2471_v56, 4 }
 0x2d1   : > { %v2304_v26 = vsel %vm2285_vm4, %v2262_v34, %v2264_v25 }
 0x2d2   : > { %v2352_v59 = vmax.f32 %v6259_v29, %v2304_v26  ;;  %v2539_v43 = vsel %vm2524_vm6, %v2537_v42, %v2538_v15  ;;  %v6507_v40 = vsel %vm2838_vm7, %v2851_v14, %v2852_v4  ;;  %v6510_v58 = vsel %vm3039_vm8, %v3052_v8, %v3053_v38 }
 0x2d3   : > { %4319 = vmatmul.mubr.msk.f32.gmra.mrb[56].mxu1 %vm2358_vm5, %v2539_v43  ;;  %v2403_v16 = vld [vmem:[#allocation2 + $0x78] ss:$2 sm:$0xff]  ;;  %v2435_v46 = vld [vmem:[#allocation2 + $0x79] ss:$2 sm:$0xff]  ;;  %v6514_v41 = vsel %vm474_vm0, %v3252_v27, %v3253_v17 }
 0x2d4   : > { %2377 = vst.msk [vmem:[#allocation2 + $0x90] sm:$0xff] %vm2358_vm5, %v2352_v59  ;;  %v2268_v28 = vpop.permute.xlu1 %2267  ;;  %v2270_v50 = vpop.permute.xlu0 %2269  ;;  %2690 = vmatprep.mubr.f32.mxu1 %v7306_v18  ;;  %v2456_v29 = vmax.f32 %v2403_v16, %v2435_v46 }
 0x2d5   : > { %v2305_v62 = vsel %vm2285_vm4, %v2266_v9, %v2268_v28 }
 0x2d6   : > { %v2353_v11 = vmax.f32 %v6274_v32, %v2305_v62  ;;  %v6520_v51 = vmax.f32 %v2456_v29, 0.0 }
 0x2d7   : > { %v2405_v45 = vld [vmem:[#allocation2 + $0x88] ss:$2 sm:$0xf]  ;;  %v2437_v19 = vld [vmem:[#allocation2 + $0x89] ss:$2 sm:$0xf] }
 0x2d8   : > { %2378 = vst.msk [vmem:[#allocation2 + $0x98] sm:$0xff] %vm2358_vm5, %v2353_v11  ;;  %v2272_v30 = vpop.permute.xlu1 %2271  ;;  %v2274_v0 = vpop.permute.xlu0 %2273  ;;  %v2457_v31 = vmax.f32 %v2405_v45, %v2437_v19  ;;  %v2540_v10 = vrot.slane %v6520_v51, 1  ;;  %v2854_v21 = vrot.slane %v6520_v51, 2  ;;  %v3055_v32 = vrot.slane %v6520_v51, 3 }
 0x2d9   : > { %v2306_v47 = vsel %vm2285_vm4, %v2270_v50, %v2272_v30  ;;  %v3255_v22 = vrot.slane %v6520_v51, 4 }
 0x2da   : > { %v2354_v52 = vmax.f32 %v6283_v54, %v2306_v47  ;;  %v2473_v1 = vmax.f32 %v2457_v31, 0.0 }
 0x2dc   : > { %2379 = vst.msk [vmem:[#allocation2 + $0xa0] sm:$0xff] %vm2358_vm5, %v2354_v52  ;;  %v2276_v20 = vpop.permute.xlu1 %2275  ;;  %v2541_v55 = vrot.slane %v2473_v1, 1  ;;  %v2855_v53 = vrot.slane %v2473_v1, 2  ;;  %v3056_v13 = vrot.slane %v2473_v1, 3  ;;  %v3256_v63 = vrot.slane %v2473_v1, 4  ;;  %v2278_v5 = vpop.permute.xlu0 %2277 }
 0x2dd   : > { %v2307_v23 = vsel %vm2285_vm4, %v2274_v0, %v2276_v20 }
 0x2de   : > { %v2355_v54 = vmax.f32 %v6292_v35, %v2307_v23  ;;  %v2542_v34 = vsel %vm2524_vm6, %v2540_v10, %v2541_v55  ;;  %v6534_v2 = vsel %vm2838_vm7, %v2854_v21, %v2855_v53  ;;  %v6537_v57 = vsel %vm3039_vm8, %v3055_v32, %v3056_v13 }
 0x2df   : > { %4320 = vmatmul.mubr.msk.f32.gmra.mrb[58].mxu1 %vm2358_vm5, %v2542_v34  ;;  %v2407_v24 = vld [vmem:[#allocation2 + $0x90] ss:$2 sm:$0xff]  ;;  %v2439_v56 = vld [vmem:[#allocation2 + $0x91] ss:$2 sm:$0xff]  ;;  %v6541_v42 = vsel %vm474_vm0, %v3255_v22, %v3256_v63 }
 0x2e0   : > { %2380 = vst.msk [vmem:[#allocation2 + $0xa8] sm:$0xff] %vm2358_vm5, %v2355_v54  ;;  %v2280_v14 = vpop.permute.xlu1 %2279  ;;  %2696 = vmatprep.mubr.f32.mxu1 %v7306_v18  ;;  %v2458_v35 = vmax.f32 %v2407_v24, %v2439_v56  ;;  %v2282_v38 = vpop.permute.xlu0 %2281  ;;  %v4333_v34 = vld [vmem:[%s7291_s3 + $0x1f0] sm:$0xff]  ;;  %v4336_v56 = vld [vmem:[%s7291_s3 + $0x208] sm:$0xff] }
 0x2e1   : > { %v2308_v25 = vsel %vm2285_vm4, %v2278_v5, %v2280_v14  ;;  %v4331_v5 = vld [vmem:[%s7291_s3 + $0x1e0] sm:$0xff]  ;;  %v4338_v14 = vld [vmem:[%s7291_s3 + $0x218] sm:$0xff] }
 0x2e2   : > { %v2356_v9 = vmax.f32 %v6301_v37, %v2308_v25  ;;  %v6547_v15 = vmax.f32 %v2458_v35, 0.0 }
 0x2e3   : > { %v2409_v4 = vld [vmem:[#allocation2 + $0xa0] ss:$2 sm:$0xf]  ;;  %v2441_v8 = vld [vmem:[#allocation2 + $0xa1] ss:$2 sm:$0xf] }
 0x2e4   : > { %2381 = vst.msk [vmem:[#allocation2 + $0xb0] sm:$0xff] %vm2358_vm5, %v2356_v9  ;;  %v2284_v26 = vpop.permute.xlu1 %2283  ;;  %v2459_v27 = vmax.f32 %v2409_v4, %v2441_v8  ;;  %v2543_v16 = vrot.slane %v6547_v15, 1  ;;  %v2857_v46 = vrot.slane %v6547_v15, 2  ;;  %v3058_v37 = vrot.slane %v6547_v15, 3 }
 0x2e5   : > { %v2309_v17 = vsel %vm2285_vm4, %v2282_v38, %v2284_v26  ;;  %v3258_v28 = vrot.slane %v6547_v15, 4  ;;  %v4757_v4 = vpack.c.bf16 %v4333_v34, %v4331_v5  ;;  %v4759_v8 = vpack.c.bf16 %v4338_v14, %v4336_v56  ;;  %v4335_v38 = vld [vmem:[%s7291_s3 + $0x200] sm:$0xff]  ;;  %v4337_v26 = vld [vmem:[%s7291_s3 + $0x210] sm:$0xff]  ;;  %v4370_v56 = vld [vmem:[%s7291_s3 + $0x2d8] sm:$0xff] }
 0x2e6   : > { %v2357_v59 = vmax.f32 %v6310_v39, %v2309_v17  ;;  %v2475_v43 = vmax.f32 %v2459_v27, 0.0  ;;  %v4340_v27 = vld [vmem:[%s7291_s3 + $0x228] sm:$0xff]  ;;  %v4342_v17 = vld [vmem:[%s7291_s3 + $0x238] sm:$0xff]  ;;  %v4355_v5 = vld [vmem:[%s7291_s3 + $0x2a0] sm:$0xff] }
 0x2e7   : > { %v4357_v34 = vld [vmem:[%s7291_s3 + $0x2b0] sm:$0xff]  ;;  %v4372_v14 = vld [vmem:[%s7291_s3 + $0x2e8] sm:$0xff] }
 0x2e8   : > { %2382 = vst.msk [vmem:[#allocation2 + $0xb8] sm:$0xff] %vm2358_vm5, %v2357_v59  ;;  %v2544_v50 = vrot.slane %v2475_v43, 1  ;;  %v2858_v29 = vrot.slane %v2475_v43, 2  ;;  %v3059_v62 = vrot.slane %v2475_v43, 3  ;;  %v3259_v11 = vrot.slane %v2475_v43, 4 }
 0x2e9   : > { %v4761_v59 = vpack.c.bf16 %v4337_v26, %v4335_v38  ;;  %v4763_v43 = vpack.c.bf16 %v4342_v17, %v4340_v27  ;;  %v4371_v38 = vld [vmem:[%s7291_s3 + $0x2e0] sm:$0xff]  ;;  %v2840_v26 = vrot.slane %v6342_v36, 2  ;;  %v4376_v27 = vld [vmem:[%s7291_s3 + $0x308] sm:$0xff]  ;;  %v2839_v17 = vrot.slane %v6332_v44, 2 }
 0x2ea   : > { %v2545_v45 = vsel %vm2524_vm6, %v2543_v16, %v2544_v50  ;;  %v6559_v19 = vsel %vm2838_vm7, %v2857_v46, %v2858_v29  ;;  %v6562_v39 = vsel %vm3039_vm8, %v3058_v37, %v3059_v62  ;;  %v6565_v30 = vsel %vm474_vm0, %v3258_v28, %v3259_v11  ;;  %v4339_v16 = vld [vmem:[%s7291_s3 + $0x220] sm:$0xff]  ;;  %v4341_v46 = vld [vmem:[%s7291_s3 + $0x230] sm:$0xff]  ;;  %v4344_v37 = vld [vmem:[%s7291_s3 + $0x248] sm:$0xff] }
 0x2eb   : > { %4321 = vmatmul.mubr.msk.f32.gmra.mrb[60].mxu1 %vm2358_vm5, %v2545_v45  ;;  %v2411_v0 = vld [vmem:[#allocation2 + $0xa8] ss:$2 sm:$0xff]  ;;  %v2443_v31 = vld [vmem:[#allocation2 + $0xa9] ss:$2 sm:$0xff]  ;;  %v4346_v28 = vld [vmem:[%s7291_s3 + $0x258] sm:$0xff]  ;;  %v4765_v50 = vpack.c.bf16 %v4341_v46, %v4339_v16 }
 0x2ec   : > { %2702 = vmatprep.mubr.f32.mxu1 %v7306_v18  ;;  %v2460_v47 = vmax.f32 %v2411_v0, %v2443_v31  ;;  %v4767_v29 = vpack.c.bf16 %v4346_v28, %v4344_v37  ;;  %v4343_v62 = vld [vmem:[%s7291_s3 + $0x240] sm:$0xff]  ;;  %v4345_v11 = vld [vmem:[%s7291_s3 + $0x250] sm:$0xff]  ;;  %v4348_v45 = vld [vmem:[%s7291_s3 + $0x268] sm:$0xff]  ;;  %v2841_v37 = vsel %vm2838_vm7, %v2839_v17, %v2840_v26 }
 0x2ed   : > { %v4350_v0 = vld [vmem:[%s7291_s3 + $0x278] sm:$0xff]  ;;  %v4769_v31 = vpack.c.bf16 %v4345_v11, %v4343_v62  ;;  %v4373_v16 = vld [vmem:[%s7291_s3 + $0x2f0] sm:$0xff]  ;;  %v4375_v46 = vld [vmem:[%s7291_s3 + $0x300] sm:$0xff] }
 0x2ee   : > { %v6569_v52 = vmax.f32 %v2460_v47, 0.0  ;;  %v4771_v47 = vpack.c.bf16 %v4350_v0, %v4348_v45  ;;  %v4378_v28 = vld [vmem:[%s7291_s3 + $0x318] sm:$0xff]  ;;  %v4789_v62 = vpack.c.bf16 %v4375_v46, %v4373_v16  ;;  %v4377_v45 = vld [vmem:[%s7291_s3 + $0x310] sm:$0xff]  ;;  %v4379_v0 = vld [vmem:[%s7291_s3 + $0x320] sm:$0xff] }
 0x2ef   : > { %v2413_v1 = vld [vmem:[#allocation2 + $0xb8] ss:$2 sm:$0xf]  ;;  %v2445_v10 = vld [vmem:[#allocation2 + $0xb9] ss:$2 sm:$0xf] }
 0x2f0   : > { %v2461_v21 = vmax.f32 %v2413_v1, %v2445_v10  ;;  %v2546_v20 = vrot.slane %v6569_v52, 1  ;;  %v2860_v55 = vrot.slane %v6569_v52, 2  ;;  %v3061_v53 = vrot.slane %v6569_v52, 3  ;;  %v4347_v1 = vld [vmem:[%s7291_s3 + $0x260] sm:$0xff]  ;;  %v4349_v10 = vld [vmem:[%s7291_s3 + $0x270] sm:$0xff]  ;;  %v4398_v46 = vld [vmem:[%s7291_s3 + $0x3b8] sm:$0xff] }
 0x2f1   : > { %v3261_v13 = vrot.slane %v6569_v52, 4  ;;  %v4391_v26 = vld [vmem:[%s7291_s3 + $0x380] sm:$0xff] }
 0x2f2   : > { %v2477_v32 = vmax.f32 %v2461_v21, 0.0  ;;  %v4352_v21 = vld [vmem:[%s7291_s3 + $0x288] sm:$0xff]  ;;  %v4395_v16 = vld [vmem:[%s7291_s3 + $0x3a0] sm:$0xff] }
 0x2f4   : > { %v2547_v63 = vrot.slane %v2477_v32, 1  ;;  %v2861_v23 = vrot.slane %v2477_v32, 2  ;;  %v3062_v22 = vrot.slane %v2477_v32, 3  ;;  %v3262_v54 = vrot.slane %v2477_v32, 4  ;;  %v4354_v32 = vld [vmem:[%s7291_s3 + $0x298] sm:$0xff] }
 0x2f6   : > { %v2548_v24 = vsel %vm2524_vm6, %v2546_v20, %v2547_v63  ;;  %v6589_v35 = vsel %vm2838_vm7, %v2860_v55, %v2861_v23  ;;  %v6592_v25 = vsel %vm3039_vm8, %v3061_v53, %v3062_v22  ;;  %v6595_v9 = vsel %vm474_vm0, %v3261_v13, %v3262_v54  ;;  %v4351_v53 = vld [vmem:[%s7291_s3 + $0x280] sm:$0xff]  ;;  %v4353_v13 = vld [vmem:[%s7291_s3 + $0x290] sm:$0xff]  ;;  %v4356_v63 = vld [vmem:[%s7291_s3 + $0x2a8] sm:$0xff] }
 0x2f7   : > { %4322 = vmatmul.mubr.msk.f32.gmra.mrb[62].mxu1 %vm2358_vm5, %v2548_v24  ;;  %v4773_v20 = vpack.c.bf16 %v4349_v10, %v4347_v1  ;;  %v4775_v55 = vpack.c.bf16 %v4354_v32, %v4352_v21  ;;  %v4358_v23 = vld [vmem:[%s7291_s3 + $0x2b8] sm:$0xff]  ;;  %v4777_v22 = vpack.c.bf16 %v4353_v13, %v4351_v53  ;;  %v4360_v24 = vld [vmem:[%s7291_s3 + $0x2c8] sm:$0xff]  ;;  %v2845_v21 = vrot.slane %v6440_v48, 2  ;;  %v4383_v53 = vld [vmem:[%s7291_s3 + $0x340] sm:$0xff] }
 0x2f8   : > { %2789 = vmatprep.mubr.f32.mxu1 %v7306_v18  ;;  %v4779_v54 = vpack.c.bf16 %v4358_v23, %v4356_v63  ;;  %v4382_v1 = vld [vmem:[%s7291_s3 + $0x338] sm:$0xff]  ;;  %v4384_v10 = vld [vmem:[%s7291_s3 + $0x348] sm:$0xff]  ;;  %v4793_v32 = vpack.c.bf16 %v4379_v0, %v4377_v45  ;;  %v2849_v63 = vrot.slane %v6480_v3, 2  ;;  %v3040_v45 = vrot.slane %v6332_v44, 3 }
 0x2f9   : > { %v4386_v23 = vld [vmem:[%s7291_s3 + $0x358] sm:$0xff] }
 0x2fb   : > { %4323 = vmatmul.mubr.msk.f32.vlgmr.msra.gmra.mrb[48].mxu1 %vm2358_vm5, %v6332_v44 }
 0x2fc   : > { %4758 = vmatpush1.bf16.msra.mxu1 %v4757_v4  ;;  %2795 = vmatprep.mubr.f32.mxu1 %v7306_v18  ;;  %v4783_v4 = vpack.c.bf16 %v4372_v14, %v4370_v56  ;;  %v4390_v14 = vld [vmem:[%s7291_s3 + $0x378] sm:$0xff] }
 0x2fd   : > { %4760 = vmatprep.subr.bf16.mxu1 %v4759_v8  ;;  %v4369_v8 = vld [vmem:[%s7291_s3 + $0x2d0] sm:$0xff] }
 0x2ff   : > { %4324 = vmatmul.mubr.msk.f32.gmra.mrb[50].mxu1 %vm2358_vm5, %v6386_v7 }
 0x300   : > { %4762 = vmatpush1.bf16.msra.mxu1 %v4761_v59  ;;  %2801 = vmatprep.mubr.f32.mxu1 %v7306_v18  ;;  %v4785_v59 = vpack.c.bf16 %v4371_v38, %v4369_v8  ;;  %v4389_v38 = vld [vmem:[%s7291_s3 + $0x370] sm:$0xff] }
 0x301   : > { %4764 = vmatprep.subr.bf16.mxu1 %v4763_v43  ;;  %v4805_v17 = vpack.c.bf16 %v4391_v26, %v4389_v38  ;;  %v4426_v38 = vld [vmem:[%s7291_s3 + $0x458] sm:$0xff]  ;;  %v3049_v26 = vrot.slane %v6476_v6, 3 }
 0x303   : > { %4325 = vmatmul.mubr.msk.f32.gmra.mrb[52].mxu1 %vm2358_vm5, %v6440_v48 }
 0x304   : > { %4766 = vmatpush1.bf16.msra.mxu1 %v4765_v50  ;;  %2807 = vmatprep.mubr.f32.mxu1 %v7306_v18  ;;  %v4380_v50 = vld [vmem:[%s7291_s3 + $0x328] sm:$0xff] }
 0x305   : > { %4768 = vmatprep.subr.bf16.mxu1 %v4767_v29  ;;  %v2842_v29 = vrot.slane %v6386_v7, 2  ;;  %v4791_v11 = vpack.c.bf16 %v4380_v50, %v4378_v28  ;;  %v4407_v50 = vld [vmem:[%s7291_s3 + $0x3c0] sm:$0xff] }
 0x307   : > { %4326 = vmatmul.mubr.msk.f32.gmra.mrb[54].mxu1 %vm2358_vm5, %v6476_v6 }
 0x308   : > { %4770 = vmatpush1.bf16.msra.mxu1 %v4769_v31  ;;  %2813 = vmatprep.mubr.f32.mxu1 %v7306_v18 }
 0x309   : > { %4772 = vmatprep.subr.bf16.mxu1 %v4771_v47  ;;  %v2846_v47 = vrot.slane %v6450_v12, 2 }
 0x30b   : > { %4327 = vmatmul.mubr.msk.f32.gmra.mrb[56].mxu1 %vm2358_vm5, %v6493_v33  ;;  %v4781_v33 = vpack.c.bf16 %v4357_v34, %v4355_v5  ;;  %v2847_v13 = vsel %vm2838_vm7, %v2845_v21, %v2846_v47  ;;  %v4411_v47 = vld [vmem:[%s7291_s3 + $0x3e0] sm:$0xff]  ;;  %v4416_v21 = vld [vmem:[%s7291_s3 + $0x408] sm:$0xff] }
 0x30c   : > { %4774 = vmatpush1.bf16.msra.mxu1 %v4773_v20  ;;  %2819 = vmatprep.mubr.f32.mxu1 %v7306_v18  ;;  %v4795_v20 = vpack.c.bf16 %v4384_v10, %v4382_v1  ;;  %v4413_v1 = vld [vmem:[%s7291_s3 + $0x3f0] sm:$0xff] }
 0x30d   : > { %4776 = vmatprep.subr.bf16.mxu1 %v4775_v55  ;;  %v4381_v55 = vld [vmem:[%s7291_s3 + $0x330] sm:$0xff] }
 0x30e   : > { %v4797_v5 = vpack.c.bf16 %v4383_v53, %v4381_v55  ;;  %v4817_v55 = vpack.c.bf16 %v4413_v1, %v4411_v47  ;;  %v3244_v47 = vrot.slane %v6396_v61, 4  ;;  %v3243_v1 = vrot.slane %v6386_v7, 4 }
 0x30f   : > { %4328 = vmatmul.mubr.msk.f32.gmra.mrb[58].mxu1 %vm2358_vm5, %v6520_v51  ;;  %v4359_v51 = vld [vmem:[%s7291_s3 + $0x2c0] sm:$0xff] }
 0x310   : > { %4778 = vmatpush1.bf16.msra.mxu1 %v4777_v22  ;;  %2825 = vmatprep.mubr.f32.mxu1 %v7306_v18  ;;  %v4388_v22 = vld [vmem:[%s7291_s3 + $0x368] sm:$0xff] }
 0x311   : > { %4780 = vmatprep.subr.bf16.mxu1 %v4779_v54  ;;  %v2848_v54 = vrot.slane %v6476_v6, 2  ;;  %v4799_v34 = vpack.c.bf16 %v4388_v22, %v4386_v23  ;;  %v3047_v22 = vrot.slane %v6450_v12, 3 }
 0x313   : > { %4329 = vmatmul.mubr.msk.f32.gmra.mrb[60].mxu1 %vm2358_vm5, %v6547_v15  ;;  %v4374_v15 = vld [vmem:[%s7291_s3 + $0x2f8] sm:$0xff]  ;;  %v2850_v56 = vsel %vm2838_vm7, %v2848_v54, %v2849_v63  ;;  %v4417_v63 = vld [vmem:[%s7291_s3 + $0x410] sm:$0xff]  ;;  %v4420_v54 = vld [vmem:[%s7291_s3 + $0x428] sm:$0xff] }
 0x314   : > { %4782 = vmatpush1.bf16.msra.mxu1 %v4781_v33  ;;  %2831 = vmatprep.mubr.f32.mxu1 %v7306_v18  ;;  %v4787_v43 = vpack.c.bf16 %v4376_v27, %v4374_v15  ;;  %v4385_v33 = vld [vmem:[%s7291_s3 + $0x350] sm:$0xff]  ;;  %v4394_v15 = vld [vmem:[%s7291_s3 + $0x398] sm:$0xff]  ;;  %v4396_v27 = vld [vmem:[%s7291_s3 + $0x3a8] sm:$0xff] }
 0x315   : > { %2938 = vmatprep.subr.mxu1 %v4360_v24  ;;  %v4387_v24 = vld [vmem:[%s7291_s3 + $0x360] sm:$0xff] }
 0x317   : > { %4330 = vmatmul.mubr.msk.f32.gmra.mrb[62].mxu1 %vm2358_vm5, %v6569_v52  ;;  %v2843_v52 = vrot.slane %v6396_v61, 2 }
 0x318   : > { %2939 = vmatpush1.msra.mxu1 %v4359_v51  ;;  %2974 = vmatprep.mubr.f32.mxu1 %v7306_v18  ;;  %v4392_v51 = vld [vmem:[%s7291_s3 + $0x388] sm:$0xff] }
 0x319   : > { %4784 = vmatprep.subr.bf16.mxu1 %v4783_v4  ;;  %v2844_v31 = vsel %vm2838_vm7, %v2842_v29, %v2843_v52  ;;  %v4801_v4 = vpack.c.bf16 %v4387_v24, %v4385_v33  ;;  %v4803_v8 = vpack.c.bf16 %v4392_v51, %v4390_v14  ;;  %v4410_v52 = vld [vmem:[%s7291_s3 + $0x3d8] sm:$0xff]  ;;  %v4409_v29 = vld [vmem:[%s7291_s3 + $0x3d0] sm:$0xff] }
 0x31a   : > { %v4813_v0 = vpack.c.bf16 %v4409_v29, %v4407_v50  ;;  %v4421_v14 = vld [vmem:[%s7291_s3 + $0x430] sm:$0xff]  ;;  %v4434_v50 = vld [vmem:[%s7291_s3 + $0x498] sm:$0xff] }
 0x31b   : > { %4361 = vmatmul.mubr.msk.f32.vlgmr.msra.gmra.mrb[48].mxu1 %vm2358_vm5, %v2841_v37  ;;  %v4408_v37 = vld [vmem:[%s7291_s3 + $0x3c8] sm:$0xff] }
 0x31c   : > { %4786 = vmatpush1.bf16.msra.mxu1 %v4785_v59  ;;  %2980 = vmatprep.mubr.f32.mxu1 %v7306_v18  ;;  %v4807_v59 = vpack.c.bf16 %v4396_v27, %v4394_v15  ;;  %v4811_v28 = vpack.c.bf16 %v4410_v52, %v4408_v37  ;;  %v4427_v52 = vld [vmem:[%s7291_s3 + $0x460] sm:$0xff] }
 0x31d   : > { %4788 = vmatprep.subr.bf16.mxu1 %v4787_v43  ;;  %v4393_v43 = vld [vmem:[%s7291_s3 + $0x390] sm:$0xff] }
 0x31f   : > { %4362 = vmatmul.mubr.msk.f32.gmra.mrb[50].mxu1 %vm2358_vm5, %v2844_v31 }
 0x320   : > { %4790 = vmatpush1.bf16.msra.mxu1 %v4789_v62  ;;  %2986 = vmatprep.mubr.f32.mxu1 %v7306_v18  ;;  %v3041_v62 = vrot.slane %v6342_v36, 3 }
 0x321   : > { %4792 = vmatprep.subr.bf16.mxu1 %v4791_v11  ;;  %v4414_v11 = vld [vmem:[%s7291_s3 + $0x3f8] sm:$0xff] }
 0x322   : > { %v3042_v10 = vsel %vm3039_vm8, %v3040_v45, %v3041_v62  ;;  %v4436_v45 = vld [vmem:[%s7291_s3 + $0x4a8] sm:$0xff] }
 0x323   : > { %4363 = vmatmul.mubr.msk.f32.gmra.mrb[52].mxu1 %vm2358_vm5, %v2847_v13  ;;  %v4415_v13 = vld [vmem:[%s7291_s3 + $0x400] sm:$0xff] }
 0x324   : > { %4794 = vmatpush1.bf16.msra.mxu1 %v4793_v32  ;;  %2992 = vmatprep.mubr.f32.mxu1 %v7306_v18  ;;  %v4418_v32 = vld [vmem:[%s7291_s3 + $0x418] sm:$0xff]  ;;  %v4821_v33 = vpack.c.bf16 %v4417_v63, %v4415_v13 }
 0x325   : > { %4796 = vmatprep.subr.bf16.mxu1 %v4795_v20  ;;  %v3043_v20 = vrot.slane %v6386_v7, 3  ;;  %v4819_v53 = vpack.c.bf16 %v4418_v32, %v4416_v21  ;;  %v3249_v7 = vrot.slane %v6476_v6, 4  ;;  %v7307_v6 = vsub.s32 1, %v6002_v49 }
 0x327   : > { %4364 = vmatmul.mubr.msk.f32.gmra.mrb[54].mxu1 %vm2358_vm5, %v2850_v56  ;;  %v4419_v56 = vld [vmem:[%s7291_s3 + $0x420] sm:$0xff] }
 0x328   : > { %4798 = vmatpush1.bf16.msra.mxu1 %v4797_v5  ;;  %2998 = vmatprep.mubr.f32.mxu1 %v7306_v18  ;;  %v4422_v5 = vld [vmem:[%s7291_s3 + $0x438] sm:$0xff]  ;;  %v4825_v15 = vpack.c.bf16 %v4421_v14, %v4419_v56  ;;  %v4447_v56 = vld [vmem:[%s7293_s5 + $0x60] sm:$0xff]  ;;  %v4448_v14 = vld [vmem:[%s7293_s5 + $0x68] sm:$0xff] }
 0x329   : > { %4800 = vmatprep.subr.bf16.mxu1 %v4799_v34  ;;  %v3046_v34 = vrot.slane %v6440_v48, 3  ;;  %v4823_v24 = vpack.c.bf16 %v4422_v5, %v4420_v54 }
 0x32b   : > { %4365 = vmatmul.mubr.msk.f32.gmra.mrb[56].mxu1 %vm2358_vm5, %v6507_v40  ;;  %v4809_v40 = vpack.c.bf16 %v4395_v16, %v4393_v43  ;;  %v3048_v51 = vsel %vm3039_vm8, %v3046_v34, %v3047_v22  ;;  %v4428_v16 = vld [vmem:[%s7291_s3 + $0x468] sm:$0xff] }
 0x32c   : > { %4802 = vmatpush1.bf16.msra.mxu1 %v4801_v4  ;;  %3004 = vmatprep.mubr.f32.mxu1 %v7306_v18  ;;  %v3050_v4 = vrot.slane %v6480_v3, 3 }
 0x32d   : > { %4804 = vmatprep.subr.bf16.mxu1 %v4803_v8  ;;  %v4424_v8 = vld [vmem:[%s7291_s3 + $0x448] sm:$0xff] }
 0x32e   : > { %v4827_v27 = vpack.c.bf16 %v4426_v38, %v4424_v8  ;;  %v3051_v43 = vsel %vm3039_vm8, %v3049_v26, %v3050_v4 }
 0x32f   : > { %4366 = vmatmul.mubr.msk.f32.gmra.mrb[58].mxu1 %vm2358_vm5, %v6534_v2  ;;  %v4397_v2 = vld [vmem:[%s7291_s3 + $0x3b0] sm:$0xff] }
 0x330   : > { %4806 = vmatpush1.bf16.msra.mxu1 %v4805_v17  ;;  %3010 = vmatprep.mubr.f32.mxu1 %v7306_v18  ;;  %v4423_v17 = vld [vmem:[%s7291_s3 + $0x440] sm:$0xff] }
 0x331   : > { %4808 = vmatprep.subr.bf16.mxu1 %v4807_v59  ;;  %v4425_v59 = vld [vmem:[%s7291_s3 + $0x450] sm:$0xff] }
 0x333   : > { %4367 = vmatmul.mubr.msk.f32.gmra.mrb[60].mxu1 %vm2358_vm5, %v6559_v19  ;;  %v4412_v19 = vld [vmem:[%s7291_s3 + $0x3e8] sm:$0xff] }
 0x334   : > { %4810 = vmatpush1.bf16.msra.mxu1 %v4809_v40  ;;  %3016 = vmatprep.mubr.f32.mxu1 %v7306_v18  ;;  %v4815_v31 = vpack.c.bf16 %v4414_v11, %v4412_v19  ;;  %v4430_v40 = vld [vmem:[%s7291_s3 + $0x478] sm:$0xff]  ;;  %v4431_v19 = vld [vmem:[%s7291_s3 + $0x480] sm:$0xff]  ;;  %v4433_v11 = vld [vmem:[%s7291_s3 + $0x490] sm:$0xff] }
 0x335   : > { %3139 = vmatprep.subr.mxu1 %v4398_v46  ;;  %v4829_v46 = vpack.c.bf16 %v4425_v59, %v4423_v17  ;;  %v4831_v37 = vpack.c.bf16 %v4430_v40, %v4428_v16 }
 0x337   : > { %4368 = vmatmul.mubr.msk.f32.gmra.mrb[62].mxu1 %vm2358_vm5, %v6589_v35  ;;  %v3044_v35 = vrot.slane %v6396_v61, 3  ;;  %v3250_v61 = vrot.slane %v6480_v3, 4 }
 0x338   : > { %3140 = vmatpush1.msra.mxu1 %v4397_v2  ;;  %3175 = vmatprep.mubr.f32.mxu1 %v7306_v18  ;;  %v4429_v2 = vld [vmem:[%s7291_s3 + $0x470] sm:$0xff] }
 0x339   : > { %4812 = vmatprep.subr.bf16.mxu1 %v4811_v28  ;;  %v3045_v23 = vsel %vm3039_vm8, %v3043_v20, %v3044_v35  ;;  %v4432_v28 = vld [vmem:[%s7291_s3 + $0x488] sm:$0xff]  ;;  %v4833_v29 = vpack.c.bf16 %v4429_v2, %v4427_v52  ;;  %v3251_v35 = vsel %vm474_vm0, %v3249_v7, %v3250_v61  ;;  %v4445_v20 = vld [vmem:[%s7293_s5 + $0x50] sm:$0xff] }
 0x33a   : > { %v4835_v62 = vpack.c.bf16 %v4434_v50, %v4432_v28  ;;  %v4453_v52 = vld [vmem:[%s7293_s5 + $0x90] sm:$0xff]  ;;  %v4454_v28 = vld [vmem:[%s7293_s5 + $0x98] sm:$0xff] }
 0x33b   : > { %4399 = vmatmul.mubr.msk.f32.vlgmr.msra.gmra.mrb[48].mxu1 %vm2358_vm5, %v3042_v10  ;;  %v3247_v10 = vrot.slane %v6450_v12, 4 }
 0x33c   : > { %4814 = vmatpush1.bf16.msra.mxu1 %v4813_v0  ;;  %3181 = vmatprep.mubr.f32.mxu1 %v7306_v18  ;;  %v3241_v0 = vrot.slane %v6342_v36, 4  ;;  %v3245_v36 = vsel %vm474_vm0, %v3243_v1, %v3244_v47 }
 0x33d   : > { %4816 = vmatprep.subr.bf16.mxu1 %v4815_v31  ;;  %v3240_v31 = vrot.slane %v6332_v44, 4  ;;  %v3246_v44 = vrot.slane %v6440_v48, 4  ;;  %v3440_v48 = vld [vmem:[%s7292_s4] sm:$0x3] }
 0x33e   : > { %v6975_v12 = vrot.slane %v3440_v48, %v2085_v60  ;;  %v6979_v3 = vrot.slane %v3440_v48, %v7307_v6 }
 0x33f   : > { %4400 = vmatmul.mubr.msk.f32.gmra.mrb[50].mxu1 %vm2358_vm5, %v3045_v23 }
 0x340   : > { %4818 = vmatpush1.bf16.msra.mxu1 %v4817_v55  ;;  %3187 = vmatprep.mubr.f32.mxu1 %v7306_v18  ;;  %v4446_v55 = vld [vmem:[%s7293_s5 + $0x58] sm:$0xff] }
 0x341   : > { %4820 = vmatprep.subr.bf16.mxu1 %v4819_v53  ;;  %v5281_v53 = vmov 0.0|0.0   ;;  %v4840_v13 = vpack.c.bf16 %v4446_v55, %v4445_v20 }
 0x343   : > { %4401 = vmatmul.mubr.msk.f32.gmra.mrb[52].mxu1 %vm2358_vm5, %v3048_v51  ;;  %v4843_v51 = vpack.c.bf16 %v4448_v14, %v4447_v56 }
 0x344   : > { %4822 = vmatpush1.bf16.msra.mxu1 %v4821_v33  ;;  %3193 = vmatprep.mubr.f32.mxu1 %v7306_v18 }
 0x345   : > { %4824 = vmatprep.subr.bf16.mxu1 %v4823_v24 }
 0x347   : > { %4402 = vmatmul.mubr.msk.f32.gmra.mrb[54].mxu1 %vm2358_vm5, %v3051_v43 }
 0x348   : > { %4826 = vmatpush1.bf16.msra.mxu1 %v4825_v15  ;;  %3199 = vmatprep.mubr.f32.mxu1 %v7306_v18  ;;  %v4449_v15 = vld [vmem:[%s7293_s5 + $0x70] sm:$0xff] }
 0x349   : > { %4828 = vmatprep.subr.bf16.mxu1 %v4827_v27  ;;  %v4450_v27 = vld [vmem:[%s7293_s5 + $0x78] sm:$0xff] }
 0x34a   : > { %v4846_v17 = vpack.c.bf16 %v4450_v27, %v4449_v15 }
 0x34b   : > { %4403 = vmatmul.mubr.msk.f32.gmra.mrb[56].mxu1 %vm2358_vm5, %v6510_v58  ;;  %v4837_v58 = vpack.c.bf16 %v4433_v11, %v4431_v19  ;;  %v4852_v19 = vpack.c.bf16 %v4454_v28, %v4453_v52  ;;  %v3566_v52 = vld [vmem:[%s7293_s5 + $0x38] sm:$0xff] }
 0x34c   : > { %4830 = vmatpush1.bf16.msra.mxu1 %v4829_v46  ;;  %3205 = vmatprep.mubr.f32.mxu1 %v7306_v18  ;;  %v4451_v46 = vld [vmem:[%s7293_s5 + $0x80] sm:$0xff] }
 0x34d   : > { %4832 = vmatprep.subr.bf16.mxu1 %v4831_v37  ;;  %v4452_v37 = vld [vmem:[%s7293_s5 + $0x88] sm:$0xff] }
 0x34e   : > { %v4849_v2 = vpack.c.bf16 %v4452_v37, %v4451_v46  ;;  %v3565_v37 = vld [vmem:[%s7293_s5 + $0x30] sm:$0xff] }
 0x34f   : > { %4404 = vmatmul.mubr.msk.f32.gmra.mrb[58].mxu1 %vm2358_vm5, %v6537_v57  ;;  %v4435_v57 = vld [vmem:[%s7291_s3 + $0x4a0] sm:$0xff] }
 0x350   : > { %4834 = vmatpush1.bf16.msra.mxu1 %v4833_v29  ;;  %3211 = vmatprep.mubr.f32.mxu1 %v7306_v18 }
 0x351   : > { %4836 = vmatprep.subr.bf16.mxu1 %v4835_v62 }
 0x353   : > { %4405 = vmatmul.mubr.msk.f32.gmra.mrb[60].mxu1 %vm2358_vm5, %v6562_v39  ;;  %v3242_v39 = vsel %vm474_vm0, %v3240_v31, %v3241_v0 }
 0x354   : > { %4838 = vmatpush1.bf16.msra.mxu1 %v4837_v58  ;;  %3217 = vmatprep.mubr.f32.mxu1 %v7306_v18 }
 0x355   : > { %3339 = vmatprep.subr.mxu1 %v4436_v45 }
 0x357   : > { %4406 = vmatmul.mubr.msk.f32.gmra.mrb[62].mxu1 %vm2358_vm5, %v6592_v25  ;;  %v3248_v25 = vsel %vm474_vm0, %v3246_v44, %v3247_v10 }
 0x358   : > { %3340 = vmatpush1.msra.mxu1 %v4435_v57  ;;  %3375 = vmatprep.mubr.f32.mxu1 %v7306_v18 }
 0x359   : > { %4839 = vmatprep.subr.bf16.mxu1 %v5281_v53 }
 0x35b   : > { %4437 = vmatmul.mubr.msk.f32.vlgmr.msra.gmra.mrb[48].mxu1 %vm2358_vm5, %v3242_v39 }
 0x35c   : > { %3381 = vmatprep.mubr.f32.mxu1 %v7306_v18  ;;  %4841 = vmatpush3.bf16.msra.mxu1 %v4840_v13 }
 0x35d   : > { %4842 = vmatprep.subr.bf16.mxu1 %v5281_v53 }
 0x35f   : > { %4438 = vmatmul.mubr.msk.f32.gmra.mrb[50].mxu1 %vm2358_vm5, %v3245_v36 }
 0x360   : > { %3387 = vmatprep.mubr.f32.mxu1 %v7306_v18  ;;  %4844 = vmatpush3.bf16.msra.mxu1 %v4843_v51 }
 0x361   : > { %4845 = vmatprep.subr.bf16.mxu1 %v5281_v53 }
 0x363   : > { %4439 = vmatmul.mubr.msk.f32.gmra.mrb[52].mxu1 %vm2358_vm5, %v3248_v25 }
 0x364   : > { %3393 = vmatprep.mubr.f32.mxu1 %v7306_v18  ;;  %4847 = vmatpush3.bf16.msra.mxu1 %v4846_v17  ;;  %v3561_v17 = vld [vmem:[%s7293_s5 + $0x10] sm:$0xff] }
 0x365   : > { %4848 = vmatprep.subr.bf16.mxu1 %v5281_v53 }
 0x367   : > { %4440 = vmatmul.mubr.msk.f32.gmra.mrb[54].mxu1 %vm2358_vm5, %v3251_v35 }
 0x368   : > { %3399 = vmatprep.mubr.f32.mxu1 %v7306_v18  ;;  %4850 = vmatpush3.bf16.msra.mxu1 %v4849_v2 }
 0x369   : > { %4851 = vmatprep.subr.bf16.mxu1 %v5281_v53 }
 0x36b   : > { %4441 = vmatmul.mubr.msk.f32.gmra.mrb[56].mxu1 %vm2358_vm5, %v6514_v41 }
 0x36c   : > { %3405 = vmatprep.mubr.f32.mxu1 %v7306_v18  ;;  %4853 = vmatpush3.bf16.msra.mxu1 %v4852_v19  ;;  %v3567_v19 = vld [vmem:[%s7293_s5 + $0x40] sm:$0xff] }
 0x36d   : > { %4854 = vmatprep.subr.bf16.mxu1 %v5281_v53 }
 0x36f   : > { %4442 = vmatmul.mubr.msk.f32.gmra.mrb[58].mxu1 %vm2358_vm5, %v6541_v42 }
 0x370   : > { %3411 = vmatprep.mubr.f32.mxu1 %v7306_v18 }
 0x373   : > { %4443 = vmatmul.mubr.msk.f32.gmra.mrb[60].mxu1 %vm2358_vm5, %v6565_v30 }
 0x374   : > { %3417 = vmatprep.mubr.f32.mxu1 %v7306_v18 }
 0x377   : > { %4444 = vmatmul.mubr.msk.f32.gmra.mrb[62].mxu1 %vm2358_vm5, %v6595_v9 }
 0x378   : > { %4560 = vmatprep.mubr.msk.f32.mxu1 %vm5282_vm9, %v7306_v18 }
 0x42e   : > { %v3377_v41 = vpop.f32.mrb[48].mxu1 }
 0x42f   : > { %v6982_v42 = vadd.f32 %v6975_v12, %v3377_v41  ;;  %v3379_v30 = vpop.f32.mrb[49].mxu1 }
 0x430   : > { %v3453_v21 = vadd.f32 %v6979_v3, %v3379_v30 }
 0x431   : > { %3484 = vrot.lane.b32.xlu0 %v6982_v42, %s5280_s28 }
 0x432   : > { %3486 = vrot.lane.b32.xlu1 %v3453_v21, %s5280_s28  ;;  %v3383_v9 = vpop.f32.mrb[50].mxu1 }
 0x433   : > { %v6989_v60 = vadd.f32 %v6975_v12, %v3383_v9  ;;  %v3385_v49 = vpop.f32.mrb[51].mxu1 }
 0x434   : > { %v3455_v32 = vadd.f32 %v6979_v3, %v3385_v49 }
 0x435   : > { %3488 = vrot.lane.b32.xlu0 %v6989_v60, %s5280_s28 }
 0x436   : > { %3490 = vrot.lane.b32.xlu1 %v3455_v32, %s5280_s28  ;;  %v3389_v63 = vpop.f32.mrb[52].mxu1 }
 0x437   : > { %v7003_v23 = vadd.f32 %v6975_v12, %v3389_v63  ;;  %v3391_v22 = vpop.f32.mrb[53].mxu1 }
 0x438   : > { %v3457_v54 = vadd.f32 %v6979_v3, %v3391_v22 }
 0x439   : > { %3492 = vrot.lane.b32.xlu0 %v7003_v23, %s5280_s28 }
 0x43a   : > { %3494 = vrot.lane.b32.xlu1 %v3457_v54, %s5280_s28  ;;  %v3395_v5 = vpop.f32.mrb[54].mxu1 }
 0x43b   : > { %v7011_v34 = vadd.f32 %v6975_v12, %v3395_v5  ;;  %v3397_v33 = vpop.f32.mrb[55].mxu1 }
 0x43c   : > { %v3459_v24 = vadd.f32 %v6979_v3, %v3397_v33 }
 0x43d   : > { %3496 = vrot.lane.b32.xlu0 %v7011_v34, %s5280_s28 }
 0x43e   : > { %3498 = vrot.lane.b32.xlu1 %v3459_v24, %s5280_s28  ;;  %v3401_v4 = vpop.f32.mrb[56].mxu1 }
 0x43f   : > { %v7024_v8 = vadd.f32 %v6975_v12, %v3401_v4  ;;  %v3403_v38 = vpop.f32.mrb[57].mxu1 }
 0x440   : > { %v3461_v26 = vadd.f32 %v6979_v3, %v3403_v38  ;;  %v3560_v38 = vld [vmem:[%s7293_s5 + $0x8] sm:$0xff] }
 0x441   : > { %3500 = vrot.lane.b32.xlu0 %v7024_v8, %s5280_s28 }
 0x442   : > { %3502 = vrot.lane.b32.xlu1 %v3461_v26, %s5280_s28  ;;  %v3407_v59 = vpop.f32.mrb[58].mxu1 }
 0x443   : > { %v7038_v43 = vadd.f32 %v6975_v12, %v3407_v59  ;;  %v3409_v16 = vpop.f32.mrb[59].mxu1  ;;  %v3562_v59 = vld [vmem:[%s7293_s5 + $0x18] sm:$0xff] }
 0x444   : > { %v3463_v40 = vadd.f32 %v6979_v3, %v3409_v16  ;;  %v3563_v16 = vld [vmem:[%s7293_s5 + $0x20] sm:$0xff] }
 0x445   : > { %3504 = vrot.lane.b32.xlu0 %v7038_v43, %s5280_s28 }
 0x446   : > { %3506 = vrot.lane.b32.xlu1 %v3463_v40, %s5280_s28  ;;  %v3413_v50 = vpop.f32.mrb[60].mxu1  ;;  %v3564_v40 = vld [vmem:[%s7293_s5 + $0x28] sm:$0xff] }
 0x447   : > { %v3464_v29 = vadd.f32 %v6975_v12, %v3413_v50  ;;  %v3415_v62 = vpop.f32.mrb[61].mxu1  ;;  %v4861_v46 = vpack.c.bf16 %v3564_v40, %v3563_v16  ;;  %v4864_v50 = vpack.c.bf16 %v3566_v52, %v3565_v37  ;;  %v3935_v40 = vld [vmem:[%s7295_s7] sm:$0xff]  ;;  %v3937_v37 = vld [vmem:[%s7295_s7 + $0x10] sm:$0xff] }
 0x448   : > { %v3465_v11 = vadd.f32 %v6979_v3, %v3415_v62 }
 0x449   : > { %3508 = vrot.lane.b32.xlu0 %v3464_v29, %s5280_s28 }
 0x44a   : > { %3510 = vrot.lane.b32.xlu1 %v3465_v11, %s5280_s28  ;;  %v3419_v58 = vpop.f32.mrb[62].mxu1  ;;  %v3568_v11 = vld [vmem:[%s7293_s5 + $0x48] sm:$0xff] }
 0x44b   : > { %v3466_v45 = vadd.f32 %v6975_v12, %v3419_v58  ;;  %v3421_v57 = vpop.f32.mrb[63].mxu1 }
 0x44c   : > { %v3467_v0 = vadd.f32 %v6979_v3, %v3421_v57  ;;  %v4867_v57 = vpack.c.bf16 %v3568_v11, %v3567_v19  ;;  %v3941_v19 = vld [vmem:[%s7295_s7 + $0x30] sm:$0x3] }
 0x44d   : > { %3512 = vrot.lane.b32.xlu0 %v3466_v45, %s5280_s28 }
 0x44e   : > { %3514 = vrot.lane.b32.xlu1 %v3467_v0, %s5280_s28  ;;  %s326_s28 = sand.u32 1, %s5267_s10  }
 0x44f   : > { %s4119_s29 = sshll.u32 %s326_s28, 3  ;;  %s4043_s17 = scalar_lea.sflag [#allocation5], %s326_s28 }
 0x450   : > { %s328_s26 = scalar_lea.vmem [#allocation4], %s4119_s29 }
 0x451   : > { %s4056_s27 = sshll.u32 %s328_s26, 4  ;;  %s7247_s27 = int_to_ptr.vmem [resolvable:$true] %s4056_s27 }
 0x452   : > { %s5213_s18 = scalar_lea.vmem %s7247_s27, 128  ;;  %p5220_p0 = scmp.lt.s32.totalorder %s7247_s27, %s5218_s22 }
 0x453   : > { %p5214_p11 = scmp.ne.s32.totalorder %s7247_s27, %s5213_s18  ;;  %p5221_p1 = scmp.lt.s32.totalorder %s5219_s23, %s5213_s18 }
 0x455   : > { %p5215_p12 = pnand %p5214_p11, %p5372_p5  ;;  %p5222_p2 = por %p5221_p1, %p5220_p0 }
 0x457   : > { %p5216_p13 = pneg %p5215_p12 }
 0x459   : > { %p5223_p3 = pnand %p5222_p2, %p5216_p13 }
 0x4a3   : > { %v3485_v31 = vpop.permute.xlu0 %3484 }
 0x4a4   : > { %v3487_v39 = vpop.permute.xlu1 %3486 }
 0x4a5   : > { %v3517_v47 = vsel %vm3516_vm10, %v3485_v31, %v3487_v39  ;;  %v4457_v31 = vld [vmem:[%s7293_s5 + $0xa0] sm:$0xff]  ;;  %v4458_v39 = vld [vmem:[%s7293_s5 + $0xa8] sm:$0xff] }
 0x4a6   : > { %v3533_v1 = vmax.f32 %v6982_v42, %v3517_v47  ;;  %v4870_v47 = vpack.c.bf16 %v4458_v39, %v4457_v31 }
 0x4a7   : > { %v3489_v36 = vpop.permute.xlu0 %3488 }
 0x4a8   : > { %3542 = vst.msk [vmem:[#allocation3] sm:$0xff] %vm3541_vm11, %v3533_v1  ;;  %v3491_v10 = vpop.permute.xlu1 %3490 }
 0x4a9   : > { %v3518_v44 = vsel %vm3516_vm10, %v3489_v36, %v3491_v10  ;;  %v4459_v36 = vld [vmem:[%s7293_s5 + $0xb0] sm:$0xff]  ;;  %v4460_v10 = vld [vmem:[%s7293_s5 + $0xb8] sm:$0xff] }
 0x4aa   : > { %v3534_v25 = vmax.f32 %v6989_v60, %v3518_v44  ;;  %v4873_v44 = vpack.c.bf16 %v4460_v10, %v4459_v36 }
 0x4ab   : > { %v3493_v61 = vpop.permute.xlu0 %3492 }
 0x4ac   : > { %3543 = vst.msk [vmem:[#allocation3 + $0x8] sm:$0xff] %vm3541_vm11, %v3534_v25  ;;  %v3495_v7 = vpop.permute.xlu1 %3494  ;;  %v4461_v25 = vld [vmem:[%s7293_s5 + $0xc0] sm:$0xff] }
 0x4ad   : > { %v3519_v35 = vsel %vm3516_vm10, %v3493_v61, %v3495_v7  ;;  %v4462_v61 = vld [vmem:[%s7293_s5 + $0xc8] sm:$0xff] }
 0x4ae   : > { %v3535_v48 = vmax.f32 %v7003_v23, %v3519_v35  ;;  %v4876_v7 = vpack.c.bf16 %v4462_v61, %v4461_v25  ;;  %v4463_v35 = vld [vmem:[%s7293_s5 + $0xd0] sm:$0xff]  ;;  %v4480_v25 = vld [vmem:[%s7296_s8] ss:$0 sm:$0xff] }
 0x4af   : > { %v3497_v12 = vpop.permute.xlu0 %3496 }
 0x4b0   : > { %3544 = vst.msk [vmem:[#allocation3 + $0x10] sm:$0xff] %vm3541_vm11, %v3535_v48  ;;  %v3499_v6 = vpop.permute.xlu1 %3498  ;;  %v4464_v48 = vld [vmem:[%s7293_s5 + $0xd8] sm:$0xff] }
 0x4b1   : > { %v3520_v3 = vsel %vm3516_vm10, %v3497_v12, %v3499_v6 }
 0x4b2   : > { %v3536_v41 = vmax.f32 %v7011_v34, %v3520_v3  ;;  %v4879_v3 = vpack.c.bf16 %v4464_v48, %v4463_v35 }
 0x4b3   : > { %v3501_v42 = vpop.permute.xlu0 %3500 }
 0x4b4   : > { %3545 = vst.msk [vmem:[#allocation3 + $0x18] sm:$0xff] %vm3541_vm11, %v3536_v41  ;;  %v3503_v30 = vpop.permute.xlu1 %3502 }
 0x4b5   : > { %v3521_v21 = vsel %vm3516_vm10, %v3501_v42, %v3503_v30  ;;  %v4465_v30 = vld [vmem:[%s7293_s5 + $0xe0] sm:$0xff] }
 0x4b6   : > { %v3537_v9 = vmax.f32 %v7024_v8, %v3521_v21  ;;  %v3559_v8 = vld [vmem:[%s7293_s5] sm:$0xff]  ;;  %v4466_v21 = vld [vmem:[%s7293_s5 + $0xe8] sm:$0xff] }
 0x4b7   : > { %v3505_v60 = vpop.permute.xlu0 %3504  ;;  %v4855_v15 = vpack.c.bf16 %v3560_v38, %v3559_v8 }
 0x4b8   : > { %3546 = vst.msk [vmem:[#allocation3 + $0x20] sm:$0xff] %vm3541_vm11, %v3537_v9  ;;  %v3507_v49 = vpop.permute.xlu1 %3506 }
 0x4b9   : > { %v3522_v32 = vsel %vm3516_vm10, %v3505_v60, %v3507_v49  ;;  %v4882_v49 = vpack.c.bf16 %v4466_v21, %v4465_v30 }
 0x4ba   : > { %v3538_v20 = vmax.f32 %v7038_v43, %v3522_v32  ;;  %v4858_v43 = vpack.c.bf16 %v3562_v59, %v3561_v17 }
 0x4bb   : > { %v3509_v55 = vpop.permute.xlu0 %3508  ;;  %v3570_v33 = vld [vmem:[#allocation3 + $0x2] ss:$8 sm:$0xf]  ;;  %v3574_v24 = vld [vmem:[#allocation3 + $0x3] ss:$8 sm:$0xf] }
 0x4bc   : > { %3547 = vst.msk [vmem:[#allocation3 + $0x28] sm:$0xff] %vm3541_vm11, %v3538_v20  ;;  %v3511_v13 = vpop.permute.xlu1 %3510  ;;  %v3554_v62 = vld [vmem:[#allocation3 + $0x1] ss:$8 sm:$0xf] }
 0x4bd   : > { %v3523_v63 = vsel %vm3516_vm10, %v3509_v55, %v3511_v13  ;;  %v3737_v41 = vld [vmem:[#allocation3 + $0x4] ss:$8 sm:$0xf]  ;;  %v3741_v42 = vld [vmem:[#allocation3 + $0x5] ss:$8 sm:$0xf] }
 0x4be   : > { %v3539_v23 = vmax.f32 %v3464_v29, %v3523_v63  ;;  %v3550_v29 = vld [vmem:[#allocation3] ss:$8 sm:$0xf]  ;;  %v3832_v8 = vld [vmem:[#allocation3 + $0x6] ss:$8 sm:$0xf] }
 0x4bf   : > { %v3513_v22 = vpop.permute.xlu0 %3512  ;;  %v4468_v20 = vld [vmem:[%s7293_s5 + $0xf0] sm:$0xff]  ;;  %v4469_v55 = vld [vmem:[%s7293_s5 + $0xf8] sm:$0xff] }
 0x4c0   : > { %3548 = vst.msk [vmem:[#allocation3 + $0x30] sm:$0xff] %vm3541_vm11, %v3539_v23  ;;  %v3515_v54 = vpop.permute.xlu1 %3514  ;;  %v4885_v13 = vpack.c.bf16 %v4469_v55, %v4468_v20  ;;  %v4470_v23 = vld [vmem:[%s7293_s5 + $0x100] sm:$0xff] }
 0x4c1   : > { %v3524_v5 = vsel %vm3516_vm10, %v3513_v22, %v3515_v54  ;;  %v4471_v22 = vld [vmem:[%s7293_s5 + $0x108] sm:$0xff] }
 0x4c2   : > { %v3540_v34 = vmax.f32 %v3466_v45, %v3524_v5  ;;  %v4888_v54 = vpack.c.bf16 %v4471_v22, %v4470_v23  ;;  %v4472_v5 = vld [vmem:[%s7293_s5 + $0x110] sm:$0xff] }
 0x4c3   : > { %v3836_v38 = vld [vmem:[#allocation3 + $0x7] ss:$8 sm:$0xf] }
 0x4c4   : > { %3549 = vst.msk [vmem:[#allocation3 + $0x38] sm:$0xff] %vm3541_vm11, %v3540_v34  ;;  %v4473_v34 = vld [vmem:[%s7293_s5 + $0x118] sm:$0xff] }
 0x4cb   : > { %v3571_v56 = vld [vmem:[#allocation3 + $0x2] ss:$8 sm:$0xf0]  ;;  %v3575_v14 = vld [vmem:[#allocation3 + $0x3] ss:$8 sm:$0xf0] }
 0x4cc   : > { %v3572_v51 = vor.u32 %v3571_v56, %v3570_v33  ;;  %v3576_v4 = vor.u32 %v3575_v14, %v3574_v24  ;;  %v3551_v2 = vld [vmem:[#allocation3] ss:$8 sm:$0xf0]  ;;  %v3555_v28 = vld [vmem:[#allocation3 + $0x1] ss:$8 sm:$0xf0]  ;;  %v4891_v33 = vpack.c.bf16 %v4473_v34, %v4472_v5 }
 0x4cd   : > { %v3552_v58 = vor.u32 %v3551_v2, %v3550_v29  ;;  %v3556_v45 = vor.u32 %v3555_v28, %v3554_v62  ;;  %v3738_v12 = vld [vmem:[#allocation3 + $0x4] ss:$8 sm:$0xf0]  ;;  %v3742_v6 = vld [vmem:[#allocation3 + $0x5] ss:$8 sm:$0xf0] }
 0x4ce   : > { %v3577_v26 = vmax.f32 %v3572_v51, %v3576_v4  ;;  %v3739_v9 = vor.u32 %v3738_v12, %v3737_v41  ;;  %v3743_v60 = vor.u32 %v3742_v6, %v3741_v42  ;;  %v4474_v24 = vld [vmem:[%s7293_s5 + $0x120] sm:$0xff]  ;;  %v4475_v56 = vld [vmem:[%s7293_s5 + $0x128] sm:$0xff]  ;;  %v3938_v2 = vld [vmem:[%s7295_s7 + $0x18] sm:$0xff] }
 0x4cf   : > { %v3557_v0 = vmax.f32 %v3552_v58, %v3556_v45  ;;  %v3833_v14 = vld [vmem:[#allocation3 + $0x6] ss:$8 sm:$0xf0]  ;;  %v3837_v51 = vld [vmem:[#allocation3 + $0x7] ss:$8 sm:$0xf0]  ;;  %v4894_v4 = vpack.c.bf16 %v4475_v56, %v4474_v24  ;;  %v4903_v28 = vpack.c.bf16 %v3938_v2, %v3937_v37 }
 0x4d0   : > { %v3578_v27 = vmax.f32 %v3577_v26, 0.0  ;;  %v3744_v32 = vmax.f32 %v3739_v9, %v3743_v60  ;;  %v4476_v26 = vld [vmem:[%s7293_s5 + $0x130] sm:$0xff]  ;;  %v3838_v17 = vor.u32 %v3837_v51, %v3836_v38  ;;  %v3940_v29 = vld [vmem:[%s7295_s7 + $0x28] sm:$0xff] }
 0x4d1   : > { %v3558_v1 = vmax.f32 %v3557_v0, 0.0 }
 0x4d2   : > { %4561 = vmatmul.mubr.msk.f32.vlgmr.msra.gmra.mrb[64].mxu1 %vm3541_vm11, %v3578_v27  ;;  %v3745_v63 = vmax.f32 %v3744_v32, 0.0  ;;  %v3834_v27 = vor.u32 %v3833_v14, %v3832_v8 }
 0x4d3   : > { %4856 = vmatpush3.bf16.msra.mxu1 %v4855_v15  ;;  %4583 = vmatprep.mubr.msk.f32.mxu1 %vm5282_vm9, %v7306_v18  ;;  %v4477_v15 = vld [vmem:[%s7293_s5 + $0x138] sm:$0xff] }
 0x4d4   : > { %4857 = vmatprep.subr.bf16.mxu1 %v5281_v53  ;;  %v4897_v59 = vpack.c.bf16 %v4477_v15, %v4476_v26 }
 0x4d7   : > { %4859 = vmatpush3.bf16.msra.mxu1 %v4858_v43  ;;  %v3839_v43 = vmax.f32 %v3834_v27, %v3838_v17 }
 0x4d8   : > { %4860 = vmatprep.subr.bf16.mxu1 %v5281_v53 }
 0x4d9   : > { %v3840_v16 = vmax.f32 %v3839_v43, 0.0 }
 0x4db   : > { %4862 = vmatpush3.bf16.msra.mxu1 %v4861_v46  ;;  %v3936_v46 = vld [vmem:[%s7295_s7 + $0x8] sm:$0xff] }
 0x4dc   : > { %4863 = vmatprep.subr.bf16.mxu1 %v5281_v53  ;;  %v4900_v52 = vpack.c.bf16 %v3936_v46, %v3935_v40 }
 0x4df   : > { %4865 = vmatpush3.bf16.msra.mxu1 %v4864_v50  ;;  %v3939_v50 = vld [vmem:[%s7295_s7 + $0x20] sm:$0xff] }
 0x4e0   : > { %4866 = vmatprep.subr.bf16.mxu1 %v5281_v53  ;;  %v4906_v62 = vpack.c.bf16 %v3940_v29, %v3939_v50 }
 0x4e3   : > { %4868 = vmatpush3.bf16.msra.mxu1 %v4867_v57 }
 0x4e4   : > { %4869 = vmatprep.subr.bf16.mxu1 %v5281_v53 }
 0x4e6   : > { %4584 = vmatmul.mubr.msk.f32.vlgmr.msra.gmra.mrb[66].mxu1 %vm3541_vm11, %v3558_v1  ;;  %v4479_v1 = vld [vmem:[%s7294_s6] ss:$0 sm:$0xff] }
 0x4e7   : > { %4871 = vmatpush3.bf16.msra.mxu1 %v4870_v47  ;;  %4606 = vmatprep.mubr.msk.f32.mxu1 %vm5282_vm9, %v7306_v18 }
 0x4e8   : > { %4872 = vmatprep.subr.bf16.mxu1 %v5281_v53 }
 0x4eb   : > { %4874 = vmatpush3.bf16.msra.mxu1 %v4873_v44 }
 0x4ec   : > { %4875 = vmatprep.subr.bf16.mxu1 %v5281_v53 }
 0x4ef   : > { %4877 = vmatpush3.bf16.msra.mxu1 %v4876_v7 }
 0x4f0   : > { %4878 = vmatprep.subr.bf16.mxu1 %v5281_v53 }
 0x4f3   : > { %4880 = vmatpush3.bf16.msra.mxu1 %v4879_v3 }
 0x4f4   : > { %4881 = vmatprep.subr.bf16.mxu1 %v5281_v53 }
 0x4f7   : > { %4883 = vmatpush3.bf16.msra.mxu1 %v4882_v49 }
 0x4f8   : > { %4884 = vmatprep.subr.bf16.mxu1 %v5281_v53 }
 0x4fa   : > { %4607 = vmatmul.mubr.msk.f32.vlgmr.msra.gmra.mrb[68].mxu1 %vm3541_vm11, %v3745_v63 }
 0x4fb   : > { %4886 = vmatpush3.bf16.msra.mxu1 %v4885_v13  ;;  %4629 = vmatprep.mubr.msk.f32.mxu1 %vm5282_vm9, %v7306_v18 }
 0x4fc   : > { %4887 = vmatprep.subr.bf16.mxu1 %v5281_v53 }
 0x4ff   : > { %4889 = vmatpush3.bf16.msra.mxu1 %v4888_v54 }
 0x500   : > { %4890 = vmatprep.subr.bf16.mxu1 %v5281_v53 }
 0x503   : > { %4892 = vmatpush3.bf16.msra.mxu1 %v4891_v33 }
 0x504   : > { %4893 = vmatprep.subr.bf16.mxu1 %v5281_v53 }
 0x507   : > { %4895 = vmatpush3.bf16.msra.mxu1 %v4894_v4 }
 0x508   : > { %4896 = vmatprep.subr.bf16.mxu1 %v5281_v53 }
 0x50b   : > { %4898 = vmatpush3.bf16.msra.mxu1 %v4897_v59 }
 0x50c   : > { %4899 = vmatprep.subr.bf16.mxu1 %v5281_v53 }
 0x50e   : > { %4630 = vmatmul.mubr.msk.f32.vlgmr.msra.gmra.mrb[70].mxu1 %vm3541_vm11, %v3840_v16 }
 0x50f   : > { %4646 = vmatprep.mubr.msk.f32.mxu1 %vm5282_vm9, %v7306_v18  ;;  %4901 = vmatpush3.bf16.msra.mxu1 %v4900_v52 }
 0x510   : > { %4902 = vmatprep.subr.bf16.mxu1 %v5281_v53 }
 0x513   : > { %4904 = vmatpush3.bf16.msra.mxu1 %v4903_v28 }
 0x514   : > { %4905 = vmatprep.subr.bf16.mxu1 %v5281_v53 }
 0x517   : > { %4907 = vmatpush3.bf16.msra.mxu1 %v4906_v62 }
 0x518   : > { %4644 = vmatprep.subr.mxu1 %v7306_v18 }
 0x51b   : > { %4645 = vmatpush3.msk.msra.mxu1 %vm3953_vm12, %v3941_v19 }
 0x5a5   : > { %v3659_v11 = vpop.f32.mrb[64].mxu1 }
 0x5a6   : > { %v4562_v53 = vpop.f32.mrb[65].mxu1 }
 0x5b9   : > { %v3732_v58 = vpop.f32.mrb[66].mxu1 }
 0x5ba   : > { %v3733_v45 = vadd.f32 %v3732_v58, %v3659_v11  ;;  %v4585_v57 = vpop.f32.mrb[67].mxu1 }
 0x5cd   : > { %v3826_v0 = vpop.f32.mrb[68].mxu1 }
 0x5ce   : > { %v3830_v31 = vadd.f32 %v3826_v0, %v3733_v45  ;;  %v4608_v39 = vpop.f32.mrb[69].mxu1 }
 0x5e1   : > { %v3921_v47 = vpop.f32.mrb[70].mxu1 }
 0x5e2   : > { %v3925_v18 = vadd.f32 %v3921_v47, %v3830_v31  ;;  %v4631_v36 = vpop.f32.mrb[71].mxu1 }
 0x5e4   : > { %v3933_v10 = vadd.f32 %v4479_v1, %v3925_v18 }
 0x5e6   : > { %v3934_v44 = vmax.f32 %v3933_v10, 0.0 }
 0x5e8   : > { %4647 = vmatmul.mubr.msk.f32.vlgmr.msra.gmra.mrb[72].mxu1 %vm3949_vm13, %v3934_v44 }
 0x6bb   : > { %v4023_v61 = vpop.f32.mrb[72].mxu1 }
 0x6bc   : > { %v4024_v7 = vadd.f32 %v4480_v25, %v4023_v61  ;;  %v4648_v35 = vpop.f32.mrb[73].mxu1 }
 0x6be   : > { %v4028_v48 = vsel %vm4027_vm14, %v4024_v7, -inf }
 0x6bf   : > { %4029 = vmax.xlane.f32.xlu0 %v4028_v48 }
 0x74c   : > { %v4030_v12 = vpop.xlane.xlu0 %4029 }
 0x74d   : > { %v4031_v6 = vsub.f32 %v4024_v7, %v4030_v12 }
 0x74f   : > { %v4032_v3 = vmul.f32 1.442695, %v4031_v6 }
 0x751   : > { %5209 = vpow2.f32 %v4032_v3 }
 0x75b   : > { %v5210_v41 = vpop.eup %5209 }
 0x75c   : > { %v4034_v42 = vsel %vm4027_vm14, %v5210_v41, 0.0 }
 0x75d   : > { %4035 = vadd.xlane.f32.xlu1 %v4034_v42 }
 0x7ea   : > { %v4036_v30 = vpop.xlane.xlu1 %4035 }
 0x7eb   : > { %5211 = vlog2.f32 %v4036_v30 }
 0x7f5   : > { %v5212_v21 = vpop.eup %5211 }
 0x7f6   : > { %v4038_v9 = vmul.f32 0.6931472, %v5212_v21 }
 0x7f8   : > { %v4039_v60 = vadd.f32 %v4038_v9, %v4030_v12 }
 0x7fa   : > { %v4040_v49 = vsub.f32 %v4024_v7, %v4039_v60 }
 0x7fc   : > { %4041 = vst.msk [vmem:[%s328_s26] sm:$0xff] %vm4027_vm14, %v4040_v49 }
 0x7fd   : > { %5226 = shalt.err (!%p5223_p3)
}
 0x7fe   : > { %s5227_s24 = scalar_lea.hbm %s7245_s16, 128  ;;  %s5231_s25 = scalar_lea.hbm %s7297_s9, 256 }
 0x7ff   : > { %p5228_p4 = scmp.ne.s32.totalorder %s7245_s16, %s5227_s24  ;;  %p5232_p9 = scmp.lt.u32.totalorder %s7245_s16, %s7297_s9 }
 0x800   : > { %p5233_p10 = scmp.lt.u32.totalorder %s5231_s25, %s5227_s24  ;;  %p5235_p12 = scmp.lt.u32.totalorder %s5227_s24, %s7245_s16 }
 0x801   : > { %p5229_p7 = pnand %p5228_p4, %p5372_p5 }
 0x802   : > { %p5234_p11 = por %p5233_p10, %p5232_p9 }
 0x803   : > { %p5230_p8 = pneg %p5229_p7 }
 0x804   : > { %p5236_p13 = por %p5235_p12, %p5234_p11 }
 0x806   : > { %p5237_p0 = pnand %p5236_p13, %p5230_p8 }
 0x808   : > { %5240 = shalt.err (!%p5237_p0)
}
 0x809   : > { %5164 = dma.vmem_to_hbm [thread:$0]  (%p5372_p5), %s7247_s27, 128, %s7245_s16, %s4043_s17  }
 0x80a PF: > { %p5170_p1 = scmp.ge.s32.totalorder %s5275_s12, 2  ;;  %s4068_s14 = sand.u32 1, %s5263_s30  }
 0x80b   : > { %s4069_s18 = scalar_lea.sflag [#allocation5], %s4068_s14 }
 0x80c   : > { %p5167_p2 = pnand %p5170_p1, %p5376_p6 }
 0x80e   : > { %5258 = dma.done.wait (!%p5167_p2), %s4069_s18, 128  }
 0x80f   : > { %5260 = vsyncadd (!%p5167_p2), %s4069_s18, 4294967168  ;;  %s7308_s13 = sld [smem:[#allocation7_spill]]  ;;  %p19_p3 = scmp.ge.s32.totalorder %s5359_s15, 4  }
 0x810   : > { %s7309_s30 = smov %s5267_s10  ;;  %s7310_s10 = smov %s5271_s11 }
 0x811   : > { %s7312_s12 = smov %s5359_s15  ;;  %21 = sbr.rel (!%p19_p3) target bundleno = 3 (0x3), region = 140 }
 0x815   : > { %s7311_s11 = smov %s7308_s13 }
 0x818   :  { %4074 = vsyncpa [#allocation5], 1 }
 0x819   :  { %4076 = vsyncpa [#allocation5 + $0x1], 1 }

</bundles_post_ra>
